<compile_context>
chip_gen: v5e
topology: v5e:2x2
jax: 0.10.0
libtpu: 0.0.40
codegen_flags: <defaults>
</compile_context>

<pallas_src>
import numpy as np

import jax
import jax.numpy as jnp
from jax import lax
from jax.experimental import pallas as pl
from jax.experimental.pallas import tpu as pltpu


# ----------------------------- fused kernel --------------------------------

def _fused_mnist_kernel(x_ref, m1_ref, b1_ref, m2_ref, b2_ref,
                        wfc_ref, bfc_ref, wout_ref, bout_ref, o_ref):
    f32 = jnp.float32
    x = x_ref[0]                                    # (28, 28) row-permuted image

    # ---- conv1 (1->16, 5x5) + ReLU + 2x2 max-pool (fused) ------------------
    # x2_half[t, c1*12 + w2] = pooled feature at channel c1, row h2 = 2t+half.
    x2_halves = []
    for half in (0, 1):
        accs = [[jnp.zeros((6, 192), f32) for _ in range(2)] for _ in range(2)]
        for pr in (0, 1):                           # output-row parity
            for ki in range(5):
                s = 2 * half + pr + ki
                start = 7 * (s % 4) + (s // 4)      # contiguous in permuted rows
                lhs = x[start:start + 6, :]         # (6, 28)
                for pc in (0, 1):                   # output-col parity
                    accs[pr][pc] = accs[pr][pc] + jnp.dot(
                        lhs, m1_ref[pc, ki], preferred_element_type=f32)
        part = jnp.maximum(jnp.maximum(accs[0][0], accs[0][1]),
                           jnp.maximum(accs[1][0], accs[1][1]))
        x2_halves.append(jnp.maximum(part + b1_ref[...], 0.0))   # (6, 192)
    x2_even, x2_odd = x2_halves                     # rows h2 = 2t / 2t+1

    # ---- conv2 (16->32, 5x5) + ReLU + 2x2 max-pool (fused) -----------------
    uacc = [[jnp.zeros((4, 128), f32) for _ in range(2)] for _ in range(2)]
    for qr in (0, 1):
        for ki in range(5):
            u = qr + ki
            src = x2_even if (u % 2 == 0) else x2_odd
            lhs2 = src[u // 2:u // 2 + 4, :]        # (4, 192) contiguous slice
            for qc in (0, 1):
                uacc[qr][qc] = uacc[qr][qc] + jnp.dot(
                    lhs2, m2_ref[qc, ki], preferred_element_type=f32)
    f = jnp.maximum(jnp.maximum(uacc[0][0], uacc[0][1]),
                    jnp.maximum(uacc[1][0], uacc[1][1]))
    f = jnp.maximum(f + b2_ref[...], 0.0)           # (4, 128): [ph, c2*4 + pw]

    # ---- fc (512->512) + ReLU, then output head (512->10, padded to 128) ---
    h = jnp.zeros((1, 512), f32)
    for ph in range(4):
        h = h + jnp.dot(f[ph:ph + 1, :], wfc_ref[ph],
                        preferred_element_type=f32)
    h = jnp.maximum(h + bfc_ref[...], 0.0)          # (1, 512)
    out = jnp.dot(h, wout_ref[...], preferred_element_type=f32) + bout_ref[...]
    o_ref[0] = out.astype(o_ref.dtype)              # (1, 128) lane-dense store


# --------------------------- parameter prep --------------------------------

def init_params(key):
    ks = jax.random.split(key, 8)
    s = 0.05
    return {
        "w1": s * jax.random.normal(ks[0], (16, 1, 5, 5), jnp.float32),
        "b1": s * jax.random.normal(ks[1], (16,), jnp.float32),
        "w2": s * jax.random.normal(ks[2], (32, 16, 5, 5), jnp.float32),
        "b2": s * jax.random.normal(ks[3], (32,), jnp.float32),
        "w_fc": s * jax.random.normal(ks[4], (512, 32 * 4 * 4), jnp.float32),
        "b_fc": s * jax.random.normal(ks[5], (512,), jnp.float32),
        "w_out": s * jax.random.normal(ks[6], (10, 512), jnp.float32),
        "b_out": s * jax.random.normal(ks[7], (10,), jnp.float32),
    }


def prepare_params(params):
    """One-time repack of PyTorch-layout weights into the kernel layouts."""
    w1 = np.asarray(params["w1"], np.float32)       # (16, 1, 5, 5)
    b1 = np.asarray(params["b1"], np.float32)
    w2 = np.asarray(params["w2"], np.float32)       # (32, 16, 5, 5)
    b2 = np.asarray(params["b2"], np.float32)
    wfc = np.asarray(params["w_fc"], np.float32)    # (512, 512) = (out, in)
    bfc = np.asarray(params["b_fc"], np.float32)
    wout = np.asarray(params["w_out"], np.float32)  # (10, 512)
    bout = np.asarray(params["b_out"], np.float32)

    c1i = np.arange(16)
    # conv1 band matrices: M1[pc, ki][w_in, c1*12 + w2] = w1[c1, 0, ki, kj]
    # with kj = w_in - (2*w2 + pc).
    m1 = np.zeros((2, 5, 28, 192), np.float32)
    w2i = np.arange(12)
    for pc in range(2):
        for ki in range(5):
            for kj in range(5):
                rows = 2 * w2i + pc + kj                              # (12,)
                cols = c1i[:, None] * 12 + w2i[None, :]               # (16, 12)
                m1[pc, ki, np.broadcast_to(rows[None, :], (16, 12)), cols] = \
                    w1[:, 0, ki, kj][:, None]
    b1r = np.repeat(b1, 12)[None, :]                                  # (1, 192)

    # conv2 band matrices:
    # M2[qc, ki][c1*12 + w2_in, c2*4 + pw] = w2[c2, c1, ki, kj]
    # with kj = w2_in - (2*pw + qc).
    m2 = np.zeros((2, 5, 192, 128), np.float32)
    pwi = np.arange(4)
    c2i = np.arange(32)
    for qc in range(2):
        for ki in range(5):
            for kj in range(5):
                w2_in = 2 * pwi + qc + kj                             # (4,)
                rows = c1i[:, None, None] * 12 + w2_in[None, None, :]  # (16,1,4)
                cols = c2i[None, :, None] * 4 + pwi[None, None, :]     # (1,32,4)
                vals = w2[:, :, ki, kj].T[:, :, None]                  # (16,32,1)
                m2[qc, ki,
                   np.broadcast_to(rows, (16, 32, 4)),
                   np.broadcast_to(cols, (16, 32, 4))] = \
                    np.broadcast_to(vals, (16, 32, 4))
    b2r = np.repeat(b2, 4)[None, :]                                    # (1, 128)

    # fc weight permuted to the kernel's (ph, c2*4+pw) feature layout
    # (this also absorbs PyTorch's CHW .view flatten order).
    wfc_r = wfc.reshape(512, 32, 4, 4)                # (j, c2, ph, pw)
    wfc_r = np.transpose(wfc_r, (2, 1, 3, 0)).reshape(4, 128, 512)
    bfc_r = bfc[None, :]                              # (1, 512)

    # output head, pre-transposed and zero-padded to 128 lanes.
    wout_p = np.zeros((512, 128), np.float32)
    wout_p[:, :10] = wout.T
    bout_p = np.zeros((1, 128), np.float32)
    bout_p[0, :10] = bout

    return {
        "m1": jnp.asarray(m1), "b1r": jnp.asarray(b1r),
        "m2": jnp.asarray(m2), "b2r": jnp.asarray(b2r),
        "wfc": jnp.asarray(wfc_r), "bfc": jnp.asarray(bfc_r),
        "wout": jnp.asarray(wout_p), "bout": jnp.asarray(bout_p),
    }


# ------------------------------ forward -------------------------------------

_ROW_PERM = np.concatenate([np.arange(r, 28, 4) for r in range(4)])


def model_mnist_forward(x_nchw, prep):
    """Forward pass of Model_mnist.  x: (B, 1, 28, 28) float32 (NCHW)."""
    B = x_nchw.shape[0]
    # Squeeze the single input channel and pre-permute rows h -> (h%4, h//4)
    # so that every row window needed in-kernel is a contiguous slice.
    x2d = x_nchw[:, 0, :, :]                                   # (B, 28, 28)
    xq = jnp.take(x2d, jnp.asarray(_ROW_PERM), axis=1)          # tiny gather

    def full(shape):
        return pl.BlockSpec(shape, lambda b, _s=shape: (0,) * len(_s))

    out_pad = pl.pallas_call(
        _fused_mnist_kernel,
        out_shape=jax.ShapeDtypeStruct((B, 1, 128), jnp.float32),
        grid=(B,),
        in_specs=[
            pl.BlockSpec((1, 28, 28), lambda b: (b, 0, 0)),     # image
            full((2, 5, 28, 192)),                              # conv1 bands
            full((1, 192)),                                     # conv1 bias
            full((2, 5, 192, 128)),                             # conv2 bands
            full((1, 128)),                                     # conv2 bias
            full((4, 128, 512)),                                # fc weight
            full((1, 512)),                                     # fc bias
            full((512, 128)),                                   # head weight
            full((1, 128)),                                     # head bias
        ],
        out_specs=pl.BlockSpec((1, 1, 128), lambda b: (b, 0, 0)),
        compiler_params=pltpu.CompilerParams(
            dimension_semantics=("parallel",)),
    )(xq, prep["m1"], prep["b1r"], prep["m2"], prep["b2r"],
      prep["wfc"], prep["bfc"], prep["wout"], prep["bout"])
    return out_pad[:, 0, :10]


# --------------------------- reference (XLA) ---------------------------------

def _reference_forward(x_nchw, params):
    dn = ("NCHW", "OIHW", "NCHW")
    hp = lax.Precision.HIGHEST
    y = lax.conv_general_dilated(x_nchw, params["w1"], (1, 1), "VALID",
                                 dimension_numbers=dn, precision=hp)
    y = jnp.maximum(y + params["b1"][None, :, None, None], 0.0)
    y = lax.reduce_window(y, -jnp.inf, lax.max, (1, 1, 2, 2), (1, 1, 2, 2),
                          "VALID")
    y = lax.conv_general_dilated(y, params["w2"], (1, 1), "VALID",
                                 dimension_numbers=dn, precision=hp)
    y = jnp.maximum(y + params["b2"][None, :, None, None], 0.0)
    y = lax.reduce_window(y, -jnp.inf, lax.max, (1, 1, 2, 2), (1, 1, 2, 2),
                          "VALID")
    feat = y.reshape(x_nchw.shape[0], 32 * 4 * 4)
    h = jnp.maximum(
        jnp.dot(feat, params["w_fc"].T, precision=hp) + params["b_fc"], 0.0)
    return jnp.dot(h, params["w_out"].T, precision=hp) + params["b_out"]


if __name__ == "__main__":
    key = jax.random.PRNGKey(0)
    k_x, k_p = jax.random.split(key)
    x = jax.random.normal(k_x, (2, 1, 28, 28), jnp.float32)  # MNIST-shaped input
    params = init_params(k_p)
    prep = prepare_params(params)          # one-time weight repack (host side)

    fwd = jax.jit(model_mnist_forward)
    logits = fwd(x, prep)
    jax.block_until_ready(logits)
    assert logits.shape == (2, 10) and logits.dtype == jnp.float32

    ref = _reference_forward(x, params)
    err = float(jnp.max(jnp.abs(logits - ref)))
    assert jnp.allclose(logits, ref, atol=2e-3, rtol=2e-2), err
    print("KERNEL_OK")
</pallas_src>

<mosaic_0001>
module attributes {stable_mosaic.version = 11 : i64} {
  func.func @_fused_mnist_kernel(%arg0: i32, %arg1: memref<1x28x28xf32, #tpu.memory_space<vmem>>, %arg2: memref<2x5x28x192xf32, #tpu.memory_space<vmem>>, %arg3: memref<1x192xf32, #tpu.memory_space<vmem>>, %arg4: memref<2x5x192x128xf32, #tpu.memory_space<vmem>>, %arg5: memref<1x128xf32, #tpu.memory_space<vmem>>, %arg6: memref<4x128x512xf32, #tpu.memory_space<vmem>>, %arg7: memref<1x512xf32, #tpu.memory_space<vmem>>, %arg8: memref<512x128xf32, #tpu.memory_space<vmem>>, %arg9: memref<1x128xf32, #tpu.memory_space<vmem>>, %arg10: memref<1x1x128xf32, #tpu.memory_space<vmem>>) attributes {dimension_semantics = [#tpu.dimension_semantics<parallel>], iteration_bounds = array<i64: 2>, scalar_prefetch = 0 : i64, scratch_operands = 0 : i64, tpu.core_type = #tpu.core_type<tc>, window_params = [{transform_indices = @transform_0, window_bounds = array<i64: 1, 28, 28>}, {pipeline_mode = #tpu.pipeline_mode<synchronous>, transform_indices = @transform_1, window_bounds = array<i64: 2, 5, 28, 192>}, {pipeline_mode = #tpu.pipeline_mode<synchronous>, transform_indices = @transform_2, window_bounds = array<i64: 1, 192>}, {pipeline_mode = #tpu.pipeline_mode<synchronous>, transform_indices = @transform_3, window_bounds = array<i64: 2, 5, 192, 128>}, {pipeline_mode = #tpu.pipeline_mode<synchronous>, transform_indices = @transform_4, window_bounds = array<i64: 1, 128>}, {pipeline_mode = #tpu.pipeline_mode<synchronous>, transform_indices = @transform_5, window_bounds = array<i64: 4, 128, 512>}, {pipeline_mode = #tpu.pipeline_mode<synchronous>, transform_indices = @transform_6, window_bounds = array<i64: 1, 512>}, {pipeline_mode = #tpu.pipeline_mode<synchronous>, transform_indices = @transform_7, window_bounds = array<i64: 512, 128>}, {pipeline_mode = #tpu.pipeline_mode<synchronous>, transform_indices = @transform_8, window_bounds = array<i64: 1, 128>}, {transform_indices = @transform_9, window_bounds = array<i64: 1, 1, 128>}]} {
    %c0 = arith.constant 0 : index
    %c0_0 = arith.constant 0 : index
    %c0_1 = arith.constant 0 : index
    %0 = vector.load %arg1[%c0, %c0_0, %c0_1] : memref<1x28x28xf32, #tpu.memory_space<vmem>>, vector<1x28x28xf32>
    %1 = vector.shape_cast %0 : vector<1x28x28xf32> to vector<28x28xf32>
    %cst = arith.constant 0.000000e+00 : f32
    %2 = vector.broadcast %cst : f32 to vector<6x192xf32>
    %cst_2 = arith.constant 0.000000e+00 : f32
    %3 = vector.broadcast %cst_2 : f32 to vector<6x192xf32>
    %cst_3 = arith.constant 0.000000e+00 : f32
    %4 = vector.broadcast %cst_3 : f32 to vector<6x192xf32>
    %cst_4 = arith.constant 0.000000e+00 : f32
    %5 = vector.broadcast %cst_4 : f32 to vector<6x192xf32>
    %6 = vector.extract_strided_slice %1 {offsets = [0, 0], sizes = [6, 28], strides = [1, 1]} : vector<28x28xf32> to vector<6x28xf32>
    %c0_5 = arith.constant 0 : index
    %c0_6 = arith.constant 0 : index
    %c0_7 = arith.constant 0 : index
    %c0_8 = arith.constant 0 : index
    %7 = vector.load %arg2[%c0_5, %c0_6, %c0_7, %c0_8] : memref<2x5x28x192xf32, #tpu.memory_space<vmem>>, vector<1x1x28x192xf32>
    %8 = vector.shape_cast %7 : vector<1x1x28x192xf32> to vector<28x192xf32>
    %cst_9 = arith.constant dense<0.000000e+00> : vector<6x192xf32>
    %9 = tpu.matmul %6, %8, %cst_9 {dimension_numbers = #tpu.dot_dimension_numbers<[1], [0], [0], [1], [0, 0, 1, 1], [], []>} : vector<6x28xf32>, vector<28x192xf32>, vector<6x192xf32> -> vector<6x192xf32>
    %10 = arith.addf %2, %9 : vector<6x192xf32>
    %c1 = arith.constant 1 : index
    %c0_10 = arith.constant 0 : index
    %c0_11 = arith.constant 0 : index
    %c0_12 = arith.constant 0 : index
    %11 = vector.load %arg2[%c1, %c0_10, %c0_11, %c0_12] : memref<2x5x28x192xf32, #tpu.memory_space<vmem>>, vector<1x1x28x192xf32>
    %12 = vector.shape_cast %11 : vector<1x1x28x192xf32> to vector<28x192xf32>
    %cst_13 = arith.constant dense<0.000000e+00> : vector<6x192xf32>
    %13 = tpu.matmul %6, %12, %cst_13 {dimension_numbers = #tpu.dot_dimension_numbers<[1], [0], [0], [1], [0, 0, 1, 1], [], []>} : vector<6x28xf32>, vector<28x192xf32>, vector<6x192xf32> -> vector<6x192xf32>
    %14 = arith.addf %3, %13 : vector<6x192xf32>
    %15 = vector.extract_strided_slice %1 {offsets = [7, 0], sizes = [6, 28], strides = [1, 1]} : vector<28x28xf32> to vector<6x28xf32>
    %c0_14 = arith.constant 0 : index
    %c1_15 = arith.constant 1 : index
    %c0_16 = arith.constant 0 : index
    %c0_17 = arith.constant 0 : index
    %16 = vector.load %arg2[%c0_14, %c1_15, %c0_16, %c0_17] : memref<2x5x28x192xf32, #tpu.memory_space<vmem>>, vector<1x1x28x192xf32>
    %17 = vector.shape_cast %16 : vector<1x1x28x192xf32> to vector<28x192xf32>
    %cst_18 = arith.constant dense<0.000000e+00> : vector<6x192xf32>
    %18 = tpu.matmul %15, %17, %cst_18 {dimension_numbers = #tpu.dot_dimension_numbers<[1], [0], [0], [1], [0, 0, 1, 1], [], []>} : vector<6x28xf32>, vector<28x192xf32>, vector<6x192xf32> -> vector<6x192xf32>
    %19 = arith.addf %10, %18 : vector<6x192xf32>
    %c1_19 = arith.constant 1 : index
    %c1_20 = arith.constant 1 : index
    %c0_21 = arith.constant 0 : index
    %c0_22 = arith.constant 0 : index
    %20 = vector.load %arg2[%c1_19, %c1_20, %c0_21, %c0_22] : memref<2x5x28x192xf32, #tpu.memory_space<vmem>>, vector<1x1x28x192xf32>
    %21 = vector.shape_cast %20 : vector<1x1x28x192xf32> to vector<28x192xf32>
    %cst_23 = arith.constant dense<0.000000e+00> : vector<6x192xf32>
    %22 = tpu.matmul %15, %21, %cst_23 {dimension_numbers = #tpu.dot_dimension_numbers<[1], [0], [0], [1], [0, 0, 1, 1], [], []>} : vector<6x28xf32>, vector<28x192xf32>, vector<6x192xf32> -> vector<6x192xf32>
    %23 = arith.addf %14, %22 : vector<6x192xf32>
    %24 = vector.extract_strided_slice %1 {offsets = [14, 0], sizes = [6, 28], strides = [1, 1]} : vector<28x28xf32> to vector<6x28xf32>
    %c0_24 = arith.constant 0 : index
    %c2 = arith.constant 2 : index
    %c0_25 = arith.constant 0 : index
    %c0_26 = arith.constant 0 : index
    %25 = vector.load %arg2[%c0_24, %c2, %c0_25, %c0_26] : memref<2x5x28x192xf32, #tpu.memory_space<vmem>>, vector<1x1x28x192xf32>
    %26 = vector.shape_cast %25 : vector<1x1x28x192xf32> to vector<28x192xf32>
    %cst_27 = arith.constant dense<0.000000e+00> : vector<6x192xf32>
    %27 = tpu.matmul %24, %26, %cst_27 {dimension_numbers = #tpu.dot_dimension_numbers<[1], [0], [0], [1], [0, 0, 1, 1], [], []>} : vector<6x28xf32>, vector<28x192xf32>, vector<6x192xf32> -> vector<6x192xf32>
    %28 = arith.addf %19, %27 : vector<6x192xf32>
    %c1_28 = arith.constant 1 : index
    %c2_29 = arith.constant 2 : index
    %c0_30 = arith.constant 0 : index
    %c0_31 = arith.constant 0 : index
    %29 = vector.load %arg2[%c1_28, %c2_29, %c0_30, %c0_31] : memref<2x5x28x192xf32, #tpu.memory_space<vmem>>, vector<1x1x28x192xf32>
    %30 = vector.shape_cast %29 : vector<1x1x28x192xf32> to vector<28x192xf32>
    %cst_32 = arith.constant dense<0.000000e+00> : vector<6x192xf32>
    %31 = tpu.matmul %24, %30, %cst_32 {dimension_numbers = #tpu.dot_dimension_numbers<[1], [0], [0], [1], [0, 0, 1, 1], [], []>} : vector<6x28xf32>, vector<28x192xf32>, vector<6x192xf32> -> vector<6x192xf32>
    %32 = arith.addf %23, %31 : vector<6x192xf32>
    %33 = vector.extract_strided_slice %1 {offsets = [21, 0], sizes = [6, 28], strides = [1, 1]} : vector<28x28xf32> to vector<6x28xf32>
    %c0_33 = arith.constant 0 : index
    %c3 = arith.constant 3 : index
    %c0_34 = arith.constant 0 : index
    %c0_35 = arith.constant 0 : index
    %34 = vector.load %arg2[%c0_33, %c3, %c0_34, %c0_35] : memref<2x5x28x192xf32, #tpu.memory_space<vmem>>, vector<1x1x28x192xf32>
    %35 = vector.shape_cast %34 : vector<1x1x28x192xf32> to vector<28x192xf32>
    %cst_36 = arith.constant dense<0.000000e+00> : vector<6x192xf32>
    %36 = tpu.matmul %33, %35, %cst_36 {dimension_numbers = #tpu.dot_dimension_numbers<[1], [0], [0], [1], [0, 0, 1, 1], [], []>} : vector<6x28xf32>, vector<28x192xf32>, vector<6x192xf32> -> vector<6x192xf32>
    %37 = arith.addf %28, %36 : vector<6x192xf32>
    %c1_37 = arith.constant 1 : index
    %c3_38 = arith.constant 3 : index
    %c0_39 = arith.constant 0 : index
    %c0_40 = arith.constant 0 : index
    %38 = vector.load %arg2[%c1_37, %c3_38, %c0_39, %c0_40] : memref<2x5x28x192xf32, #tpu.memory_space<vmem>>, vector<1x1x28x192xf32>
    %39 = vector.shape_cast %38 : vector<1x1x28x192xf32> to vector<28x192xf32>
    %cst_41 = arith.constant dense<0.000000e+00> : vector<6x192xf32>
    %40 = tpu.matmul %33, %39, %cst_41 {dimension_numbers = #tpu.dot_dimension_numbers<[1], [0], [0], [1], [0, 0, 1, 1], [], []>} : vector<6x28xf32>, vector<28x192xf32>, vector<6x192xf32> -> vector<6x192xf32>
    %41 = arith.addf %32, %40 : vector<6x192xf32>
    %42 = vector.extract_strided_slice %1 {offsets = [1, 0], sizes = [6, 28], strides = [1, 1]} : vector<28x28xf32> to vector<6x28xf32>
    %c0_42 = arith.constant 0 : index
    %c4 = arith.constant 4 : index
    %c0_43 = arith.constant 0 : index
    %c0_44 = arith.constant 0 : index
    %43 = vector.load %arg2[%c0_42, %c4, %c0_43, %c0_44] : memref<2x5x28x192xf32, #tpu.memory_space<vmem>>, vector<1x1x28x192xf32>
    %44 = vector.shape_cast %43 : vector<1x1x28x192xf32> to vector<28x192xf32>
    %cst_45 = arith.constant dense<0.000000e+00> : vector<6x192xf32>
    %45 = tpu.matmul %42, %44, %cst_45 {dimension_numbers = #tpu.dot_dimension_numbers<[1], [0], [0], [1], [0, 0, 1, 1], [], []>} : vector<6x28xf32>, vector<28x192xf32>, vector<6x192xf32> -> vector<6x192xf32>
    %46 = arith.addf %37, %45 : vector<6x192xf32>
    %c1_46 = arith.constant 1 : index
    %c4_47 = arith.constant 4 : index
    %c0_48 = arith.constant 0 : index
    %c0_49 = arith.constant 0 : index
    %47 = vector.load %arg2[%c1_46, %c4_47, %c0_48, %c0_49] : memref<2x5x28x192xf32, #tpu.memory_space<vmem>>, vector<1x1x28x192xf32>
    %48 = vector.shape_cast %47 : vector<1x1x28x192xf32> to vector<28x192xf32>
    %cst_50 = arith.constant dense<0.000000e+00> : vector<6x192xf32>
    %49 = tpu.matmul %42, %48, %cst_50 {dimension_numbers = #tpu.dot_dimension_numbers<[1], [0], [0], [1], [0, 0, 1, 1], [], []>} : vector<6x28xf32>, vector<28x192xf32>, vector<6x192xf32> -> vector<6x192xf32>
    %50 = arith.addf %41, %49 : vector<6x192xf32>
    %51 = vector.extract_strided_slice %1 {offsets = [7, 0], sizes = [6, 28], strides = [1, 1]} : vector<28x28xf32> to vector<6x28xf32>
    %c0_51 = arith.constant 0 : index
    %c0_52 = arith.constant 0 : index
    %c0_53 = arith.constant 0 : index
    %c0_54 = arith.constant 0 : index
    %52 = vector.load %arg2[%c0_51, %c0_52, %c0_53, %c0_54] : memref<2x5x28x192xf32, #tpu.memory_space<vmem>>, vector<1x1x28x192xf32>
    %53 = vector.shape_cast %52 : vector<1x1x28x192xf32> to vector<28x192xf32>
    %cst_55 = arith.constant dense<0.000000e+00> : vector<6x192xf32>
    %54 = tpu.matmul %51, %53, %cst_55 {dimension_numbers = #tpu.dot_dimension_numbers<[1], [0], [0], [1], [0, 0, 1, 1], [], []>} : vector<6x28xf32>, vector<28x192xf32>, vector<6x192xf32> -> vector<6x192xf32>
    %55 = arith.addf %4, %54 : vector<6x192xf32>
    %c1_56 = arith.constant 1 : index
    %c0_57 = arith.constant 0 : index
    %c0_58 = arith.constant 0 : index
    %c0_59 = arith.constant 0 : index
    %56 = vector.load %arg2[%c1_56, %c0_57, %c0_58, %c0_59] : memref<2x5x28x192xf32, #tpu.memory_space<vmem>>, vector<1x1x28x192xf32>
    %57 = vector.shape_cast %56 : vector<1x1x28x192xf32> to vector<28x192xf32>
    %cst_60 = arith.constant dense<0.000000e+00> : vector<6x192xf32>
    %58 = tpu.matmul %51, %57, %cst_60 {dimension_numbers = #tpu.dot_dimension_numbers<[1], [0], [0], [1], [0, 0, 1, 1], [], []>} : vector<6x28xf32>, vector<28x192xf32>, vector<6x192xf32> -> vector<6x192xf32>
    %59 = arith.addf %5, %58 : vector<6x192xf32>
    %60 = vector.extract_strided_slice %1 {offsets = [14, 0], sizes = [6, 28], strides = [1, 1]} : vector<28x28xf32> to vector<6x28xf32>
    %c0_61 = arith.constant 0 : index
    %c1_62 = arith.constant 1 : index
    %c0_63 = arith.constant 0 : index
    %c0_64 = arith.constant 0 : index
    %61 = vector.load %arg2[%c0_61, %c1_62, %c0_63, %c0_64] : memref<2x5x28x192xf32, #tpu.memory_space<vmem>>, vector<1x1x28x192xf32>
    %62 = vector.shape_cast %61 : vector<1x1x28x192xf32> to vector<28x192xf32>
    %cst_65 = arith.constant dense<0.000000e+00> : vector<6x192xf32>
    %63 = tpu.matmul %60, %62, %cst_65 {dimension_numbers = #tpu.dot_dimension_numbers<[1], [0], [0], [1], [0, 0, 1, 1], [], []>} : vector<6x28xf32>, vector<28x192xf32>, vector<6x192xf32> -> vector<6x192xf32>
    %64 = arith.addf %55, %63 : vector<6x192xf32>
    %c1_66 = arith.constant 1 : index
    %c1_67 = arith.constant 1 : index
    %c0_68 = arith.constant 0 : index
    %c0_69 = arith.constant 0 : index
    %65 = vector.load %arg2[%c1_66, %c1_67, %c0_68, %c0_69] : memref<2x5x28x192xf32, #tpu.memory_space<vmem>>, vector<1x1x28x192xf32>
    %66 = vector.shape_cast %65 : vector<1x1x28x192xf32> to vector<28x192xf32>
    %cst_70 = arith.constant dense<0.000000e+00> : vector<6x192xf32>
    %67 = tpu.matmul %60, %66, %cst_70 {dimension_numbers = #tpu.dot_dimension_numbers<[1], [0], [0], [1], [0, 0, 1, 1], [], []>} : vector<6x28xf32>, vector<28x192xf32>, vector<6x192xf32> -> vector<6x192xf32>
    %68 = arith.addf %59, %67 : vector<6x192xf32>
    %69 = vector.extract_strided_slice %1 {offsets = [21, 0], sizes = [6, 28], strides = [1, 1]} : vector<28x28xf32> to vector<6x28xf32>
    %c0_71 = arith.constant 0 : index
    %c2_72 = arith.constant 2 : index
    %c0_73 = arith.constant 0 : index
    %c0_74 = arith.constant 0 : index
    %70 = vector.load %arg2[%c0_71, %c2_72, %c0_73, %c0_74] : memref<2x5x28x192xf32, #tpu.memory_space<vmem>>, vector<1x1x28x192xf32>
    %71 = vector.shape_cast %70 : vector<1x1x28x192xf32> to vector<28x192xf32>
    %cst_75 = arith.constant dense<0.000000e+00> : vector<6x192xf32>
    %72 = tpu.matmul %69, %71, %cst_75 {dimension_numbers = #tpu.dot_dimension_numbers<[1], [0], [0], [1], [0, 0, 1, 1], [], []>} : vector<6x28xf32>, vector<28x192xf32>, vector<6x192xf32> -> vector<6x192xf32>
    %73 = arith.addf %64, %72 : vector<6x192xf32>
    %c1_76 = arith.constant 1 : index
    %c2_77 = arith.constant 2 : index
    %c0_78 = arith.constant 0 : index
    %c0_79 = arith.constant 0 : index
    %74 = vector.load %arg2[%c1_76, %c2_77, %c0_78, %c0_79] : memref<2x5x28x192xf32, #tpu.memory_space<vmem>>, vector<1x1x28x192xf32>
    %75 = vector.shape_cast %74 : vector<1x1x28x192xf32> to vector<28x192xf32>
    %cst_80 = arith.constant dense<0.000000e+00> : vector<6x192xf32>
    %76 = tpu.matmul %69, %75, %cst_80 {dimension_numbers = #tpu.dot_dimension_numbers<[1], [0], [0], [1], [0, 0, 1, 1], [], []>} : vector<6x28xf32>, vector<28x192xf32>, vector<6x192xf32> -> vector<6x192xf32>
    %77 = arith.addf %68, %76 : vector<6x192xf32>
    %78 = vector.extract_strided_slice %1 {offsets = [1, 0], sizes = [6, 28], strides = [1, 1]} : vector<28x28xf32> to vector<6x28xf32>
    %c0_81 = arith.constant 0 : index
    %c3_82 = arith.constant 3 : index
    %c0_83 = arith.constant 0 : index
    %c0_84 = arith.constant 0 : index
    %79 = vector.load %arg2[%c0_81, %c3_82, %c0_83, %c0_84] : memref<2x5x28x192xf32, #tpu.memory_space<vmem>>, vector<1x1x28x192xf32>
    %80 = vector.shape_cast %79 : vector<1x1x28x192xf32> to vector<28x192xf32>
    %cst_85 = arith.constant dense<0.000000e+00> : vector<6x192xf32>
    %81 = tpu.matmul %78, %80, %cst_85 {dimension_numbers = #tpu.dot_dimension_numbers<[1], [0], [0], [1], [0, 0, 1, 1], [], []>} : vector<6x28xf32>, vector<28x192xf32>, vector<6x192xf32> -> vector<6x192xf32>
    %82 = arith.addf %73, %81 : vector<6x192xf32>
    %c1_86 = arith.constant 1 : index
    %c3_87 = arith.constant 3 : index
    %c0_88 = arith.constant 0 : index
    %c0_89 = arith.constant 0 : index
    %83 = vector.load %arg2[%c1_86, %c3_87, %c0_88, %c0_89] : memref<2x5x28x192xf32, #tpu.memory_space<vmem>>, vector<1x1x28x192xf32>
    %84 = vector.shape_cast %83 : vector<1x1x28x192xf32> to vector<28x192xf32>
    %cst_90 = arith.constant dense<0.000000e+00> : vector<6x192xf32>
    %85 = tpu.matmul %78, %84, %cst_90 {dimension_numbers = #tpu.dot_dimension_numbers<[1], [0], [0], [1], [0, 0, 1, 1], [], []>} : vector<6x28xf32>, vector<28x192xf32>, vector<6x192xf32> -> vector<6x192xf32>
    %86 = arith.addf %77, %85 : vector<6x192xf32>
    %87 = vector.extract_strided_slice %1 {offsets = [8, 0], sizes = [6, 28], strides = [1, 1]} : vector<28x28xf32> to vector<6x28xf32>
    %c0_91 = arith.constant 0 : index
    %c4_92 = arith.constant 4 : index
    %c0_93 = arith.constant 0 : index
    %c0_94 = arith.constant 0 : index
    %88 = vector.load %arg2[%c0_91, %c4_92, %c0_93, %c0_94] : memref<2x5x28x192xf32, #tpu.memory_space<vmem>>, vector<1x1x28x192xf32>
    %89 = vector.shape_cast %88 : vector<1x1x28x192xf32> to vector<28x192xf32>
    %cst_95 = arith.constant dense<0.000000e+00> : vector<6x192xf32>
    %90 = tpu.matmul %87, %89, %cst_95 {dimension_numbers = #tpu.dot_dimension_numbers<[1], [0], [0], [1], [0, 0, 1, 1], [], []>} : vector<6x28xf32>, vector<28x192xf32>, vector<6x192xf32> -> vector<6x192xf32>
    %91 = arith.addf %82, %90 : vector<6x192xf32>
    %c1_96 = arith.constant 1 : index
    %c4_97 = arith.constant 4 : index
    %c0_98 = arith.constant 0 : index
    %c0_99 = arith.constant 0 : index
    %92 = vector.load %arg2[%c1_96, %c4_97, %c0_98, %c0_99] : memref<2x5x28x192xf32, #tpu.memory_space<vmem>>, vector<1x1x28x192xf32>
    %93 = vector.shape_cast %92 : vector<1x1x28x192xf32> to vector<28x192xf32>
    %cst_100 = arith.constant dense<0.000000e+00> : vector<6x192xf32>
    %94 = tpu.matmul %87, %93, %cst_100 {dimension_numbers = #tpu.dot_dimension_numbers<[1], [0], [0], [1], [0, 0, 1, 1], [], []>} : vector<6x28xf32>, vector<28x192xf32>, vector<6x192xf32> -> vector<6x192xf32>
    %95 = arith.addf %86, %94 : vector<6x192xf32>
    %96 = arith.maximumf %46, %50 : vector<6x192xf32>
    %97 = arith.maximumf %91, %95 : vector<6x192xf32>
    %98 = arith.maximumf %96, %97 : vector<6x192xf32>
    %c0_101 = arith.constant 0 : index
    %c0_102 = arith.constant 0 : index
    %99 = vector.load %arg3[%c0_101, %c0_102] : memref<1x192xf32, #tpu.memory_space<vmem>>, vector<1x192xf32>
    %100 = vector.broadcast %99 : vector<1x192xf32> to vector<6x192xf32>
    %101 = arith.addf %98, %100 : vector<6x192xf32>
    %cst_103 = arith.constant 0.000000e+00 : f32
    %102 = vector.broadcast %cst_103 : f32 to vector<6x192xf32>
    %103 = arith.maximumf %101, %102 : vector<6x192xf32>
    %cst_104 = arith.constant 0.000000e+00 : f32
    %104 = vector.broadcast %cst_104 : f32 to vector<6x192xf32>
    %cst_105 = arith.constant 0.000000e+00 : f32
    %105 = vector.broadcast %cst_105 : f32 to vector<6x192xf32>
    %cst_106 = arith.constant 0.000000e+00 : f32
    %106 = vector.broadcast %cst_106 : f32 to vector<6x192xf32>
    %cst_107 = arith.constant 0.000000e+00 : f32
    %107 = vector.broadcast %cst_107 : f32 to vector<6x192xf32>
    %108 = vector.extract_strided_slice %1 {offsets = [14, 0], sizes = [6, 28], strides = [1, 1]} : vector<28x28xf32> to vector<6x28xf32>
    %c0_108 = arith.constant 0 : index
    %c0_109 = arith.constant 0 : index
    %c0_110 = arith.constant 0 : index
    %c0_111 = arith.constant 0 : index
    %109 = vector.load %arg2[%c0_108, %c0_109, %c0_110, %c0_111] : memref<2x5x28x192xf32, #tpu.memory_space<vmem>>, vector<1x1x28x192xf32>
    %110 = vector.shape_cast %109 : vector<1x1x28x192xf32> to vector<28x192xf32>
    %cst_112 = arith.constant dense<0.000000e+00> : vector<6x192xf32>
    %111 = tpu.matmul %108, %110, %cst_112 {dimension_numbers = #tpu.dot_dimension_numbers<[1], [0], [0], [1], [0, 0, 1, 1], [], []>} : vector<6x28xf32>, vector<28x192xf32>, vector<6x192xf32> -> vector<6x192xf32>
    %112 = arith.addf %104, %111 : vector<6x192xf32>
    %c1_113 = arith.constant 1 : index
    %c0_114 = arith.constant 0 : index
    %c0_115 = arith.constant 0 : index
    %c0_116 = arith.constant 0 : index
    %113 = vector.load %arg2[%c1_113, %c0_114, %c0_115, %c0_116] : memref<2x5x28x192xf32, #tpu.memory_space<vmem>>, vector<1x1x28x192xf32>
    %114 = vector.shape_cast %113 : vector<1x1x28x192xf32> to vector<28x192xf32>
    %cst_117 = arith.constant dense<0.000000e+00> : vector<6x192xf32>
    %115 = tpu.matmul %108, %114, %cst_117 {dimension_numbers = #tpu.dot_dimension_numbers<[1], [0], [0], [1], [0, 0, 1, 1], [], []>} : vector<6x28xf32>, vector<28x192xf32>, vector<6x192xf32> -> vector<6x192xf32>
    %116 = arith.addf %105, %115 : vector<6x192xf32>
    %117 = vector.extract_strided_slice %1 {offsets = [21, 0], sizes = [6, 28], strides = [1, 1]} : vector<28x28xf32> to vector<6x28xf32>
    %c0_118 = arith.constant 0 : index
    %c1_119 = arith.constant 1 : index
    %c0_120 = arith.constant 0 : index
    %c0_121 = arith.constant 0 : index
    %118 = vector.load %arg2[%c0_118, %c1_119, %c0_120, %c0_121] : memref<2x5x28x192xf32, #tpu.memory_space<vmem>>, vector<1x1x28x192xf32>
    %119 = vector.shape_cast %118 : vector<1x1x28x192xf32> to vector<28x192xf32>
    %cst_122 = arith.constant dense<0.000000e+00> : vector<6x192xf32>
    %120 = tpu.matmul %117, %119, %cst_122 {dimension_numbers = #tpu.dot_dimension_numbers<[1], [0], [0], [1], [0, 0, 1, 1], [], []>} : vector<6x28xf32>, vector<28x192xf32>, vector<6x192xf32> -> vector<6x192xf32>
    %121 = arith.addf %112, %120 : vector<6x192xf32>
    %c1_123 = arith.constant 1 : index
    %c1_124 = arith.constant 1 : index
    %c0_125 = arith.constant 0 : index
    %c0_126 = arith.constant 0 : index
    %122 = vector.load %arg2[%c1_123, %c1_124, %c0_125, %c0_126] : memref<2x5x28x192xf32, #tpu.memory_space<vmem>>, vector<1x1x28x192xf32>
    %123 = vector.shape_cast %122 : vector<1x1x28x192xf32> to vector<28x192xf32>
    %cst_127 = arith.constant dense<0.000000e+00> : vector<6x192xf32>
    %124 = tpu.matmul %117, %123, %cst_127 {dimension_numbers = #tpu.dot_dimension_numbers<[1], [0], [0], [1], [0, 0, 1, 1], [], []>} : vector<6x28xf32>, vector<28x192xf32>, vector<6x192xf32> -> vector<6x192xf32>
    %125 = arith.addf %116, %124 : vector<6x192xf32>
    %126 = vector.extract_strided_slice %1 {offsets = [1, 0], sizes = [6, 28], strides = [1, 1]} : vector<28x28xf32> to vector<6x28xf32>
    %c0_128 = arith.constant 0 : index
    %c2_129 = arith.constant 2 : index
    %c0_130 = arith.constant 0 : index
    %c0_131 = arith.constant 0 : index
    %127 = vector.load %arg2[%c0_128, %c2_129, %c0_130, %c0_131] : memref<2x5x28x192xf32, #tpu.memory_space<vmem>>, vector<1x1x28x192xf32>
    %128 = vector.shape_cast %127 : vector<1x1x28x192xf32> to vector<28x192xf32>
    %cst_132 = arith.constant dense<0.000000e+00> : vector<6x192xf32>
    %129 = tpu.matmul %126, %128, %cst_132 {dimension_numbers = #tpu.dot_dimension_numbers<[1], [0], [0], [1], [0, 0, 1, 1], [], []>} : vector<6x28xf32>, vector<28x192xf32>, vector<6x192xf32> -> vector<6x192xf32>
    %130 = arith.addf %121, %129 : vector<6x192xf32>
    %c1_133 = arith.constant 1 : index
    %c2_134 = arith.constant 2 : index
    %c0_135 = arith.constant 0 : index
    %c0_136 = arith.constant 0 : index
    %131 = vector.load %arg2[%c1_133, %c2_134, %c0_135, %c0_136] : memref<2x5x28x192xf32, #tpu.memory_space<vmem>>, vector<1x1x28x192xf32>
    %132 = vector.shape_cast %131 : vector<1x1x28x192xf32> to vector<28x192xf32>
    %cst_137 = arith.constant dense<0.000000e+00> : vector<6x192xf32>
    %133 = tpu.matmul %126, %132, %cst_137 {dimension_numbers = #tpu.dot_dimension_numbers<[1], [0], [0], [1], [0, 0, 1, 1], [], []>} : vector<6x28xf32>, vector<28x192xf32>, vector<6x192xf32> -> vector<6x192xf32>
    %134 = arith.addf %125, %133 : vector<6x192xf32>
    %135 = vector.extract_strided_slice %1 {offsets = [8, 0], sizes = [6, 28], strides = [1, 1]} : vector<28x28xf32> to vector<6x28xf32>
    %c0_138 = arith.constant 0 : index
    %c3_139 = arith.constant 3 : index
    %c0_140 = arith.constant 0 : index
    %c0_141 = arith.constant 0 : index
    %136 = vector.load %arg2[%c0_138, %c3_139, %c0_140, %c0_141] : memref<2x5x28x192xf32, #tpu.memory_space<vmem>>, vector<1x1x28x192xf32>
    %137 = vector.shape_cast %136 : vector<1x1x28x192xf32> to vector<28x192xf32>
    %cst_142 = arith.constant dense<0.000000e+00> : vector<6x192xf32>
    %138 = tpu.matmul %135, %137, %cst_142 {dimension_numbers = #tpu.dot_dimension_numbers<[1], [0], [0], [1], [0, 0, 1, 1], [], []>} : vector<6x28xf32>, vector<28x192xf32>, vector<6x192xf32> -> vector<6x192xf32>
    %139 = arith.addf %130, %138 : vector<6x192xf32>
    %c1_143 = arith.constant 1 : index
    %c3_144 = arith.constant 3 : index
    %c0_145 = arith.constant 0 : index
    %c0_146 = arith.constant 0 : index
    %140 = vector.load %arg2[%c1_143, %c3_144, %c0_145, %c0_146] : memref<2x5x28x192xf32, #tpu.memory_space<vmem>>, vector<1x1x28x192xf32>
    %141 = vector.shape_cast %140 : vector<1x1x28x192xf32> to vector<28x192xf32>
    %cst_147 = arith.constant dense<0.000000e+00> : vector<6x192xf32>
    %142 = tpu.matmul %135, %141, %cst_147 {dimension_numbers = #tpu.dot_dimension_numbers<[1], [0], [0], [1], [0, 0, 1, 1], [], []>} : vector<6x28xf32>, vector<28x192xf32>, vector<6x192xf32> -> vector<6x192xf32>
    %143 = arith.addf %134, %142 : vector<6x192xf32>
    %144 = vector.extract_strided_slice %1 {offsets = [15, 0], sizes = [6, 28], strides = [1, 1]} : vector<28x28xf32> to vector<6x28xf32>
    %c0_148 = arith.constant 0 : index
    %c4_149 = arith.constant 4 : index
    %c0_150 = arith.constant 0 : index
    %c0_151 = arith.constant 0 : index
    %145 = vector.load %arg2[%c0_148, %c4_149, %c0_150, %c0_151] : memref<2x5x28x192xf32, #tpu.memory_space<vmem>>, vector<1x1x28x192xf32>
    %146 = vector.shape_cast %145 : vector<1x1x28x192xf32> to vector<28x192xf32>
    %cst_152 = arith.constant dense<0.000000e+00> : vector<6x192xf32>
    %147 = tpu.matmul %144, %146, %cst_152 {dimension_numbers = #tpu.dot_dimension_numbers<[1], [0], [0], [1], [0, 0, 1, 1], [], []>} : vector<6x28xf32>, vector<28x192xf32>, vector<6x192xf32> -> vector<6x192xf32>
    %148 = arith.addf %139, %147 : vector<6x192xf32>
    %c1_153 = arith.constant 1 : index
    %c4_154 = arith.constant 4 : index
    %c0_155 = arith.constant 0 : index
    %c0_156 = arith.constant 0 : index
    %149 = vector.load %arg2[%c1_153, %c4_154, %c0_155, %c0_156] : memref<2x5x28x192xf32, #tpu.memory_space<vmem>>, vector<1x1x28x192xf32>
    %150 = vector.shape_cast %149 : vector<1x1x28x192xf32> to vector<28x192xf32>
    %cst_157 = arith.constant dense<0.000000e+00> : vector<6x192xf32>
    %151 = tpu.matmul %144, %150, %cst_157 {dimension_numbers = #tpu.dot_dimension_numbers<[1], [0], [0], [1], [0, 0, 1, 1], [], []>} : vector<6x28xf32>, vector<28x192xf32>, vector<6x192xf32> -> vector<6x192xf32>
    %152 = arith.addf %143, %151 : vector<6x192xf32>
    %153 = vector.extract_strided_slice %1 {offsets = [21, 0], sizes = [6, 28], strides = [1, 1]} : vector<28x28xf32> to vector<6x28xf32>
    %c0_158 = arith.constant 0 : index
    %c0_159 = arith.constant 0 : index
    %c0_160 = arith.constant 0 : index
    %c0_161 = arith.constant 0 : index
    %154 = vector.load %arg2[%c0_158, %c0_159, %c0_160, %c0_161] : memref<2x5x28x192xf32, #tpu.memory_space<vmem>>, vector<1x1x28x192xf32>
    %155 = vector.shape_cast %154 : vector<1x1x28x192xf32> to vector<28x192xf32>
    %cst_162 = arith.constant dense<0.000000e+00> : vector<6x192xf32>
    %156 = tpu.matmul %153, %155, %cst_162 {dimension_numbers = #tpu.dot_dimension_numbers<[1], [0], [0], [1], [0, 0, 1, 1], [], []>} : vector<6x28xf32>, vector<28x192xf32>, vector<6x192xf32> -> vector<6x192xf32>
    %157 = arith.addf %106, %156 : vector<6x192xf32>
    %c1_163 = arith.constant 1 : index
    %c0_164 = arith.constant 0 : index
    %c0_165 = arith.constant 0 : index
    %c0_166 = arith.constant 0 : index
    %158 = vector.load %arg2[%c1_163, %c0_164, %c0_165, %c0_166] : memref<2x5x28x192xf32, #tpu.memory_space<vmem>>, vector<1x1x28x192xf32>
    %159 = vector.shape_cast %158 : vector<1x1x28x192xf32> to vector<28x192xf32>
    %cst_167 = arith.constant dense<0.000000e+00> : vector<6x192xf32>
    %160 = tpu.matmul %153, %159, %cst_167 {dimension_numbers = #tpu.dot_dimension_numbers<[1], [0], [0], [1], [0, 0, 1, 1], [], []>} : vector<6x28xf32>, vector<28x192xf32>, vector<6x192xf32> -> vector<6x192xf32>
    %161 = arith.addf %107, %160 : vector<6x192xf32>
    %162 = vector.extract_strided_slice %1 {offsets = [1, 0], sizes = [6, 28], strides = [1, 1]} : vector<28x28xf32> to vector<6x28xf32>
    %c0_168 = arith.constant 0 : index
    %c1_169 = arith.constant 1 : index
    %c0_170 = arith.constant 0 : index
    %c0_171 = arith.constant 0 : index
    %163 = vector.load %arg2[%c0_168, %c1_169, %c0_170, %c0_171] : memref<2x5x28x192xf32, #tpu.memory_space<vmem>>, vector<1x1x28x192xf32>
    %164 = vector.shape_cast %163 : vector<1x1x28x192xf32> to vector<28x192xf32>
    %cst_172 = arith.constant dense<0.000000e+00> : vector<6x192xf32>
    %165 = tpu.matmul %162, %164, %cst_172 {dimension_numbers = #tpu.dot_dimension_numbers<[1], [0], [0], [1], [0, 0, 1, 1], [], []>} : vector<6x28xf32>, vector<28x192xf32>, vector<6x192xf32> -> vector<6x192xf32>
    %166 = arith.addf %157, %165 : vector<6x192xf32>
    %c1_173 = arith.constant 1 : index
    %c1_174 = arith.constant 1 : index
    %c0_175 = arith.constant 0 : index
    %c0_176 = arith.constant 0 : index
    %167 = vector.load %arg2[%c1_173, %c1_174, %c0_175, %c0_176] : memref<2x5x28x192xf32, #tpu.memory_space<vmem>>, vector<1x1x28x192xf32>
    %168 = vector.shape_cast %167 : vector<1x1x28x192xf32> to vector<28x192xf32>
    %cst_177 = arith.constant dense<0.000000e+00> : vector<6x192xf32>
    %169 = tpu.matmul %162, %168, %cst_177 {dimension_numbers = #tpu.dot_dimension_numbers<[1], [0], [0], [1], [0, 0, 1, 1], [], []>} : vector<6x28xf32>, vector<28x192xf32>, vector<6x192xf32> -> vector<6x192xf32>
    %170 = arith.addf %161, %169 : vector<6x192xf32>
    %171 = vector.extract_strided_slice %1 {offsets = [8, 0], sizes = [6, 28], strides = [1, 1]} : vector<28x28xf32> to vector<6x28xf32>
    %c0_178 = arith.constant 0 : index
    %c2_179 = arith.constant 2 : index
    %c0_180 = arith.constant 0 : index
    %c0_181 = arith.constant 0 : index
    %172 = vector.load %arg2[%c0_178, %c2_179, %c0_180, %c0_181] : memref<2x5x28x192xf32, #tpu.memory_space<vmem>>, vector<1x1x28x192xf32>
    %173 = vector.shape_cast %172 : vector<1x1x28x192xf32> to vector<28x192xf32>
    %cst_182 = arith.constant dense<0.000000e+00> : vector<6x192xf32>
    %174 = tpu.matmul %171, %173, %cst_182 {dimension_numbers = #tpu.dot_dimension_numbers<[1], [0], [0], [1], [0, 0, 1, 1], [], []>} : vector<6x28xf32>, vector<28x192xf32>, vector<6x192xf32> -> vector<6x192xf32>
    %175 = arith.addf %166, %174 : vector<6x192xf32>
    %c1_183 = arith.constant 1 : index
    %c2_184 = arith.constant 2 : index
    %c0_185 = arith.constant 0 : index
    %c0_186 = arith.constant 0 : index
    %176 = vector.load %arg2[%c1_183, %c2_184, %c0_185, %c0_186] : memref<2x5x28x192xf32, #tpu.memory_space<vmem>>, vector<1x1x28x192xf32>
    %177 = vector.shape_cast %176 : vector<1x1x28x192xf32> to vector<28x192xf32>
    %cst_187 = arith.constant dense<0.000000e+00> : vector<6x192xf32>
    %178 = tpu.matmul %171, %177, %cst_187 {dimension_numbers = #tpu.dot_dimension_numbers<[1], [0], [0], [1], [0, 0, 1, 1], [], []>} : vector<6x28xf32>, vector<28x192xf32>, vector<6x192xf32> -> vector<6x192xf32>
    %179 = arith.addf %170, %178 : vector<6x192xf32>
    %180 = vector.extract_strided_slice %1 {offsets = [15, 0], sizes = [6, 28], strides = [1, 1]} : vector<28x28xf32> to vector<6x28xf32>
    %c0_188 = arith.constant 0 : index
    %c3_189 = arith.constant 3 : index
    %c0_190 = arith.constant 0 : index
    %c0_191 = arith.constant 0 : index
    %181 = vector.load %arg2[%c0_188, %c3_189, %c0_190, %c0_191] : memref<2x5x28x192xf32, #tpu.memory_space<vmem>>, vector<1x1x28x192xf32>
    %182 = vector.shape_cast %181 : vector<1x1x28x192xf32> to vector<28x192xf32>
    %cst_192 = arith.constant dense<0.000000e+00> : vector<6x192xf32>
    %183 = tpu.matmul %180, %182, %cst_192 {dimension_numbers = #tpu.dot_dimension_numbers<[1], [0], [0], [1], [0, 0, 1, 1], [], []>} : vector<6x28xf32>, vector<28x192xf32>, vector<6x192xf32> -> vector<6x192xf32>
    %184 = arith.addf %175, %183 : vector<6x192xf32>
    %c1_193 = arith.constant 1 : index
    %c3_194 = arith.constant 3 : index
    %c0_195 = arith.constant 0 : index
    %c0_196 = arith.constant 0 : index
    %185 = vector.load %arg2[%c1_193, %c3_194, %c0_195, %c0_196] : memref<2x5x28x192xf32, #tpu.memory_space<vmem>>, vector<1x1x28x192xf32>
    %186 = vector.shape_cast %185 : vector<1x1x28x192xf32> to vector<28x192xf32>
    %cst_197 = arith.constant dense<0.000000e+00> : vector<6x192xf32>
    %187 = tpu.matmul %180, %186, %cst_197 {dimension_numbers = #tpu.dot_dimension_numbers<[1], [0], [0], [1], [0, 0, 1, 1], [], []>} : vector<6x28xf32>, vector<28x192xf32>, vector<6x192xf32> -> vector<6x192xf32>
    %188 = arith.addf %179, %187 : vector<6x192xf32>
    %189 = vector.extract_strided_slice %1 {offsets = [22, 0], sizes = [6, 28], strides = [1, 1]} : vector<28x28xf32> to vector<6x28xf32>
    %c0_198 = arith.constant 0 : index
    %c4_199 = arith.constant 4 : index
    %c0_200 = arith.constant 0 : index
    %c0_201 = arith.constant 0 : index
    %190 = vector.load %arg2[%c0_198, %c4_199, %c0_200, %c0_201] : memref<2x5x28x192xf32, #tpu.memory_space<vmem>>, vector<1x1x28x192xf32>
    %191 = vector.shape_cast %190 : vector<1x1x28x192xf32> to vector<28x192xf32>
    %cst_202 = arith.constant dense<0.000000e+00> : vector<6x192xf32>
    %192 = tpu.matmul %189, %191, %cst_202 {dimension_numbers = #tpu.dot_dimension_numbers<[1], [0], [0], [1], [0, 0, 1, 1], [], []>} : vector<6x28xf32>, vector<28x192xf32>, vector<6x192xf32> -> vector<6x192xf32>
    %193 = arith.addf %184, %192 : vector<6x192xf32>
    %c1_203 = arith.constant 1 : index
    %c4_204 = arith.constant 4 : index
    %c0_205 = arith.constant 0 : index
    %c0_206 = arith.constant 0 : index
    %194 = vector.load %arg2[%c1_203, %c4_204, %c0_205, %c0_206] : memref<2x5x28x192xf32, #tpu.memory_space<vmem>>, vector<1x1x28x192xf32>
    %195 = vector.shape_cast %194 : vector<1x1x28x192xf32> to vector<28x192xf32>
    %cst_207 = arith.constant dense<0.000000e+00> : vector<6x192xf32>
    %196 = tpu.matmul %189, %195, %cst_207 {dimension_numbers = #tpu.dot_dimension_numbers<[1], [0], [0], [1], [0, 0, 1, 1], [], []>} : vector<6x28xf32>, vector<28x192xf32>, vector<6x192xf32> -> vector<6x192xf32>
    %197 = arith.addf %188, %196 : vector<6x192xf32>
    %198 = arith.maximumf %148, %152 : vector<6x192xf32>
    %199 = arith.maximumf %193, %197 : vector<6x192xf32>
    %200 = arith.maximumf %198, %199 : vector<6x192xf32>
    %c0_208 = arith.constant 0 : index
    %c0_209 = arith.constant 0 : index
    %201 = vector.load %arg3[%c0_208, %c0_209] : memref<1x192xf32, #tpu.memory_space<vmem>>, vector<1x192xf32>
    %202 = vector.broadcast %201 : vector<1x192xf32> to vector<6x192xf32>
    %203 = arith.addf %200, %202 : vector<6x192xf32>
    %cst_210 = arith.constant 0.000000e+00 : f32
    %204 = vector.broadcast %cst_210 : f32 to vector<6x192xf32>
    %205 = arith.maximumf %203, %204 : vector<6x192xf32>
    %cst_211 = arith.constant 0.000000e+00 : f32
    %206 = vector.broadcast %cst_211 : f32 to vector<4x128xf32>
    %cst_212 = arith.constant 0.000000e+00 : f32
    %207 = vector.broadcast %cst_212 : f32 to vector<4x128xf32>
    %cst_213 = arith.constant 0.000000e+00 : f32
    %208 = vector.broadcast %cst_213 : f32 to vector<4x128xf32>
    %cst_214 = arith.constant 0.000000e+00 : f32
    %209 = vector.broadcast %cst_214 : f32 to vector<4x128xf32>
    %210 = vector.extract_strided_slice %103 {offsets = [0, 0], sizes = [4, 192], strides = [1, 1]} : vector<6x192xf32> to vector<4x192xf32>
    %c0_215 = arith.constant 0 : index
    %c0_216 = arith.constant 0 : index
    %c0_217 = arith.constant 0 : index
    %c0_218 = arith.constant 0 : index
    %211 = vector.load %arg4[%c0_215, %c0_216, %c0_217, %c0_218] : memref<2x5x192x128xf32, #tpu.memory_space<vmem>>, vector<1x1x192x128xf32>
    %212 = vector.shape_cast %211 : vector<1x1x192x128xf32> to vector<192x128xf32>
    %cst_219 = arith.constant dense<0.000000e+00> : vector<4x128xf32>
    %213 = tpu.matmul %210, %212, %cst_219 {dimension_numbers = #tpu.dot_dimension_numbers<[1], [0], [0], [1], [0, 0, 1, 1], [], []>} : vector<4x192xf32>, vector<192x128xf32>, vector<4x128xf32> -> vector<4x128xf32>
    %214 = arith.addf %206, %213 : vector<4x128xf32>
    %c1_220 = arith.constant 1 : index
    %c0_221 = arith.constant 0 : index
    %c0_222 = arith.constant 0 : index
    %c0_223 = arith.constant 0 : index
    %215 = vector.load %arg4[%c1_220, %c0_221, %c0_222, %c0_223] : memref<2x5x192x128xf32, #tpu.memory_space<vmem>>, vector<1x1x192x128xf32>
    %216 = vector.shape_cast %215 : vector<1x1x192x128xf32> to vector<192x128xf32>
    %cst_224 = arith.constant dense<0.000000e+00> : vector<4x128xf32>
    %217 = tpu.matmul %210, %216, %cst_224 {dimension_numbers = #tpu.dot_dimension_numbers<[1], [0], [0], [1], [0, 0, 1, 1], [], []>} : vector<4x192xf32>, vector<192x128xf32>, vector<4x128xf32> -> vector<4x128xf32>
    %218 = arith.addf %207, %217 : vector<4x128xf32>
    %219 = vector.extract_strided_slice %205 {offsets = [0, 0], sizes = [4, 192], strides = [1, 1]} : vector<6x192xf32> to vector<4x192xf32>
    %c0_225 = arith.constant 0 : index
    %c1_226 = arith.constant 1 : index
    %c0_227 = arith.constant 0 : index
    %c0_228 = arith.constant 0 : index
    %220 = vector.load %arg4[%c0_225, %c1_226, %c0_227, %c0_228] : memref<2x5x192x128xf32, #tpu.memory_space<vmem>>, vector<1x1x192x128xf32>
    %221 = vector.shape_cast %220 : vector<1x1x192x128xf32> to vector<192x128xf32>
    %cst_229 = arith.constant dense<0.000000e+00> : vector<4x128xf32>
    %222 = tpu.matmul %219, %221, %cst_229 {dimension_numbers = #tpu.dot_dimension_numbers<[1], [0], [0], [1], [0, 0, 1, 1], [], []>} : vector<4x192xf32>, vector<192x128xf32>, vector<4x128xf32> -> vector<4x128xf32>
    %223 = arith.addf %214, %222 : vector<4x128xf32>
    %c1_230 = arith.constant 1 : index
    %c1_231 = arith.constant 1 : index
    %c0_232 = arith.constant 0 : index
    %c0_233 = arith.constant 0 : index
    %224 = vector.load %arg4[%c1_230, %c1_231, %c0_232, %c0_233] : memref<2x5x192x128xf32, #tpu.memory_space<vmem>>, vector<1x1x192x128xf32>
    %225 = vector.shape_cast %224 : vector<1x1x192x128xf32> to vector<192x128xf32>
    %cst_234 = arith.constant dense<0.000000e+00> : vector<4x128xf32>
    %226 = tpu.matmul %219, %225, %cst_234 {dimension_numbers = #tpu.dot_dimension_numbers<[1], [0], [0], [1], [0, 0, 1, 1], [], []>} : vector<4x192xf32>, vector<192x128xf32>, vector<4x128xf32> -> vector<4x128xf32>
    %227 = arith.addf %218, %226 : vector<4x128xf32>
    %228 = vector.extract_strided_slice %103 {offsets = [1, 0], sizes = [4, 192], strides = [1, 1]} : vector<6x192xf32> to vector<4x192xf32>
    %c0_235 = arith.constant 0 : index
    %c2_236 = arith.constant 2 : index
    %c0_237 = arith.constant 0 : index
    %c0_238 = arith.constant 0 : index
    %229 = vector.load %arg4[%c0_235, %c2_236, %c0_237, %c0_238] : memref<2x5x192x128xf32, #tpu.memory_space<vmem>>, vector<1x1x192x128xf32>
    %230 = vector.shape_cast %229 : vector<1x1x192x128xf32> to vector<192x128xf32>
    %cst_239 = arith.constant dense<0.000000e+00> : vector<4x128xf32>
    %231 = tpu.matmul %228, %230, %cst_239 {dimension_numbers = #tpu.dot_dimension_numbers<[1], [0], [0], [1], [0, 0, 1, 1], [], []>} : vector<4x192xf32>, vector<192x128xf32>, vector<4x128xf32> -> vector<4x128xf32>
    %232 = arith.addf %223, %231 : vector<4x128xf32>
    %c1_240 = arith.constant 1 : index
    %c2_241 = arith.constant 2 : index
    %c0_242 = arith.constant 0 : index
    %c0_243 = arith.constant 0 : index
    %233 = vector.load %arg4[%c1_240, %c2_241, %c0_242, %c0_243] : memref<2x5x192x128xf32, #tpu.memory_space<vmem>>, vector<1x1x192x128xf32>
    %234 = vector.shape_cast %233 : vector<1x1x192x128xf32> to vector<192x128xf32>
    %cst_244 = arith.constant dense<0.000000e+00> : vector<4x128xf32>
    %235 = tpu.matmul %228, %234, %cst_244 {dimension_numbers = #tpu.dot_dimension_numbers<[1], [0], [0], [1], [0, 0, 1, 1], [], []>} : vector<4x192xf32>, vector<192x128xf32>, vector<4x128xf32> -> vector<4x128xf32>
    %236 = arith.addf %227, %235 : vector<4x128xf32>
    %237 = vector.extract_strided_slice %205 {offsets = [1, 0], sizes = [4, 192], strides = [1, 1]} : vector<6x192xf32> to vector<4x192xf32>
    %c0_245 = arith.constant 0 : index
    %c3_246 = arith.constant 3 : index
    %c0_247 = arith.constant 0 : index
    %c0_248 = arith.constant 0 : index
    %238 = vector.load %arg4[%c0_245, %c3_246, %c0_247, %c0_248] : memref<2x5x192x128xf32, #tpu.memory_space<vmem>>, vector<1x1x192x128xf32>
    %239 = vector.shape_cast %238 : vector<1x1x192x128xf32> to vector<192x128xf32>
    %cst_249 = arith.constant dense<0.000000e+00> : vector<4x128xf32>
    %240 = tpu.matmul %237, %239, %cst_249 {dimension_numbers = #tpu.dot_dimension_numbers<[1], [0], [0], [1], [0, 0, 1, 1], [], []>} : vector<4x192xf32>, vector<192x128xf32>, vector<4x128xf32> -> vector<4x128xf32>
    %241 = arith.addf %232, %240 : vector<4x128xf32>
    %c1_250 = arith.constant 1 : index
    %c3_251 = arith.constant 3 : index
    %c0_252 = arith.constant 0 : index
    %c0_253 = arith.constant 0 : index
    %242 = vector.load %arg4[%c1_250, %c3_251, %c0_252, %c0_253] : memref<2x5x192x128xf32, #tpu.memory_space<vmem>>, vector<1x1x192x128xf32>
    %243 = vector.shape_cast %242 : vector<1x1x192x128xf32> to vector<192x128xf32>
    %cst_254 = arith.constant dense<0.000000e+00> : vector<4x128xf32>
    %244 = tpu.matmul %237, %243, %cst_254 {dimension_numbers = #tpu.dot_dimension_numbers<[1], [0], [0], [1], [0, 0, 1, 1], [], []>} : vector<4x192xf32>, vector<192x128xf32>, vector<4x128xf32> -> vector<4x128xf32>
    %245 = arith.addf %236, %244 : vector<4x128xf32>
    %246 = vector.extract_strided_slice %103 {offsets = [2, 0], sizes = [4, 192], strides = [1, 1]} : vector<6x192xf32> to vector<4x192xf32>
    %c0_255 = arith.constant 0 : index
    %c4_256 = arith.constant 4 : index
    %c0_257 = arith.constant 0 : index
    %c0_258 = arith.constant 0 : index
    %247 = vector.load %arg4[%c0_255, %c4_256, %c0_257, %c0_258] : memref<2x5x192x128xf32, #tpu.memory_space<vmem>>, vector<1x1x192x128xf32>
    %248 = vector.shape_cast %247 : vector<1x1x192x128xf32> to vector<192x128xf32>
    %cst_259 = arith.constant dense<0.000000e+00> : vector<4x128xf32>
    %249 = tpu.matmul %246, %248, %cst_259 {dimension_numbers = #tpu.dot_dimension_numbers<[1], [0], [0], [1], [0, 0, 1, 1], [], []>} : vector<4x192xf32>, vector<192x128xf32>, vector<4x128xf32> -> vector<4x128xf32>
    %250 = arith.addf %241, %249 : vector<4x128xf32>
    %c1_260 = arith.constant 1 : index
    %c4_261 = arith.constant 4 : index
    %c0_262 = arith.constant 0 : index
    %c0_263 = arith.constant 0 : index
    %251 = vector.load %arg4[%c1_260, %c4_261, %c0_262, %c0_263] : memref<2x5x192x128xf32, #tpu.memory_space<vmem>>, vector<1x1x192x128xf32>
    %252 = vector.shape_cast %251 : vector<1x1x192x128xf32> to vector<192x128xf32>
    %cst_264 = arith.constant dense<0.000000e+00> : vector<4x128xf32>
    %253 = tpu.matmul %246, %252, %cst_264 {dimension_numbers = #tpu.dot_dimension_numbers<[1], [0], [0], [1], [0, 0, 1, 1], [], []>} : vector<4x192xf32>, vector<192x128xf32>, vector<4x128xf32> -> vector<4x128xf32>
    %254 = arith.addf %245, %253 : vector<4x128xf32>
    %255 = vector.extract_strided_slice %205 {offsets = [0, 0], sizes = [4, 192], strides = [1, 1]} : vector<6x192xf32> to vector<4x192xf32>
    %c0_265 = arith.constant 0 : index
    %c0_266 = arith.constant 0 : index
    %c0_267 = arith.constant 0 : index
    %c0_268 = arith.constant 0 : index
    %256 = vector.load %arg4[%c0_265, %c0_266, %c0_267, %c0_268] : memref<2x5x192x128xf32, #tpu.memory_space<vmem>>, vector<1x1x192x128xf32>
    %257 = vector.shape_cast %256 : vector<1x1x192x128xf32> to vector<192x128xf32>
    %cst_269 = arith.constant dense<0.000000e+00> : vector<4x128xf32>
    %258 = tpu.matmul %255, %257, %cst_269 {dimension_numbers = #tpu.dot_dimension_numbers<[1], [0], [0], [1], [0, 0, 1, 1], [], []>} : vector<4x192xf32>, vector<192x128xf32>, vector<4x128xf32> -> vector<4x128xf32>
    %259 = arith.addf %208, %258 : vector<4x128xf32>
    %c1_270 = arith.constant 1 : index
    %c0_271 = arith.constant 0 : index
    %c0_272 = arith.constant 0 : index
    %c0_273 = arith.constant 0 : index
    %260 = vector.load %arg4[%c1_270, %c0_271, %c0_272, %c0_273] : memref<2x5x192x128xf32, #tpu.memory_space<vmem>>, vector<1x1x192x128xf32>
    %261 = vector.shape_cast %260 : vector<1x1x192x128xf32> to vector<192x128xf32>
    %cst_274 = arith.constant dense<0.000000e+00> : vector<4x128xf32>
    %262 = tpu.matmul %255, %261, %cst_274 {dimension_numbers = #tpu.dot_dimension_numbers<[1], [0], [0], [1], [0, 0, 1, 1], [], []>} : vector<4x192xf32>, vector<192x128xf32>, vector<4x128xf32> -> vector<4x128xf32>
    %263 = arith.addf %209, %262 : vector<4x128xf32>
    %264 = vector.extract_strided_slice %103 {offsets = [1, 0], sizes = [4, 192], strides = [1, 1]} : vector<6x192xf32> to vector<4x192xf32>
    %c0_275 = arith.constant 0 : index
    %c1_276 = arith.constant 1 : index
    %c0_277 = arith.constant 0 : index
    %c0_278 = arith.constant 0 : index
    %265 = vector.load %arg4[%c0_275, %c1_276, %c0_277, %c0_278] : memref<2x5x192x128xf32, #tpu.memory_space<vmem>>, vector<1x1x192x128xf32>
    %266 = vector.shape_cast %265 : vector<1x1x192x128xf32> to vector<192x128xf32>
    %cst_279 = arith.constant dense<0.000000e+00> : vector<4x128xf32>
    %267 = tpu.matmul %264, %266, %cst_279 {dimension_numbers = #tpu.dot_dimension_numbers<[1], [0], [0], [1], [0, 0, 1, 1], [], []>} : vector<4x192xf32>, vector<192x128xf32>, vector<4x128xf32> -> vector<4x128xf32>
    %268 = arith.addf %259, %267 : vector<4x128xf32>
    %c1_280 = arith.constant 1 : index
    %c1_281 = arith.constant 1 : index
    %c0_282 = arith.constant 0 : index
    %c0_283 = arith.constant 0 : index
    %269 = vector.load %arg4[%c1_280, %c1_281, %c0_282, %c0_283] : memref<2x5x192x128xf32, #tpu.memory_space<vmem>>, vector<1x1x192x128xf32>
    %270 = vector.shape_cast %269 : vector<1x1x192x128xf32> to vector<192x128xf32>
    %cst_284 = arith.constant dense<0.000000e+00> : vector<4x128xf32>
    %271 = tpu.matmul %264, %270, %cst_284 {dimension_numbers = #tpu.dot_dimension_numbers<[1], [0], [0], [1], [0, 0, 1, 1], [], []>} : vector<4x192xf32>, vector<192x128xf32>, vector<4x128xf32> -> vector<4x128xf32>
    %272 = arith.addf %263, %271 : vector<4x128xf32>
    %273 = vector.extract_strided_slice %205 {offsets = [1, 0], sizes = [4, 192], strides = [1, 1]} : vector<6x192xf32> to vector<4x192xf32>
    %c0_285 = arith.constant 0 : index
    %c2_286 = arith.constant 2 : index
    %c0_287 = arith.constant 0 : index
    %c0_288 = arith.constant 0 : index
    %274 = vector.load %arg4[%c0_285, %c2_286, %c0_287, %c0_288] : memref<2x5x192x128xf32, #tpu.memory_space<vmem>>, vector<1x1x192x128xf32>
    %275 = vector.shape_cast %274 : vector<1x1x192x128xf32> to vector<192x128xf32>
    %cst_289 = arith.constant dense<0.000000e+00> : vector<4x128xf32>
    %276 = tpu.matmul %273, %275, %cst_289 {dimension_numbers = #tpu.dot_dimension_numbers<[1], [0], [0], [1], [0, 0, 1, 1], [], []>} : vector<4x192xf32>, vector<192x128xf32>, vector<4x128xf32> -> vector<4x128xf32>
    %277 = arith.addf %268, %276 : vector<4x128xf32>
    %c1_290 = arith.constant 1 : index
    %c2_291 = arith.constant 2 : index
    %c0_292 = arith.constant 0 : index
    %c0_293 = arith.constant 0 : index
    %278 = vector.load %arg4[%c1_290, %c2_291, %c0_292, %c0_293] : memref<2x5x192x128xf32, #tpu.memory_space<vmem>>, vector<1x1x192x128xf32>
    %279 = vector.shape_cast %278 : vector<1x1x192x128xf32> to vector<192x128xf32>
    %cst_294 = arith.constant dense<0.000000e+00> : vector<4x128xf32>
    %280 = tpu.matmul %273, %279, %cst_294 {dimension_numbers = #tpu.dot_dimension_numbers<[1], [0], [0], [1], [0, 0, 1, 1], [], []>} : vector<4x192xf32>, vector<192x128xf32>, vector<4x128xf32> -> vector<4x128xf32>
    %281 = arith.addf %272, %280 : vector<4x128xf32>
    %282 = vector.extract_strided_slice %103 {offsets = [2, 0], sizes = [4, 192], strides = [1, 1]} : vector<6x192xf32> to vector<4x192xf32>
    %c0_295 = arith.constant 0 : index
    %c3_296 = arith.constant 3 : index
    %c0_297 = arith.constant 0 : index
    %c0_298 = arith.constant 0 : index
    %283 = vector.load %arg4[%c0_295, %c3_296, %c0_297, %c0_298] : memref<2x5x192x128xf32, #tpu.memory_space<vmem>>, vector<1x1x192x128xf32>
    %284 = vector.shape_cast %283 : vector<1x1x192x128xf32> to vector<192x128xf32>
    %cst_299 = arith.constant dense<0.000000e+00> : vector<4x128xf32>
    %285 = tpu.matmul %282, %284, %cst_299 {dimension_numbers = #tpu.dot_dimension_numbers<[1], [0], [0], [1], [0, 0, 1, 1], [], []>} : vector<4x192xf32>, vector<192x128xf32>, vector<4x128xf32> -> vector<4x128xf32>
    %286 = arith.addf %277, %285 : vector<4x128xf32>
    %c1_300 = arith.constant 1 : index
    %c3_301 = arith.constant 3 : index
    %c0_302 = arith.constant 0 : index
    %c0_303 = arith.constant 0 : index
    %287 = vector.load %arg4[%c1_300, %c3_301, %c0_302, %c0_303] : memref<2x5x192x128xf32, #tpu.memory_space<vmem>>, vector<1x1x192x128xf32>
    %288 = vector.shape_cast %287 : vector<1x1x192x128xf32> to vector<192x128xf32>
    %cst_304 = arith.constant dense<0.000000e+00> : vector<4x128xf32>
    %289 = tpu.matmul %282, %288, %cst_304 {dimension_numbers = #tpu.dot_dimension_numbers<[1], [0], [0], [1], [0, 0, 1, 1], [], []>} : vector<4x192xf32>, vector<192x128xf32>, vector<4x128xf32> -> vector<4x128xf32>
    %290 = arith.addf %281, %289 : vector<4x128xf32>
    %291 = vector.extract_strided_slice %205 {offsets = [2, 0], sizes = [4, 192], strides = [1, 1]} : vector<6x192xf32> to vector<4x192xf32>
    %c0_305 = arith.constant 0 : index
    %c4_306 = arith.constant 4 : index
    %c0_307 = arith.constant 0 : index
    %c0_308 = arith.constant 0 : index
    %292 = vector.load %arg4[%c0_305, %c4_306, %c0_307, %c0_308] : memref<2x5x192x128xf32, #tpu.memory_space<vmem>>, vector<1x1x192x128xf32>
    %293 = vector.shape_cast %292 : vector<1x1x192x128xf32> to vector<192x128xf32>
    %cst_309 = arith.constant dense<0.000000e+00> : vector<4x128xf32>
    %294 = tpu.matmul %291, %293, %cst_309 {dimension_numbers = #tpu.dot_dimension_numbers<[1], [0], [0], [1], [0, 0, 1, 1], [], []>} : vector<4x192xf32>, vector<192x128xf32>, vector<4x128xf32> -> vector<4x128xf32>
    %295 = arith.addf %286, %294 : vector<4x128xf32>
    %c1_310 = arith.constant 1 : index
    %c4_311 = arith.constant 4 : index
    %c0_312 = arith.constant 0 : index
    %c0_313 = arith.constant 0 : index
    %296 = vector.load %arg4[%c1_310, %c4_311, %c0_312, %c0_313] : memref<2x5x192x128xf32, #tpu.memory_space<vmem>>, vector<1x1x192x128xf32>
    %297 = vector.shape_cast %296 : vector<1x1x192x128xf32> to vector<192x128xf32>
    %cst_314 = arith.constant dense<0.000000e+00> : vector<4x128xf32>
    %298 = tpu.matmul %291, %297, %cst_314 {dimension_numbers = #tpu.dot_dimension_numbers<[1], [0], [0], [1], [0, 0, 1, 1], [], []>} : vector<4x192xf32>, vector<192x128xf32>, vector<4x128xf32> -> vector<4x128xf32>
    %299 = arith.addf %290, %298 : vector<4x128xf32>
    %300 = arith.maximumf %250, %254 : vector<4x128xf32>
    %301 = arith.maximumf %295, %299 : vector<4x128xf32>
    %302 = arith.maximumf %300, %301 : vector<4x128xf32>
    %c0_315 = arith.constant 0 : index
    %c0_316 = arith.constant 0 : index
    %303 = vector.load %arg5[%c0_315, %c0_316] : memref<1x128xf32, #tpu.memory_space<vmem>>, vector<1x128xf32>
    %304 = vector.broadcast %303 : vector<1x128xf32> to vector<4x128xf32>
    %305 = arith.addf %302, %304 : vector<4x128xf32>
    %cst_317 = arith.constant 0.000000e+00 : f32
    %306 = vector.broadcast %cst_317 : f32 to vector<4x128xf32>
    %307 = arith.maximumf %305, %306 : vector<4x128xf32>
    %cst_318 = arith.constant 0.000000e+00 : f32
    %308 = vector.broadcast %cst_318 : f32 to vector<1x512xf32>
    %309 = vector.extract_strided_slice %307 {offsets = [0, 0], sizes = [1, 128], strides = [1, 1]} : vector<4x128xf32> to vector<1x128xf32>
    %c0_319 = arith.constant 0 : index
    %c0_320 = arith.constant 0 : index
    %c0_321 = arith.constant 0 : index
    %310 = vector.load %arg6[%c0_319, %c0_320, %c0_321] : memref<4x128x512xf32, #tpu.memory_space<vmem>>, vector<1x128x512xf32>
    %311 = vector.shape_cast %310 : vector<1x128x512xf32> to vector<128x512xf32>
    %cst_322 = arith.constant dense<0.000000e+00> : vector<1x512xf32>
    %312 = tpu.matmul %309, %311, %cst_322 {dimension_numbers = #tpu.dot_dimension_numbers<[1], [0], [0], [1], [0, 0, 1, 1], [], []>} : vector<1x128xf32>, vector<128x512xf32>, vector<1x512xf32> -> vector<1x512xf32>
    %313 = arith.addf %308, %312 : vector<1x512xf32>
    %314 = vector.extract_strided_slice %307 {offsets = [1, 0], sizes = [1, 128], strides = [1, 1]} : vector<4x128xf32> to vector<1x128xf32>
    %c1_323 = arith.constant 1 : index
    %c0_324 = arith.constant 0 : index
    %c0_325 = arith.constant 0 : index
    %315 = vector.load %arg6[%c1_323, %c0_324, %c0_325] : memref<4x128x512xf32, #tpu.memory_space<vmem>>, vector<1x128x512xf32>
    %316 = vector.shape_cast %315 : vector<1x128x512xf32> to vector<128x512xf32>
    %cst_326 = arith.constant dense<0.000000e+00> : vector<1x512xf32>
    %317 = tpu.matmul %314, %316, %cst_326 {dimension_numbers = #tpu.dot_dimension_numbers<[1], [0], [0], [1], [0, 0, 1, 1], [], []>} : vector<1x128xf32>, vector<128x512xf32>, vector<1x512xf32> -> vector<1x512xf32>
    %318 = arith.addf %313, %317 : vector<1x512xf32>
    %319 = vector.extract_strided_slice %307 {offsets = [2, 0], sizes = [1, 128], strides = [1, 1]} : vector<4x128xf32> to vector<1x128xf32>
    %c2_327 = arith.constant 2 : index
    %c0_328 = arith.constant 0 : index
    %c0_329 = arith.constant 0 : index
    %320 = vector.load %arg6[%c2_327, %c0_328, %c0_329] : memref<4x128x512xf32, #tpu.memory_space<vmem>>, vector<1x128x512xf32>
    %321 = vector.shape_cast %320 : vector<1x128x512xf32> to vector<128x512xf32>
    %cst_330 = arith.constant dense<0.000000e+00> : vector<1x512xf32>
    %322 = tpu.matmul %319, %321, %cst_330 {dimension_numbers = #tpu.dot_dimension_numbers<[1], [0], [0], [1], [0, 0, 1, 1], [], []>} : vector<1x128xf32>, vector<128x512xf32>, vector<1x512xf32> -> vector<1x512xf32>
    %323 = arith.addf %318, %322 : vector<1x512xf32>
    %324 = vector.extract_strided_slice %307 {offsets = [3, 0], sizes = [1, 128], strides = [1, 1]} : vector<4x128xf32> to vector<1x128xf32>
    %c3_331 = arith.constant 3 : index
    %c0_332 = arith.constant 0 : index
    %c0_333 = arith.constant 0 : index
    %325 = vector.load %arg6[%c3_331, %c0_332, %c0_333] : memref<4x128x512xf32, #tpu.memory_space<vmem>>, vector<1x128x512xf32>
    %326 = vector.shape_cast %325 : vector<1x128x512xf32> to vector<128x512xf32>
    %cst_334 = arith.constant dense<0.000000e+00> : vector<1x512xf32>
    %327 = tpu.matmul %324, %326, %cst_334 {dimension_numbers = #tpu.dot_dimension_numbers<[1], [0], [0], [1], [0, 0, 1, 1], [], []>} : vector<1x128xf32>, vector<128x512xf32>, vector<1x512xf32> -> vector<1x512xf32>
    %328 = arith.addf %323, %327 : vector<1x512xf32>
    %c0_335 = arith.constant 0 : index
    %c0_336 = arith.constant 0 : index
    %329 = vector.load %arg7[%c0_335, %c0_336] : memref<1x512xf32, #tpu.memory_space<vmem>>, vector<1x512xf32>
    %330 = arith.addf %328, %329 : vector<1x512xf32>
    %cst_337 = arith.constant 0.000000e+00 : f32
    %331 = vector.broadcast %cst_337 : f32 to vector<1x512xf32>
    %332 = arith.maximumf %330, %331 : vector<1x512xf32>
    %c0_338 = arith.constant 0 : index
    %c0_339 = arith.constant 0 : index
    %333 = vector.load %arg8[%c0_338, %c0_339] : memref<512x128xf32, #tpu.memory_space<vmem>>, vector<512x128xf32>
    %cst_340 = arith.constant dense<0.000000e+00> : vector<1x128xf32>
    %334 = tpu.matmul %332, %333, %cst_340 {dimension_numbers = #tpu.dot_dimension_numbers<[1], [0], [0], [1], [0, 0, 1, 1], [], []>} : vector<1x512xf32>, vector<512x128xf32>, vector<1x128xf32> -> vector<1x128xf32>
    %c0_341 = arith.constant 0 : index
    %c0_342 = arith.constant 0 : index
    %335 = vector.load %arg9[%c0_341, %c0_342] : memref<1x128xf32, #tpu.memory_space<vmem>>, vector<1x128xf32>
    %336 = arith.addf %334, %335 : vector<1x128xf32>
    %c0_343 = arith.constant 0 : index
    %c0_344 = arith.constant 0 : index
    %c0_345 = arith.constant 0 : index
    %337 = vector.load %arg10[%c0_343, %c0_344, %c0_345] : memref<1x1x128xf32, #tpu.memory_space<vmem>>, vector<1x1x128xf32>
    %338 = vector.shape_cast %337 : vector<1x1x128xf32> to vector<1x128xf32>
    %339 = vector.shape_cast %336 : vector<1x128xf32> to vector<1x1x128xf32>
    tpu.vector_store %arg10[%c0_343, %c0_344, %c0_345], %339 {strides = array<i32>} : memref<1x1x128xf32, #tpu.memory_space<vmem>>, vector<1x1x128xf32>,
    return
  }
  func.func @transform_0(%arg0: i32) -> (i32, i32, i32) {
    %c0_i32 = arith.constant 0 : i32
    %c0_i32_0 = arith.constant 0 : i32
    %c0_i32_1 = arith.constant 0 : i32
    return %arg0, %c0_i32, %c0_i32_0 : i32, i32, i32
  }
  func.func @transform_1(%arg0: i32) -> (i32, i32, i32, i32) {
    %c0_i32 = arith.constant 0 : i32
    %c0_i32_0 = arith.constant 0 : i32
    %c0_i32_1 = arith.constant 0 : i32
    %c0_i32_2 = arith.constant 0 : i32
    %c0_i32_3 = arith.constant 0 : i32
    return %c0_i32, %c0_i32_0, %c0_i32_1, %c0_i32_2 : i32, i32, i32, i32
  }
  func.func @transform_2(%arg0: i32) -> (i32, i32) {
    %c0_i32 = arith.constant 0 : i32
    %c0_i32_0 = arith.constant 0 : i32
    %c0_i32_1 = arith.constant 0 : i32
    return %c0_i32, %c0_i32_0 : i32, i32
  }
  func.func @transform_3(%arg0: i32) -> (i32, i32, i32, i32) {
    %c0_i32 = arith.constant 0 : i32
    %c0_i32_0 = arith.constant 0 : i32
    %c0_i32_1 = arith.constant 0 : i32
    %c0_i32_2 = arith.constant 0 : i32
    %c0_i32_3 = arith.constant 0 : i32
    return %c0_i32, %c0_i32_0, %c0_i32_1, %c0_i32_2 : i32, i32, i32, i32
  }
  func.func @transform_4(%arg0: i32) -> (i32, i32) {
    %c0_i32 = arith.constant 0 : i32
    %c0_i32_0 = arith.constant 0 : i32
    %c0_i32_1 = arith.constant 0 : i32
    return %c0_i32, %c0_i32_0 : i32, i32
  }
  func.func @transform_5(%arg0: i32) -> (i32, i32, i32) {
    %c0_i32 = arith.constant 0 : i32
    %c0_i32_0 = arith.constant 0 : i32
    %c0_i32_1 = arith.constant 0 : i32
    %c0_i32_2 = arith.constant 0 : i32
    return %c0_i32, %c0_i32_0, %c0_i32_1 : i32, i32, i32
  }
  func.func @transform_6(%arg0: i32) -> (i32, i32) {
    %c0_i32 = arith.constant 0 : i32
    %c0_i32_0 = arith.constant 0 : i32
    %c0_i32_1 = arith.constant 0 : i32
    return %c0_i32, %c0_i32_0 : i32, i32
  }
  func.func @transform_7(%arg0: i32) -> (i32, i32) {
    %c0_i32 = arith.constant 0 : i32
    %c0_i32_0 = arith.constant 0 : i32
    %c0_i32_1 = arith.constant 0 : i32
    return %c0_i32, %c0_i32_0 : i32, i32
  }
  func.func @transform_8(%arg0: i32) -> (i32, i32) {
    %c0_i32 = arith.constant 0 : i32
    %c0_i32_0 = arith.constant 0 : i32
    %c0_i32_1 = arith.constant 0 : i32
    return %c0_i32, %c0_i32_0 : i32, i32
  }
  func.func @transform_9(%arg0: i32) -> (i32, i32, i32) {
    %c0_i32 = arith.constant 0 : i32
    %c0_i32_0 = arith.constant 0 : i32
    %c0_i32_1 = arith.constant 0 : i32
    return %arg0, %c0_i32, %c0_i32_0 : i32, i32, i32
  }
}

</mosaic_0001>

<bundles_post_ra>
// kernel: model_mnist_forward.1
= control target key start
LH: loop header
LB: loop body
LE: loop exit
PB: predicated region body
PF: predicated region fallthrough
CT: control target
= control target key end

     0   :  { %s6983_s0 = inlined_call_operand.vmem [shape: f32[2,28,28], index: 0, kind: input, shape index: {}]   ;;  %s6984_s1 = inlined_call_operand.vmem [shape: f32[2,5,28,192], index: 1, kind: input, shape index: {}]   ;;  %s6985_s2 = inlined_call_operand.vmem [shape: f32[1,192], index: 2, kind: input, shape index: {}]   ;;  %s6986_s3 = inlined_call_operand.hbm [shape: f32[2,5,192,128], index: 3, kind: input, shape index: {}]   ;;  %s6987_s4 = inlined_call_operand.vmem [shape: f32[1,128], index: 4, kind: input, shape index: {}]   ;;  %s6988_s5 = inlined_call_operand.hbm [shape: f32[4,128,512], index: 5, kind: input, shape index: {}]   ;;  %s6989_s6 = inlined_call_operand.vmem [shape: f32[1,512], index: 6, kind: input, shape index: {}]   ;;  %s6990_s7 = inlined_call_operand.vmem [shape: f32[512,128], index: 7, kind: input, shape index: {}]   ;;  %s6991_s8 = inlined_call_operand.vmem [shape: f32[1,128], index: 8, kind: input, shape index: {}]   ;;  %s6992_s9 = inlined_call_operand.hbm [shape: f32[2,1,128], index: 9, kind: output, shape index: {}]  }
   0x1   :  { %7144 = sst [smem:[#allocation78_spill]] %s6986_s3 }
   0x2   :  { %14 = vsyncpa [#allocation3], 0 }
   0x3   :  { %15 = vsyncpa [#allocation6], 0 }
   0x4   :  { %16 = vsyncpa [#allocation4], 0 }
   0x5   :  { %18 = vsyncpa [#allocation4 + $0x1], 0  ;;  %s4788_s30 = smov 0   ;;  %s4790_s10 = smov 0  }
   0x6   :  { %s4792_s11 = smov 0   ;;  %s4794_s12 = smov 0  }
   0x7 LB: > { %s4809_s13 = sadd.s32 4294967295, %s4730_s12   ;;  %s4177_s14 = sadd.s32 4294967294, %s4730_s12   ;;  %s4730_s12 = sphi %s4794_s12, %s7422_s12   ;;  %s4726_s11 = sphi %s4792_s11, %s7421_s11   ;;  %s4722_s10 = sphi %s4790_s10, %s7420_s10   ;;  %s4718_s30 = sphi %s4788_s30, %s7419_s30  }
   0x8   : > { %s4813_s15 = sadd.s32 1, %s4730_s12   ;;  %s225_s16 = sadd.s32 1, %s4726_s11 }
   0x9   : > { %s222_s17 = ssub.s32 %s4730_s12, %s4813_s15  ;;  %p235_p0 = scmp.ne.s32.totalorder %s4726_s11, %s4722_s10 }
   0xa   : > { %p223_p1 = scmp.eq.s32.totalorder %s222_s17, 0  ;;  %p236_p2 = scmp.eq.s32.totalorder %s4809_s13, 1 }
   0xb   : > { %p241_p3 = scmp.ne.s32.totalorder %s4722_s10, %s4718_s30  ;;  %p242_p4 = scmp.eq.s32.totalorder %s4177_s14, 1 }
   0xc   : > { %s4824_s18 = scalar_select %p223_p1, %s4726_s11, %s225_s16  }
   0xd   : > { %p4826_p5 = por %p236_p2, %p235_p0  ;;  %p4830_p6 = por %p242_p4, %p241_p3 }
   0xe   : > { %p4178_p7 = scmp.ge.s32.totalorder %s4730_s12, 1  ;;  %p249_p8 = scmp.lt.s32.totalorder %s4730_s12, 3 }
   0xf   : > { %p4463_p9 = scmp.eq.s32.totalorder %s4809_s13, 0  ;;  %s7148_s3 = sld [smem:[#allocation78_spill]] }
  0x10   : > { %p4837_p10 = pnand %p4178_p7, %p249_p8  ;;  %s4732_s25 = smov [#allocation2]  }
  0x11   : > { %s268_s26 = sshll.u32 %s4732_s25, 4  ;;  %s283_s29 = sshll.u32 %s6988_s5, 4  ;;  %s269_s26 = int_to_ptr.vmem [resolvable:$true] %s268_s26  ;;  %s284_s29 = int_to_ptr.hbm [resolvable:$true] %s283_s29 }
  0x12   : > { %p4452_p11 = pneg %p4837_p10  ;;  %s4733_s14 = smov 128  }
  0x13   : > { %s4734_s16 = smov 8   ;;  %s4735_s17 = smov [#allocation5]  }
  0x14   : > { %p4453_p12 = pnand %p4463_p9, %p4452_p11  ;;  %s285_s22 = sshll.u32 %s4735_s17, 4  ;;  %s286_s22 = int_to_ptr.vmem [resolvable:$true] %s285_s22 }
  0x15   : > { %s266_s24 = sshll.u32 %s7148_s3, 4  ;;  %s4736_s23 = smov 512   ;;  %s267_s24 = int_to_ptr.hbm [resolvable:$true] %s266_s24 }
  0x16   : > { %4455 = dma.hbm_to_vmem [thread:$0]  (!%p4453_p12), %s267_s24, 30720, %s269_s26, [#allocation3], %s4733_s14, %s4733_s14, %s4734_s16  }
  0x17   : > { %s4737_s3 = smov 32   ;;  %318 = sbr.rel (%p4837_p10) target bundleno = 1071 (0x42f), region = 56 }
  0x18   : > { %4458 = dma.hbm_to_vmem [thread:$0]  (!%p4453_p12), %s284_s29, 32768, %s286_s22, [#allocation6], %s4736_s23, %s4736_s23, %s4737_s3  }
  0x1c   : > { %4705 = dma.done.wait (%p4463_p9), [#allocation3], 30720  }
  0x1d   : > { %4707 = vsyncadd (%p4463_p9), [#allocation3], 4294936576 }
  0x1e   : > { %4709 = dma.done.wait (%p4463_p9), [#allocation6], 32768  }
  0x1f   : > { %4711 = vsyncadd (%p4463_p9), [#allocation6], 4294934528  ;;  %p359_p13 = scmp.lt.s32.totalorder %s4809_s13, 1  ;;  %vm403_vm0 = vcmask 1043456   ;;  %v4866_v0 = vld [vmem:[%s6984_s1 + $0x70] sm:$0xf] }
  0x20   : > { %v4871_v1 = vld [vmem:[%s6984_s1 + $0x78] sm:$0xf]  ;;  %v4876_v2 = vld [vmem:[%s6984_s1 + $0x30] sm:$0xf]  ;;  %4203 = vmatpush.msk.msra.mxu0 %vm403_vm0, %v4866_v0  ;;  %v4890_v4 = vld [vmem:[%s6984_s1 + $0x60] sm:$0xff]  ;;  %vm396_vm1 = vcmask 1040384  }
  0x21   : > { %s360_s24 = scalar_select %p359_p13, %s4809_s13, 1  ;;  %4205 = vmatpush.msk.msra.mxu1 %vm403_vm0, %v4871_v1  ;;  %v4885_v3 = vld [vmem:[%s6984_s1 + $0x38] sm:$0xf]  ;;  %v4895_v5 = vld [vmem:[%s6984_s1 + $0x68] sm:$0xff]  ;;  %4207 = vmatpush.msk.msra.mxu2 %vm403_vm0, %v4876_v2  ;;  %v4904_v6 = vld [vmem:[%s6984_s1 + $0x20] sm:$0xff]  ;;  %vm400_vm2 = vcmask 228352  }
  0x22   : > { %4209 = vmatpush.msk.msra.mxu3 %vm403_vm0, %v4885_v3  ;;  %v4909_v7 = vld [vmem:[%s6984_s1 + $0x28] sm:$0xff]  ;;  %v4914_v8 = vld [vmem:[%s6984_s1 + $0x50] sm:$0xff]  ;;  %423 = vmatpush.msra.mxu0 %v4890_v4  ;;  %v4926_v9 = vld [vmem:[%s6984_s1 + $0x58] sm:$0xff]  ;;  %vm609_vm3 = vcmask 1041408   ;;  %vm730_vm4 = vcmask 1042432   ;;  %vm2304_vm5 = vcmask 523264  }
  0x23   : > { %s4441_s3 = sshll.u32 %s360_s24, 5  ;;  %443 = vmatpush.msra.mxu1 %v4895_v5  ;;  %v4931_v10 = vld [vmem:[%s6984_s1 + $0x10] sm:$0xff]  ;;  %v4936_v11 = vld [vmem:[%s6984_s1 + $0x18] sm:$0xff]  ;;  %471 = vmatpush.msra.mxu2 %v4904_v6  ;;  %v4943_v12 = vld [vmem:[%s6984_s1 + $0x40] sm:$0xff]  ;;  %s357_s16 = sand.u32 1, %s4722_s10  }
  0x24   : > { %s4919_s17 = scalar_lea.vmem %s6983_s0, %s4441_s3  ;;  %491 = vmatpush.msra.mxu3 %v4909_v7  ;;  %v4948_v13 = vld [vmem:[%s6984_s1 + $0x48] sm:$0xff]  ;;  %v4953_v14 = vld [vmem:[%s6984_s1] sm:$0xff]  ;;  %424 = vmatpush.msra.mxu0 %v4914_v8  ;;  %v4984_v21 = vld [vmem:[%s6984_s1 + $0x1b0] sm:$0xf]  ;;  %s358_s24 = scalar_lea.vmem [#allocation7], %s357_s16 }
  0x25   : > { %444 = vmatpush.msra.mxu1 %v4926_v9  ;;  %v4960_v15 = vld [vmem:[%s6984_s1 + $0x8] sm:$0xff]  ;;  %v4963_v16 = vld [vmem:[%s4919_s17] sm:$0xff]  ;;  %472 = vmatpush.msra.mxu2 %v4931_v10  ;;  %v4989_v22 = vld [vmem:[%s6984_s1 + $0x1b8] sm:$0xf]  ;;  %s4098_s21 = sshll.u32 %s358_s24, 4  ;;  %s4088_s26 = scalar_lea.sflag [#allocation4], %s357_s16  ;;  %s4099_s21 = int_to_ptr.vmem [resolvable:$true] %s4098_s21 }
  0x26   : > { %v4966_v17 = vld [vmem:[%s4919_s17 + $0x8] sm:$0xff]  ;;  %492 = vmatpush.msra.mxu3 %v4936_v11  ;;  %v397_v18 = vrot.slane %v4963_v16, 7  ;;  %425 = vmatpush.msra.mxu0 %v4943_v12  ;;  %v4998_v23 = vld [vmem:[%s6984_s1 + $0x170] sm:$0xf]  ;;  %v5003_v24 = vld [vmem:[%s6984_s1 + $0x178] sm:$0xf] }
  0x27   : > { %7149 = vst [vmem:[#allocation11_spill] sm:$0xff] %v4966_v17  ;;  %v6994_v19 = vrot.slane %v4966_v17, 7  ;;  %445 = vmatpush.msra.mxu1 %v4948_v13  ;;  %473 = vmatpush.msra.mxu2 %v4953_v14  ;;  %v5012_v25 = vld [vmem:[%s6984_s1 + $0x1a0] sm:$0xff]  ;;  %v5017_v26 = vld [vmem:[%s6984_s1 + $0x1a8] sm:$0xff]  ;;  %v5040_v29 = vld [vmem:[%s6984_s1 + $0x190] sm:$0xff]  ;;  %v610_v49 = vrot.slane %v4966_v17, 6 }
  0x28   : > { %493 = vmatpush.msra.mxu3 %v4960_v15  ;;  %4208 = vmatmul.msk.f32.vlgmr.msra.gmra.mxu2 %vm400_vm2, %v4963_v16  ;;  %v5026_v27 = vld [vmem:[%s6984_s1 + $0x160] sm:$0xff]  ;;  %v5031_v28 = vld [vmem:[%s6984_s1 + $0x168] sm:$0xff]  ;;  %v5045_v30 = vld [vmem:[%s6984_s1 + $0x198] sm:$0xff]  ;;  %s4680_s29 = scalar_lea.hbm %s6992_s9, 2 }
  0x29   : > { %v4979_v20 = vsel %vm396_vm1, %v397_v18, %v6994_v19  ;;  %4210 = vmatmul.msk.f32.vlgmr.msra.gmra.mxu3 %vm400_vm2, %v4963_v16  ;;  %4219 = vmatpush.msk.msrb.mxu0 %vm403_vm0, %v4984_v21  ;;  %v5052_v31 = vld [vmem:[%s6984_s1 + $0x150] sm:$0xff]  ;;  %v5057_v32 = vld [vmem:[%s6984_s1 + $0x158] sm:$0xff]  ;;  %v5064_v33 = vld [vmem:[%s6984_s1 + $0x180] sm:$0xff] }
  0x2a   : > { %4204 = vmatmul.msk.f32.vlgmr.msra.gmra.mxu0 %vm400_vm2, %v4979_v20  ;;  %4206 = vmatmul.msk.f32.vlgmr.msra.gmra.mxu1 %vm400_vm2, %v4979_v20  ;;  %v5069_v34 = vld [vmem:[%s6984_s1 + $0x188] sm:$0xff]  ;;  %v5076_v35 = vld [vmem:[%s6984_s1 + $0x140] sm:$0xff]  ;;  %v5092_v37 = vld [vmem:[%s6984_s1 + $0xb0] sm:$0xf] }
  0x2b   : > { %4221 = vmatpush.msk.msrb.mxu1 %vm403_vm0, %v4989_v22  ;;  %4223 = vmatpush.msk.msrb.mxu2 %vm403_vm0, %v4998_v23  ;;  %v5081_v36 = vld [vmem:[%s6984_s1 + $0x148] sm:$0xff]  ;;  %7150 = vst [vmem:[#allocation12_spill] sm:$0xff] %v5092_v37  ;;  %v5097_v38 = vld [vmem:[%s6984_s1 + $0xb8] sm:$0xf]  ;;  %v5100_v39 = vld [vmem:[%s4919_s17 + $0x10] sm:$0xff] }
  0x2c   : > { %4225 = vmatpush.msk.msrb.mxu3 %vm403_vm0, %v5003_v24  ;;  %526 = vmatpush.msrb.mxu0 %v5012_v25  ;;  %7151 = vst [vmem:[#allocation13_spill] sm:$0xff] %v5097_v38  ;;  %v5109_v40 = vld [vmem:[%s6984_s1 + $0x1f0] sm:$0xf]  ;;  %v5114_v41 = vld [vmem:[%s6984_s1 + $0x1f8] sm:$0xf]  ;;  %v5123_v42 = vld [vmem:[%s6984_s1 + $0xa0] sm:$0xff] }
  0x2d   : > { %546 = vmatpush.msrb.mxu1 %v5017_v26  ;;  %572 = vmatpush.msrb.mxu2 %v5026_v27  ;;  %7152 = vst [vmem:[#allocation14_spill] sm:$0xff] %v5100_v39  ;;  %v5128_v43 = vld [vmem:[%s6984_s1 + $0xa8] sm:$0xff]  ;;  %v5137_v44 = vld [vmem:[%s6984_s1 + $0x1e0] sm:$0xff]  ;;  %v6993_v46 = vrot.slane %v5100_v39, 6  ;;  %v5152_v47 = vld [vmem:[%s6984_s1 + $0x90] sm:$0xff] }
  0x2e   : > { %592 = vmatpush.msrb.mxu3 %v5031_v28  ;;  %527 = vmatpush.msrb.mxu0 %v5040_v29  ;;  %7153 = vst [vmem:[#allocation15_spill] sm:$0xff] %v5109_v40  ;;  %v5142_v45 = vld [vmem:[%s6984_s1 + $0x1e8] sm:$0xff]  ;;  %v5157_v48 = vld [vmem:[%s6984_s1 + $0x98] sm:$0xff]  ;;  %v5165_v50 = vld [vmem:[%s6984_s1 + $0x1d0] sm:$0xff] }
  0x2f   : > { %547 = vmatpush.msrb.mxu1 %v5045_v30  ;;  %573 = vmatpush.msrb.mxu2 %v5052_v31  ;;  %7154 = vst [vmem:[#allocation16_spill] sm:$0xff] %v5114_v41  ;;  %v5170_v51 = vld [vmem:[%s6984_s1 + $0x1d8] sm:$0xff]  ;;  %v5177_v52 = vld [vmem:[%s6984_s1 + $0x80] sm:$0xff]  ;;  %v5182_v53 = vld [vmem:[%s6984_s1 + $0x88] sm:$0xff]  ;;  %v5201_v56 = vsel %vm609_vm3, %v610_v49, %v6993_v46  ;;  %v731_v46 = vrot.slane %v5100_v39, 5 }
  0x30   : > { %593 = vmatpush.msrb.mxu3 %v5057_v32  ;;  %528 = vmatpush.msrb.mxu0 %v5064_v33  ;;  %7155 = vst [vmem:[#allocation17_spill] sm:$0xff] %v5123_v42  ;;  %v5189_v54 = vld [vmem:[%s6984_s1 + $0x1c0] sm:$0xff]  ;;  %v5194_v55 = vld [vmem:[%s6984_s1 + $0x1c8] sm:$0xff]  ;;  %v5210_v57 = vld [vmem:[%s6984_s1 + $0xf0] sm:$0xf] }
  0x31   : > { %548 = vmatpush.msrb.mxu1 %v5069_v34  ;;  %574 = vmatpush.msrb.mxu2 %v5076_v35  ;;  %7156 = vst [vmem:[#allocation18_spill] sm:$0xff] %v5152_v47  ;;  %v5215_v58 = vld [vmem:[%s6984_s1 + $0xf8] sm:$0xf]  ;;  %v5227_v60 = vld [vmem:[%s6984_s1 + $0x230] sm:$0xf]  ;;  %v5241_v62 = vld [vmem:[%s6984_s1 + $0xe0] sm:$0xff] }
  0x32   : > { %594 = vmatpush.msrb.mxu3 %v5081_v36  ;;  %4220 = vmatmul.msk.f32.vlgmr.msrb.gmra.mxu0 %vm400_vm2, %v4979_v20  ;;  %7157 = vst [vmem:[#allocation19_spill] sm:$0xff] %v5157_v48  ;;  %v5218_v59 = vld [vmem:[%s4919_s17 + $0x18] sm:$0xf]  ;;  %v5246_v63 = vld [vmem:[%s6984_s1 + $0xe8] sm:$0xff]  ;;  %v5255_v18 = vld [vmem:[%s6984_s1 + $0x220] sm:$0xff]  ;;  %s4096_s17 = scalar_lea.hbm %s6992_s9, %s4809_s13 }
  0x33   : > { %4222 = vmatmul.msk.f32.vlgmr.msrb.gmra.mxu1 %vm400_vm2, %v4979_v20  ;;  %4224 = vmatmul.msk.f32.vlgmr.msrb.gmra.mxu2 %vm400_vm2, %v4963_v16  ;;  %7158 = vst [vmem:[#allocation20_spill] sm:$0xff] %v5165_v50  ;;  %v5232_v61 = vld [vmem:[%s6984_s1 + $0x238] sm:$0xf]  ;;  %v5260_v49 = vld [vmem:[%s6984_s1 + $0x228] sm:$0xff]  ;;  %v732_v19 = vrot.slane %v5218_v59, 5  ;;  %v5271_v17 = vld [vmem:[%s6984_s1 + $0xd0] sm:$0xff] }
  0x34   : > { %4226 = vmatmul.msk.f32.vlgmr.msrb.gmra.mxu3 %vm400_vm2, %v4963_v16  ;;  %4235 = vmatpush.msk.msra.mxu0 %vm403_vm0, %v5092_v37  ;;  %7159 = vst [vmem:[#allocation21_spill] sm:$0xff] %v5170_v51  ;;  %v5288_v39 = vld [vmem:[%s6984_s1 + $0x218] sm:$0xff]  ;;  %s4100_s25 = sshll.u32 %s4096_s17, 4  ;;  %s4101_s25 = int_to_ptr.hbm [resolvable:$true] %s4100_s25 }
  0x35   : > { %4237 = vmatpush.msk.msra.mxu1 %vm403_vm0, %v5097_v38  ;;  %4247 = vmatpush.msk.msra.mxu2 %vm403_vm0, %v5109_v40  ;;  %7160 = vst [vmem:[#allocation22_spill] sm:$0xff] %v5177_v52  ;;  %s4674_s3 = sshra.s32 %s4101_s25, 4  ;;  %s4675_s3 = int_to_ptr.hbm [resolvable:$true] %s4674_s3 }
  0x36   : > { %4249 = vmatpush.msk.msra.mxu3 %vm403_vm0, %v5114_v41  ;;  %634 = vmatpush.msra.mxu0 %v5123_v42  ;;  %7161 = vst [vmem:[#allocation23_spill] sm:$0xff] %v5182_v53  ;;  %s4676_s27 = scalar_lea.hbm %s4675_s3, 1  ;;  %p4681_p3 = scmp.lt.s32.totalorder %s4675_s3, %s6992_s9 }
  0x37   : > { %654 = vmatpush.msra.mxu1 %v5128_v43  ;;  %691 = vmatpush.msra.mxu2 %v5137_v44  ;;  %7162 = vst [vmem:[#allocation24_spill] sm:$0xff] %v5189_v54  ;;  %p4677_p0 = scmp.ne.s32.totalorder %s4675_s3, %s4676_s27  ;;  %p4682_p4 = scmp.lt.s32.totalorder %s4680_s29, %s4676_s27 }
  0x38   : > { %711 = vmatpush.msra.mxu3 %v5142_v45  ;;  %635 = vmatpush.msra.mxu0 %v5152_v47  ;;  %7163 = vst [vmem:[#allocation25_spill] sm:$0xff] %v5194_v55 }
  0x39   : > { %655 = vmatpush.msra.mxu1 %v5157_v48  ;;  %692 = vmatpush.msra.mxu2 %v5165_v50  ;;  %7164 = vst [vmem:[#allocation26_spill] sm:$0xff] %v5210_v57  ;;  %p4678_p1 = pnand %p4677_p0, %p4826_p5  ;;  %p4683_p7 = por %p4682_p4, %p4681_p3 }
  0x3a   : > { %712 = vmatpush.msra.mxu3 %v5170_v51  ;;  %636 = vmatpush.msra.mxu0 %v5177_v52  ;;  %7165 = vst [vmem:[#allocation27_spill] sm:$0xff] %v5215_v58 }
  0x3b   : > { %656 = vmatpush.msra.mxu1 %v5182_v53  ;;  %693 = vmatpush.msra.mxu2 %v5189_v54  ;;  %7166 = vst [vmem:[#allocation28_spill] sm:$0xff] %v5218_v59  ;;  %v5283_v59 = vld [vmem:[%s6984_s1 + $0x210] sm:$0xff]  ;;  %p4679_p2 = pneg %p4678_p1 }
  0x3c   : > { %713 = vmatpush.msra.mxu3 %v5194_v55  ;;  %4236 = vmatmul.msk.f32.vlgmr.msra.gmra.mxu0 %vm400_vm2, %v5201_v56  ;;  %7167 = vst [vmem:[#allocation29_spill] sm:$0xff] %v5227_v60 }
  0x3d   : > { %4238 = vmatmul.msk.f32.vlgmr.msra.gmra.mxu1 %vm400_vm2, %v5201_v56  ;;  %7168 = vst [vmem:[#allocation30_spill] sm:$0xff] %v5232_v61  ;;  %4248 = vmatmul.msk.f32.vlgmr.msra.gmra.mxu2 %vm400_vm2, %v5201_v56  ;;  %p4684_p8 = pnand %p4683_p7, %p4679_p2 }
  0x3e   : > { %4250 = vmatmul.msk.f32.vlgmr.msra.gmra.mxu3 %vm400_vm2, %v5201_v56  ;;  %7169 = vst [vmem:[#allocation31_spill] sm:$0xff] %v5241_v62  ;;  %4259 = vmatpush.msk.msrb.mxu0 %vm403_vm0, %v5210_v57 }
  0x3f   : > { %7170 = vst [vmem:[#allocation32_spill] sm:$0xff] %v5246_v63  ;;  %4261 = vmatpush.msk.msrb.mxu1 %vm403_vm0, %v5215_v58  ;;  %4271 = vmatpush.msk.msrb.mxu2 %vm403_vm0, %v5227_v60  ;;  %v5276_v58 = vld [vmem:[%s6984_s1 + $0xd8] sm:$0xff] }
  0x40   : > { %7171 = vst [vmem:[#allocation33_spill] sm:$0xff] %v5255_v18  ;;  %4273 = vmatpush.msk.msrb.mxu3 %vm403_vm0, %v5232_v61  ;;  %755 = vmatpush.msrb.mxu0 %v5241_v62  ;;  %v5295_v62 = vld [vmem:[%s6984_s1 + $0xc0] sm:$0xff]  ;;  %v5314_v61 = vsel %vm730_vm4, %v731_v46, %v732_v19  ;;  %v5330_v19 = vld [vmem:[%s6984_s1 + $0x138] sm:$0xf]  ;;  %v5339_v46 = vld [vmem:[%s6984_s1 + $0x270] sm:$0xf] }
  0x41   : > { %7172 = vst [vmem:[#allocation34_spill] sm:$0xff] %v5260_v49  ;;  %775 = vmatpush.msrb.mxu1 %v5246_v63  ;;  %812 = vmatpush.msrb.mxu2 %v5255_v18  ;;  %v5300_v63 = vld [vmem:[%s6984_s1 + $0xc8] sm:$0xff]  ;;  %v5307_v18 = vld [vmem:[%s6984_s1 + $0x200] sm:$0xff] }
  0x42   : > { %7173 = vst [vmem:[#allocation35_spill] sm:$0xff] %v5271_v17  ;;  %832 = vmatpush.msrb.mxu3 %v5260_v49  ;;  %756 = vmatpush.msrb.mxu0 %v5271_v17  ;;  %v5312_v49 = vld [vmem:[%s6984_s1 + $0x208] sm:$0xff] }
  0x43   : > { %7174 = vst [vmem:[#allocation36_spill] sm:$0xff] %v5276_v58  ;;  %776 = vmatpush.msrb.mxu1 %v5276_v58  ;;  %813 = vmatpush.msrb.mxu2 %v5283_v59  ;;  %v5325_v58 = vld [vmem:[%s6984_s1 + $0x130] sm:$0xf] }
  0x44   : > { %7175 = vst [vmem:[#allocation37_spill] sm:$0xff] %v5283_v59  ;;  %833 = vmatpush.msrb.mxu3 %v5288_v39  ;;  %757 = vmatpush.msrb.mxu0 %v5295_v62  ;;  %v5413_v59 = vrot.slane %v4963_v16, 1  ;;  %v7190_v16 = vld [vmem:[#allocation27_spill] sm:$0xff] }
  0x45   : > { %7176 = vst [vmem:[#allocation38_spill] sm:$0xff] %v5288_v39  ;;  %777 = vmatpush.msrb.mxu1 %v5300_v63  ;;  %814 = vmatpush.msrb.mxu2 %v5307_v18  ;;  %v5372_v39 = vld [vmem:[%s6984_s1 + $0x268] sm:$0xff] }
  0x46   : > { %7177 = vst [vmem:[#allocation39_spill] sm:$0xff] %v5295_v62  ;;  %834 = vmatpush.msrb.mxu3 %v5312_v49  ;;  %4260 = vmatmul.msk.f32.vlgmr.msrb.gmra.mxu0 %vm400_vm2, %v5314_v61  ;;  %v5367_v62 = vld [vmem:[%s6984_s1 + $0x260] sm:$0xff] }
  0x47   : > { %7178 = vst [vmem:[#allocation40_spill] sm:$0xff] %v5300_v63  ;;  %4262 = vmatmul.msk.f32.vlgmr.msrb.gmra.mxu1 %vm400_vm2, %v5314_v61  ;;  %4272 = vmatmul.msk.f32.vlgmr.msrb.gmra.mxu2 %vm400_vm2, %v5314_v61  ;;  %v5358_v63 = vld [vmem:[%s6984_s1 + $0x128] sm:$0xff] }
  0x48   : > { %7179 = vst [vmem:[#allocation41_spill] sm:$0xff] %v5307_v18  ;;  %4274 = vmatmul.msk.f32.vlgmr.msrb.gmra.mxu3 %vm400_vm2, %v5314_v61  ;;  %v5353_v18 = vld [vmem:[%s6984_s1 + $0x120] sm:$0xff]  ;;  %4283 = vmatpush.msk.msra.mxu0 %vm403_vm0, %v5325_v58 }
  0x49   : > { %7180 = vst [vmem:[#allocation42_spill] sm:$0xff] %v5312_v49  ;;  %v5344_v49 = vld [vmem:[%s6984_s1 + $0x278] sm:$0xf]  ;;  %4285 = vmatpush.msk.msra.mxu1 %vm403_vm0, %v5330_v19  ;;  %4295 = vmatpush.msk.msra.mxu2 %vm403_vm0, %v5339_v46 }
  0x4a   : > { %7181 = vst [vmem:[#allocation43_spill] sm:$0xff] %v5325_v58  ;;  %4297 = vmatpush.msk.msra.mxu3 %vm403_vm0, %v5344_v49  ;;  %v5386_v58 = vld [vmem:[%s6984_s1 + $0x118] sm:$0xff]  ;;  %872 = vmatpush.msra.mxu0 %v5353_v18 }
  0x4b   : > { %7182 = vst [vmem:[#allocation44_spill] sm:$0xff] %v5330_v19  ;;  %v5381_v19 = vld [vmem:[%s6984_s1 + $0x110] sm:$0xff]  ;;  %892 = vmatpush.msra.mxu1 %v5358_v63  ;;  %929 = vmatpush.msra.mxu2 %v5367_v62 }
  0x4c   : > { %7183 = vst [vmem:[#allocation45_spill] sm:$0xff] %v5339_v46  ;;  %v5393_v46 = vld [vmem:[%s6984_s1 + $0x250] sm:$0xff]  ;;  %949 = vmatpush.msra.mxu3 %v5372_v39  ;;  %873 = vmatpush.msra.mxu0 %v5381_v19 }
  0x4d   : > { %7184 = vst [vmem:[#allocation46_spill] sm:$0xff] %v5344_v49  ;;  %v5398_v49 = vld [vmem:[%s6984_s1 + $0x258] sm:$0xff]  ;;  %893 = vmatpush.msra.mxu1 %v5386_v58  ;;  %930 = vmatpush.msra.mxu2 %v5393_v46 }
  0x4e   : > { %7185 = vst [vmem:[#allocation47_spill] sm:$0xff] %v5353_v18  ;;  %v5405_v18 = vld [vmem:[%s6984_s1 + $0x100] sm:$0xff]  ;;  %950 = vmatpush.msra.mxu3 %v5398_v49 }
  0x4f   : > { %7186 = vst [vmem:[#allocation48_spill] sm:$0xff] %v5358_v63  ;;  %v5410_v63 = vld [vmem:[%s6984_s1 + $0x108] sm:$0xff]  ;;  %874 = vmatpush.msra.mxu0 %v5405_v18 }
  0x50   : > { %7187 = vst [vmem:[#allocation49_spill] sm:$0xff] %v5367_v62  ;;  %v5425_v62 = vld [vmem:[%s6984_s1 + $0x248] sm:$0xff]  ;;  %894 = vmatpush.msra.mxu1 %v5410_v63  ;;  %4284 = vmatmul.msk.f32.vlgmr.msra.gmra.mxu0 %vm400_vm2, %v5413_v59 }
  0x51   : > { %7188 = vst [vmem:[#allocation50_spill] sm:$0xff] %v5372_v39  ;;  %v5420_v39 = vld [vmem:[%s6984_s1 + $0x240] sm:$0xff]  ;;  %951 = vmatpush.msra.mxu3 %v5425_v62  ;;  %4286 = vmatmul.msk.f32.vlgmr.msra.gmra.mxu1 %vm400_vm2, %v5413_v59 }
  0x52   : > { %7189 = vst [vmem:[#allocation51_spill] sm:$0xff] %v5398_v49  ;;  %931 = vmatpush.msra.mxu2 %v5420_v39  ;;  %4298 = vmatmul.msk.f32.vlgmr.msra.gmra.mxu3 %vm400_vm2, %v5413_v59 }
  0x53   : > { %4296 = vmatmul.msk.f32.vlgmr.msra.gmra.mxu2 %vm400_vm2, %v5413_v59  ;;  %4299 = vmatpush.msk.msrb.mxu0 %vm403_vm0, %v4866_v0 }
  0x54   : > { %4301 = vmatpush.msk.msrb.mxu1 %vm403_vm0, %v4871_v1  ;;  %4303 = vmatpush.msk.msrb.mxu2 %vm403_vm0, %v4876_v2 }
  0x55   : > { %4305 = vmatpush.msk.msrb.mxu3 %vm403_vm0, %v4885_v3  ;;  %971 = vmatpush.msrb.mxu0 %v4890_v4 }
  0x56   : > { %991 = vmatpush.msrb.mxu1 %v4895_v5  ;;  %1011 = vmatpush.msrb.mxu2 %v4904_v6 }
  0x57   : > { %1031 = vmatpush.msrb.mxu3 %v4909_v7  ;;  %972 = vmatpush.msrb.mxu0 %v4914_v8 }
  0x58   : > { %992 = vmatpush.msrb.mxu1 %v4926_v9  ;;  %1012 = vmatpush.msrb.mxu2 %v4931_v10 }
  0x59   : > { %1032 = vmatpush.msrb.mxu3 %v4936_v11  ;;  %973 = vmatpush.msrb.mxu0 %v4943_v12 }
  0x5a   : > { %993 = vmatpush.msrb.mxu1 %v4948_v13  ;;  %1013 = vmatpush.msrb.mxu2 %v4953_v14 }
  0x5b   : > { %1033 = vmatpush.msrb.mxu3 %v4960_v15  ;;  %4300 = vmatmul.msk.f32.vlgmr.msrb.gmra.mxu0 %vm400_vm2, %v5201_v56 }
  0x5c   : > { %4302 = vmatmul.msk.f32.vlgmr.msrb.gmra.mxu1 %vm400_vm2, %v5201_v56  ;;  %4304 = vmatmul.msk.f32.vlgmr.msrb.gmra.mxu2 %vm400_vm2, %v4979_v20 }
  0x5d   : > { %4306 = vmatmul.msk.f32.vlgmr.msrb.gmra.mxu3 %vm400_vm2, %v4979_v20  ;;  %4307 = vmatpush.msk.msra.mxu0 %vm403_vm0, %v4984_v21 }
  0x5e   : > { %4309 = vmatpush.msk.msra.mxu1 %vm403_vm0, %v4989_v22  ;;  %4311 = vmatpush.msk.msra.mxu2 %vm403_vm0, %v4998_v23 }
  0x5f   : > { %4313 = vmatpush.msk.msra.mxu3 %vm403_vm0, %v5003_v24  ;;  %1051 = vmatpush.msra.mxu0 %v5012_v25 }
  0x60   : > { %1071 = vmatpush.msra.mxu1 %v5017_v26  ;;  %1091 = vmatpush.msra.mxu2 %v5026_v27 }
  0x61   : > { %1111 = vmatpush.msra.mxu3 %v5031_v28  ;;  %1052 = vmatpush.msra.mxu0 %v5040_v29 }
  0x62   : > { %1072 = vmatpush.msra.mxu1 %v5045_v30  ;;  %1092 = vmatpush.msra.mxu2 %v5052_v31 }
  0x63   : > { %1112 = vmatpush.msra.mxu3 %v5057_v32  ;;  %1053 = vmatpush.msra.mxu0 %v5064_v33 }
  0x64   : > { %1073 = vmatpush.msra.mxu1 %v5069_v34  ;;  %1093 = vmatpush.msra.mxu2 %v5076_v35 }
  0x65   : > { %1113 = vmatpush.msra.mxu3 %v5081_v36  ;;  %4308 = vmatmul.msk.f32.vlgmr.msra.gmra.mxu0 %vm400_vm2, %v5201_v56 }
  0x66   : > { %4310 = vmatmul.msk.f32.vlgmr.msra.gmra.mxu1 %vm400_vm2, %v5201_v56  ;;  %4312 = vmatmul.msk.f32.vlgmr.msra.gmra.mxu2 %vm400_vm2, %v4979_v20 }
  0x67   : > { %4314 = vmatmul.msk.f32.vlgmr.msra.gmra.mxu3 %vm400_vm2, %v4979_v20  ;;  %4315 = vmatpush.msk.msrb.mxu0 %vm403_vm0, %v5092_v37  ;;  %v7191_v20 = vld [vmem:[#allocation30_spill] sm:$0xff] }
  0x68   : > { %4317 = vmatpush.msk.msrb.mxu1 %vm403_vm0, %v5097_v38  ;;  %4319 = vmatpush.msk.msrb.mxu2 %vm403_vm0, %v5109_v40 }
  0x69   : > { %4321 = vmatpush.msk.msrb.mxu3 %vm403_vm0, %v5114_v41  ;;  %1131 = vmatpush.msrb.mxu0 %v5123_v42 }
  0x6a   : > { %1151 = vmatpush.msrb.mxu1 %v5128_v43  ;;  %1173 = vmatpush.msrb.mxu2 %v5137_v44 }
  0x6b   : > { %1193 = vmatpush.msrb.mxu3 %v5142_v45  ;;  %1132 = vmatpush.msrb.mxu0 %v5152_v47 }
  0x6c   : > { %1152 = vmatpush.msrb.mxu1 %v5157_v48  ;;  %1174 = vmatpush.msrb.mxu2 %v5165_v50  ;;  %v7200_v50 = vld [vmem:[#allocation40_spill] sm:$0xff] }
  0x6d   : > { %1194 = vmatpush.msrb.mxu3 %v5170_v51  ;;  %1133 = vmatpush.msrb.mxu0 %v5177_v52  ;;  %v7195_v52 = vld [vmem:[#allocation34_spill] sm:$0xff]  ;;  %v7197_v51 = vld [vmem:[#allocation37_spill] sm:$0xff] }
  0x6e   : > { %1153 = vmatpush.msrb.mxu1 %v5182_v53  ;;  %1175 = vmatpush.msrb.mxu2 %v5189_v54  ;;  %v7193_v54 = vld [vmem:[#allocation32_spill] sm:$0xff]  ;;  %v7194_v53 = vld [vmem:[#allocation33_spill] sm:$0xff] }
  0x6f   : > { %1195 = vmatpush.msrb.mxu3 %v5194_v55  ;;  %4316 = vmatmul.msk.f32.vlgmr.msrb.gmra.mxu0 %vm400_vm2, %v5314_v61  ;;  %v7192_v55 = vld [vmem:[#allocation31_spill] sm:$0xff] }
  0x70   : > { %4318 = vmatmul.msk.f32.vlgmr.msrb.gmra.mxu1 %vm400_vm2, %v5314_v61  ;;  %4320 = vmatmul.msk.f32.vlgmr.msrb.gmra.mxu2 %vm400_vm2, %v5314_v61 }
  0x71   : > { %4322 = vmatmul.msk.f32.vlgmr.msrb.gmra.mxu3 %vm400_vm2, %v5314_v61  ;;  %4323 = vmatpush.msk.msra.mxu0 %vm403_vm0, %v5210_v57  ;;  %v7196_v57 = vld [vmem:[#allocation36_spill] sm:$0xff] }
  0x72   : > { %4325 = vmatpush.msk.msra.mxu1 %vm403_vm0, %v7190_v16  ;;  %4327 = vmatpush.msk.msra.mxu2 %vm403_vm0, %v5227_v60  ;;  %v7198_v16 = vld [vmem:[#allocation38_spill] sm:$0xff]  ;;  %v7199_v60 = vld [vmem:[#allocation39_spill] sm:$0xff] }
  0x73   : > { %4329 = vmatpush.msk.msra.mxu3 %vm403_vm0, %v7191_v20  ;;  %1215 = vmatpush.msra.mxu0 %v7192_v55  ;;  %v7201_v20 = vld [vmem:[#allocation41_spill] sm:$0xff]  ;;  %v7202_v55 = vld [vmem:[#allocation42_spill] sm:$0xff] }
  0x74   : > { %1235 = vmatpush.msra.mxu1 %v7193_v54  ;;  %1257 = vmatpush.msra.mxu2 %v7194_v53 }
  0x75   : > { %1277 = vmatpush.msra.mxu3 %v7195_v52  ;;  %1216 = vmatpush.msra.mxu0 %v5271_v17  ;;  %v7210_v17 = vld [vmem:[#allocation50_spill] sm:$0xff] }
  0x76   : > { %1236 = vmatpush.msra.mxu1 %v7196_v57  ;;  %1258 = vmatpush.msra.mxu2 %v7197_v51  ;;  %v7208_v51 = vld [vmem:[#allocation48_spill] sm:$0xff]  ;;  %v7209_v57 = vld [vmem:[#allocation49_spill] sm:$0xff] }
  0x77   : > { %1278 = vmatpush.msra.mxu3 %v7198_v16  ;;  %1217 = vmatpush.msra.mxu0 %v7199_v60  ;;  %v7203_v16 = vld [vmem:[#allocation43_spill] sm:$0xff] }
  0x78   : > { %1237 = vmatpush.msra.mxu1 %v7200_v50  ;;  %1259 = vmatpush.msra.mxu2 %v7201_v20  ;;  %v7204_v50 = vld [vmem:[#allocation44_spill] sm:$0xff]  ;;  %v7205_v20 = vld [vmem:[#allocation45_spill] sm:$0xff]  ;;  %v7207_v60 = vld [vmem:[#allocation47_spill] sm:$0xff] }
  0x79   : > { %1279 = vmatpush.msra.mxu3 %v7202_v55  ;;  %4324 = vmatmul.msk.f32.vlgmr.msra.gmra.mxu0 %vm400_vm2, %v5413_v59  ;;  %v7206_v55 = vld [vmem:[#allocation46_spill] sm:$0xff] }
  0x7a   : > { %4326 = vmatmul.msk.f32.vlgmr.msra.gmra.mxu1 %vm400_vm2, %v5413_v59  ;;  %4328 = vmatmul.msk.f32.vlgmr.msra.gmra.mxu2 %vm400_vm2, %v5413_v59 }
  0x7b   : > { %4330 = vmatmul.msk.f32.vlgmr.msra.gmra.mxu3 %vm400_vm2, %v5413_v59  ;;  %4331 = vmatpush.msk.msrb.mxu0 %vm403_vm0, %v7203_v16 }
  0x7c   : > { %4333 = vmatpush.msk.msrb.mxu1 %vm403_vm0, %v7204_v50  ;;  %4335 = vmatpush.msk.msrb.mxu2 %vm403_vm0, %v7205_v20 }
  0x7d   : > { %4337 = vmatpush.msk.msrb.mxu3 %vm403_vm0, %v7206_v55  ;;  %1301 = vmatpush.msrb.mxu0 %v7207_v60 }
  0x7e   : > { %1321 = vmatpush.msrb.mxu1 %v7208_v51  ;;  %1343 = vmatpush.msrb.mxu2 %v7209_v57  ;;  %v7211_v51 = vld [vmem:[#allocation11_spill] sm:$0xff] }
  0x7f   : > { %1363 = vmatpush.msrb.mxu3 %v7210_v17  ;;  %1302 = vmatpush.msrb.mxu0 %v5381_v19 }
  0x80   : > { %1322 = vmatpush.msrb.mxu1 %v5386_v58  ;;  %1344 = vmatpush.msrb.mxu2 %v5393_v46 }
  0x81   : > { %1364 = vmatpush.msrb.mxu3 %v5398_v49  ;;  %1303 = vmatpush.msrb.mxu0 %v5405_v18 }
  0x82   : > { %1323 = vmatpush.msrb.mxu1 %v5410_v63  ;;  %1345 = vmatpush.msrb.mxu2 %v5420_v39 }
  0x83   : > { %1365 = vmatpush.msrb.mxu3 %v5425_v62  ;;  %4332 = vmatmul.msk.f32.vlgmr.msrb.gmra.mxu0 %vm400_vm2, %v7211_v51 }
  0x84   : > { %4334 = vmatmul.msk.f32.vlgmr.msrb.gmra.mxu1 %vm400_vm2, %v7211_v51  ;;  %4336 = vmatmul.msk.f32.vlgmr.msrb.gmra.mxu2 %vm400_vm2, %v7211_v51 }
  0x85   : > { %4338 = vmatmul.msk.f32.vlgmr.msrb.gmra.mxu3 %vm400_vm2, %v7211_v51  ;;  %4339 = vmatpush.msk.msra.mxu0 %vm403_vm0, %v4866_v0 }
  0x86   : > { %4341 = vmatpush.msk.msra.mxu1 %vm403_vm0, %v4871_v1  ;;  %4343 = vmatpush.msk.msra.mxu2 %vm403_vm0, %v4876_v2 }
  0x87   : > { %4345 = vmatpush.msk.msra.mxu3 %vm403_vm0, %v4885_v3  ;;  %1401 = vmatpush.msra.mxu0 %v4890_v4 }
  0x88   : > { %1421 = vmatpush.msra.mxu1 %v4895_v5  ;;  %1441 = vmatpush.msra.mxu2 %v4904_v6 }
  0x89   : > { %1461 = vmatpush.msra.mxu3 %v4909_v7  ;;  %1402 = vmatpush.msra.mxu0 %v4914_v8 }
  0x8a   : > { %1422 = vmatpush.msra.mxu1 %v4926_v9  ;;  %1442 = vmatpush.msra.mxu2 %v4931_v10 }
  0x8b   : > { %1462 = vmatpush.msra.mxu3 %v4936_v11  ;;  %1403 = vmatpush.msra.mxu0 %v4943_v12 }
  0x8c   : > { %1423 = vmatpush.msra.mxu1 %v4948_v13  ;;  %1443 = vmatpush.msra.mxu2 %v4953_v14 }
  0x8d   : > { %1463 = vmatpush.msra.mxu3 %v4960_v15  ;;  %4340 = vmatmul.msk.f32.vlgmr.msra.gmra.mxu0 %vm400_vm2, %v5314_v61 }
  0x8e   : > { %4342 = vmatmul.msk.f32.vlgmr.msra.gmra.mxu1 %vm400_vm2, %v5314_v61  ;;  %4344 = vmatmul.msk.f32.vlgmr.msra.gmra.mxu2 %vm400_vm2, %v5201_v56 }
  0x8f   : > { %4346 = vmatmul.msk.f32.vlgmr.msra.gmra.mxu3 %vm400_vm2, %v5201_v56  ;;  %4347 = vmatpush.msk.msrb.mxu0 %vm403_vm0, %v4984_v21 }
  0x90   : > { %4349 = vmatpush.msk.msrb.mxu1 %vm403_vm0, %v4989_v22  ;;  %4351 = vmatpush.msk.msrb.mxu2 %vm403_vm0, %v4998_v23 }
  0x91   : > { %4353 = vmatpush.msk.msrb.mxu3 %vm403_vm0, %v5003_v24  ;;  %1481 = vmatpush.msrb.mxu0 %v5012_v25 }
  0x92   : > { %1501 = vmatpush.msrb.mxu1 %v5017_v26  ;;  %1521 = vmatpush.msrb.mxu2 %v5026_v27 }
  0x93   : > { %1541 = vmatpush.msrb.mxu3 %v5031_v28  ;;  %1482 = vmatpush.msrb.mxu0 %v5040_v29 }
  0x94   : > { %1502 = vmatpush.msrb.mxu1 %v5045_v30  ;;  %1522 = vmatpush.msrb.mxu2 %v5052_v31 }
  0x95   : > { %1542 = vmatpush.msrb.mxu3 %v5057_v32  ;;  %1483 = vmatpush.msrb.mxu0 %v5064_v33 }
  0x96   : > { %1503 = vmatpush.msrb.mxu1 %v5069_v34  ;;  %1523 = vmatpush.msrb.mxu2 %v5076_v35 }
  0x97   : > { %1543 = vmatpush.msrb.mxu3 %v5081_v36  ;;  %4348 = vmatmul.msk.f32.vlgmr.msrb.gmra.mxu0 %vm400_vm2, %v5314_v61 }
  0x98   : > { %4350 = vmatmul.msk.f32.vlgmr.msrb.gmra.mxu1 %vm400_vm2, %v5314_v61  ;;  %4352 = vmatmul.msk.f32.vlgmr.msrb.gmra.mxu2 %vm400_vm2, %v5201_v56 }
  0x99   : > { %4354 = vmatmul.msk.f32.vlgmr.msrb.gmra.mxu3 %vm400_vm2, %v5201_v56  ;;  %4355 = vmatpush.msk.msra.mxu0 %vm403_vm0, %v5092_v37  ;;  %v7212_v56 = vld [vmem:[#allocation20_spill] sm:$0xff]  ;;  %v7215_v37 = vld [vmem:[#allocation23_spill] sm:$0xff] }
  0x9a   : > { %4357 = vmatpush.msk.msra.mxu1 %vm403_vm0, %v5097_v38  ;;  %4359 = vmatpush.msk.msra.mxu2 %vm403_vm0, %v5109_v40  ;;  %v7213_v38 = vld [vmem:[#allocation21_spill] sm:$0xff]  ;;  %v7214_v40 = vld [vmem:[#allocation22_spill] sm:$0xff] }
  0x9b   : > { %4361 = vmatpush.msk.msra.mxu3 %vm403_vm0, %v5114_v41  ;;  %1561 = vmatpush.msra.mxu0 %v5123_v42  ;;  %v7216_v41 = vld [vmem:[#allocation24_spill] sm:$0xff]  ;;  %v7217_v42 = vld [vmem:[#allocation25_spill] sm:$0xff] }
  0x9c   : > { %1581 = vmatpush.msra.mxu1 %v5128_v43  ;;  %1603 = vmatpush.msra.mxu2 %v5137_v44 }
  0x9d   : > { %1623 = vmatpush.msra.mxu3 %v5142_v45  ;;  %1562 = vmatpush.msra.mxu0 %v5152_v47  ;;  %v7228_v47 = vld [vmem:[#allocation40_spill] sm:$0xff] }
  0x9e   : > { %1582 = vmatpush.msra.mxu1 %v5157_v48  ;;  %1604 = vmatpush.msra.mxu2 %v7212_v56  ;;  %v7223_v56 = vld [vmem:[#allocation35_spill] sm:$0xff]  ;;  %v7225_v48 = vld [vmem:[#allocation37_spill] sm:$0xff] }
  0x9f   : > { %1624 = vmatpush.msra.mxu3 %v7213_v38  ;;  %1563 = vmatpush.msra.mxu0 %v7214_v40  ;;  %v7218_v38 = vld [vmem:[#allocation26_spill] sm:$0xff]  ;;  %v7222_v40 = vld [vmem:[#allocation31_spill] sm:$0xff] }
  0xa0   : > { %1583 = vmatpush.msra.mxu1 %v7215_v37  ;;  %1605 = vmatpush.msra.mxu2 %v7216_v41  ;;  %v7219_v37 = vld [vmem:[#allocation27_spill] sm:$0xff]  ;;  %v7220_v41 = vld [vmem:[#allocation29_spill] sm:$0xff] }
  0xa1   : > { %1625 = vmatpush.msra.mxu3 %v7217_v42  ;;  %4356 = vmatmul.msk.f32.vlgmr.msra.gmra.mxu0 %vm400_vm2, %v5413_v59  ;;  %v7221_v42 = vld [vmem:[#allocation30_spill] sm:$0xff] }
  0xa2   : > { %4358 = vmatmul.msk.f32.vlgmr.msra.gmra.mxu1 %vm400_vm2, %v5413_v59  ;;  %4360 = vmatmul.msk.f32.vlgmr.msra.gmra.mxu2 %vm400_vm2, %v5413_v59 }
  0xa3   : > { %4362 = vmatmul.msk.f32.vlgmr.msra.gmra.mxu3 %vm400_vm2, %v5413_v59  ;;  %4363 = vmatpush.msk.msrb.mxu0 %vm403_vm0, %v7218_v38  ;;  %v7224_v38 = vld [vmem:[#allocation36_spill] sm:$0xff] }
  0xa4   : > { %4365 = vmatpush.msk.msrb.mxu1 %vm403_vm0, %v7219_v37  ;;  %4367 = vmatpush.msk.msrb.mxu2 %vm403_vm0, %v7220_v41  ;;  %v7226_v37 = vld [vmem:[#allocation38_spill] sm:$0xff]  ;;  %v7227_v41 = vld [vmem:[#allocation39_spill] sm:$0xff] }
  0xa5   : > { %4369 = vmatpush.msk.msrb.mxu3 %vm403_vm0, %v7221_v42  ;;  %1645 = vmatpush.msrb.mxu0 %v7222_v40  ;;  %v7229_v42 = vld [vmem:[#allocation41_spill] sm:$0xff]  ;;  %v7230_v40 = vld [vmem:[#allocation42_spill] sm:$0xff] }
  0xa6   : > { %1665 = vmatpush.msrb.mxu1 %v7193_v54  ;;  %1687 = vmatpush.msrb.mxu2 %v7194_v53 }
  0xa7   : > { %1707 = vmatpush.msrb.mxu3 %v7195_v52  ;;  %1646 = vmatpush.msrb.mxu0 %v7223_v56  ;;  %v5689_v56 = vpop.f32.mrf.mxu0 }
  0xa8   : > { %1666 = vmatpush.msrb.mxu1 %v7224_v38  ;;  %1688 = vmatpush.msrb.mxu2 %v7225_v48  ;;  %7231 = vst [vmem:[#allocation32_spill] sm:$0xff] %v5689_v56  ;;  %v5691_v38 = vpop.f32.mrf.mxu1 }
  0xa9   : > { %1708 = vmatpush.msrb.mxu3 %v7226_v37  ;;  %1647 = vmatpush.msrb.mxu0 %v7227_v41  ;;  %7232 = vst [vmem:[#allocation33_spill] sm:$0xff] %v5691_v38  ;;  %v7235_v38 = vld [vmem:[#allocation14_spill] sm:$0xff] }
  0xaa   : > { %1667 = vmatpush.msrb.mxu1 %v7228_v47  ;;  %1689 = vmatpush.msrb.mxu2 %v7229_v42  ;;  %v1716_v56 = vrot.slane %v7235_v38, 7  ;;  %v7236_v47 = vld [vmem:[#allocation48_spill] sm:$0xff] }
  0xab   : > { %1709 = vmatpush.msrb.mxu3 %v7230_v40  ;;  %4364 = vmatmul.msk.f32.vlgmr.msrb.gmra.mxu0 %vm400_vm2, %v7211_v51  ;;  %v5701_v40 = vpop.f32.mrf.mxu2 }
  0xac   : > { %4366 = vmatmul.msk.f32.vlgmr.msrb.gmra.mxu1 %vm400_vm2, %v7211_v51  ;;  %4368 = vmatmul.msk.f32.vlgmr.msrb.gmra.mxu2 %vm400_vm2, %v7211_v51  ;;  %7233 = vst [vmem:[#allocation34_spill] sm:$0xff] %v5701_v40  ;;  %v5703_v42 = vpop.f32.mrf.mxu3 }
  0xad   : > { %4370 = vmatmul.msk.f32.vlgmr.msrb.gmra.mxu3 %vm400_vm2, %v7211_v51  ;;  %4371 = vmatpush.msk.msra.mxu0 %vm403_vm0, %v7203_v16  ;;  %7234 = vst [vmem:[#allocation43_spill] sm:$0xff] %v5703_v42  ;;  %v7237_v42 = vrot.slane %v7211_v51, 7 }
  0xae   : > { %4373 = vmatpush.msk.msra.mxu1 %vm403_vm0, %v7204_v50  ;;  %4375 = vmatpush.msk.msra.mxu2 %vm403_vm0, %v7205_v20 }
  0xaf   : > { %4377 = vmatpush.msk.msra.mxu3 %vm403_vm0, %v7206_v55  ;;  %1733 = vmatpush.msra.mxu0 %v7207_v60  ;;  %v5721_v40 = vsel %vm396_vm1, %v7237_v42, %v1716_v56  ;;  %v5731_v38 = vpop.f32.mrf.mxu0 }
  0xb0   : > { %1753 = vmatpush.msra.mxu1 %v7236_v47  ;;  %1775 = vmatpush.msra.mxu2 %v7209_v57 }
  0xb1   : > { %1795 = vmatpush.msra.mxu3 %v7210_v17  ;;  %1734 = vmatpush.msra.mxu0 %v5381_v19 }
  0xb2   : > { %1754 = vmatpush.msra.mxu1 %v5386_v58  ;;  %1776 = vmatpush.msra.mxu2 %v5393_v46 }
  0xb3   : > { %1796 = vmatpush.msra.mxu3 %v5398_v49  ;;  %1735 = vmatpush.msra.mxu0 %v5405_v18  ;;  %v5733_v49 = vpop.f32.mrf.mxu1 }
  0xb4   : > { %1755 = vmatpush.msra.mxu1 %v5410_v63  ;;  %1777 = vmatpush.msra.mxu2 %v5420_v39 }
  0xb5   : > { %1797 = vmatpush.msra.mxu3 %v5425_v62  ;;  %4372 = vmatmul.msk.f32.vlgmr.msra.gmra.mxu0 %vm400_vm2, %v5721_v40 }
  0xb6   : > { %4374 = vmatmul.msk.f32.vlgmr.msra.gmra.mxu1 %vm400_vm2, %v5721_v40  ;;  %4376 = vmatmul.msk.f32.vlgmr.msra.gmra.mxu2 %vm400_vm2, %v5721_v40  ;;  %v5743_v42 = vpop.f32.mrf.mxu2 }
  0xb7   : > { %4378 = vmatmul.msk.f32.vlgmr.msra.gmra.mxu3 %vm400_vm2, %v5721_v40  ;;  %4379 = vmatpush.msk.msrb.mxu0 %vm403_vm0, %v4866_v0  ;;  %v5745_v56 = vpop.f32.mrf.mxu3 }
  0xb8   : > { %4381 = vmatpush.msk.msrb.mxu1 %vm403_vm0, %v4871_v1  ;;  %4383 = vmatpush.msk.msrb.mxu2 %vm403_vm0, %v4876_v2 }
  0xb9   : > { %4385 = vmatpush.msk.msrb.mxu3 %vm403_vm0, %v4885_v3  ;;  %1817 = vmatpush.msrb.mxu0 %v4890_v4  ;;  %v5767_v0 = vpop.f32.mrf.mxu0 }
  0xba   : > { %1837 = vmatpush.msrb.mxu1 %v4895_v5  ;;  %1857 = vmatpush.msrb.mxu2 %v4904_v6  ;;  %v7238_v6 = vld [vmem:[#allocation12_spill] sm:$0xff] }
  0xbb   : > { %1877 = vmatpush.msrb.mxu3 %v4909_v7  ;;  %1818 = vmatpush.msrb.mxu0 %v4914_v8  ;;  %v5769_v1 = vpop.f32.mrf.mxu1  ;;  %v7239_v7 = vld [vmem:[#allocation13_spill] sm:$0xff] }
  0xbc   : > { %1838 = vmatpush.msrb.mxu1 %v4926_v9  ;;  %1858 = vmatpush.msrb.mxu2 %v4931_v10  ;;  %v7240_v10 = vld [vmem:[#allocation15_spill] sm:$0xff] }
  0xbd   : > { %1878 = vmatpush.msrb.mxu3 %v4936_v11  ;;  %1819 = vmatpush.msrb.mxu0 %v4943_v12  ;;  %v7241_v11 = vld [vmem:[#allocation16_spill] sm:$0xff]  ;;  %v7242_v12 = vld [vmem:[#allocation17_spill] sm:$0xff] }
  0xbe   : > { %1839 = vmatpush.msrb.mxu1 %v4948_v13  ;;  %1859 = vmatpush.msrb.mxu2 %v4953_v14  ;;  %v7243_v13 = vld [vmem:[#allocation18_spill] sm:$0xff]  ;;  %v7244_v14 = vld [vmem:[#allocation19_spill] sm:$0xff] }
  0xbf   : > { %1879 = vmatpush.msrb.mxu3 %v4960_v15  ;;  %4380 = vmatmul.msk.f32.vlgmr.msrb.gmra.mxu0 %vm400_vm2, %v5413_v59  ;;  %v7245_v15 = vld [vmem:[#allocation20_spill] sm:$0xff] }
  0xc0   : > { %4382 = vmatmul.msk.f32.vlgmr.msrb.gmra.mxu1 %vm400_vm2, %v5413_v59  ;;  %4384 = vmatmul.msk.f32.vlgmr.msrb.gmra.mxu2 %vm400_vm2, %v5314_v61  ;;  %v5779_v2 = vpop.f32.mrf.mxu2 }
  0xc1   : > { %4386 = vmatmul.msk.f32.vlgmr.msrb.gmra.mxu3 %vm400_vm2, %v5314_v61  ;;  %4387 = vmatpush.msk.msra.mxu0 %vm403_vm0, %v4984_v21  ;;  %v5781_v3 = vpop.f32.mrf.mxu3  ;;  %v7246_v21 = vld [vmem:[#allocation21_spill] sm:$0xff] }
  0xc2   : > { %4389 = vmatpush.msk.msra.mxu1 %vm403_vm0, %v4989_v22  ;;  %4391 = vmatpush.msk.msra.mxu2 %vm403_vm0, %v4998_v23  ;;  %v7247_v22 = vld [vmem:[#allocation22_spill] sm:$0xff]  ;;  %v7248_v23 = vld [vmem:[#allocation23_spill] sm:$0xff] }
  0xc3   : > { %4393 = vmatpush.msk.msra.mxu3 %vm403_vm0, %v5003_v24  ;;  %1897 = vmatpush.msra.mxu0 %v5012_v25  ;;  %v5803_v4 = vpop.f32.mrf.mxu0  ;;  %v7249_v24 = vld [vmem:[#allocation24_spill] sm:$0xff]  ;;  %v7250_v25 = vld [vmem:[#allocation25_spill] sm:$0xff] }
  0xc4   : > { %1917 = vmatpush.msra.mxu1 %v5017_v26  ;;  %1937 = vmatpush.msra.mxu2 %v5026_v27  ;;  %v5805_v5 = vpop.f32.mrf.mxu1 }
  0xc5   : > { %1957 = vmatpush.msra.mxu3 %v5031_v28  ;;  %1898 = vmatpush.msra.mxu0 %v5040_v29  ;;  %v7251_v28 = vld [vmem:[#allocation26_spill] sm:$0xff]  ;;  %v7252_v29 = vld [vmem:[#allocation27_spill] sm:$0xff] }
  0xc6   : > { %1918 = vmatpush.msra.mxu1 %v5045_v30  ;;  %1938 = vmatpush.msra.mxu2 %v5052_v31 }
  0xc7   : > { %1958 = vmatpush.msra.mxu3 %v5057_v32  ;;  %1899 = vmatpush.msra.mxu0 %v5064_v33  ;;  %v7253_v32 = vld [vmem:[#allocation29_spill] sm:$0xff]  ;;  %v7254_v33 = vld [vmem:[#allocation30_spill] sm:$0xff] }
  0xc8   : > { %1919 = vmatpush.msra.mxu1 %v5069_v34  ;;  %1939 = vmatpush.msra.mxu2 %v5076_v35  ;;  %v7255_v34 = vld [vmem:[#allocation31_spill] sm:$0xff] }
  0xc9   : > { %1959 = vmatpush.msra.mxu3 %v5081_v36  ;;  %4388 = vmatmul.msk.f32.vlgmr.msra.gmra.mxu0 %vm400_vm2, %v5413_v59  ;;  %v7256_v35 = vld [vmem:[#allocation35_spill] sm:$0xff]  ;;  %v7257_v36 = vld [vmem:[#allocation36_spill] sm:$0xff] }
  0xca   : > { %4390 = vmatmul.msk.f32.vlgmr.msra.gmra.mxu1 %vm400_vm2, %v5413_v59  ;;  %4392 = vmatmul.msk.f32.vlgmr.msra.gmra.mxu2 %vm400_vm2, %v5314_v61  ;;  %v5815_v8 = vpop.f32.mrf.mxu2  ;;  %v2244_v59 = vld [vmem:[#allocation2 + $0x70] sm:$0xff] }
  0xcb   : > { %4394 = vmatmul.msk.f32.vlgmr.msra.gmra.mxu3 %vm400_vm2, %v5314_v61  ;;  %4395 = vmatpush.msk.msrb.mxu0 %vm403_vm0, %v7238_v6  ;;  %v5817_v9 = vpop.f32.mrf.mxu3 }
  0xcc   : > { %4397 = vmatpush.msk.msrb.mxu1 %vm403_vm0, %v7239_v7  ;;  %4399 = vmatpush.msk.msrb.mxu2 %vm403_vm0, %v7240_v10  ;;  %v2239_v7 = vld [vmem:[#allocation2 + $0x48] sm:$0xff]  ;;  %v5928_v10 = vld [vmem:[#allocation2 + $0x98] sm:$0xff] }
  0xcd   : > { %4401 = vmatpush.msk.msrb.mxu3 %vm403_vm0, %v7241_v11  ;;  %1977 = vmatpush.msrb.mxu0 %v7242_v12  ;;  %v5839_v26 = vpop.f32.mrf.mxu0 }
  0xce   : > { %1997 = vmatpush.msrb.mxu1 %v5128_v43  ;;  %2019 = vmatpush.msrb.mxu2 %v5137_v44  ;;  %v5841_v27 = vpop.f32.mrf.mxu1  ;;  %v7258_v43 = vld [vmem:[#allocation40_spill] sm:$0xff]  ;;  %v7259_v44 = vld [vmem:[#allocation41_spill] sm:$0xff] }
  0xcf   : > { %2039 = vmatpush.msrb.mxu3 %v5142_v45  ;;  %1978 = vmatpush.msrb.mxu0 %v7243_v13  ;;  %v7260_v45 = vld [vmem:[#allocation42_spill] sm:$0xff] }
  0xd0   : > { %1998 = vmatpush.msrb.mxu1 %v7244_v14  ;;  %2020 = vmatpush.msrb.mxu2 %v7245_v15  ;;  %v2238_v13 = vld [vmem:[#allocation2 + $0x40] sm:$0xff]  ;;  %v5931_v14 = vld [vmem:[#allocation2 + $0x90] sm:$0xff]  ;;  %v2237_v15 = vld [vmem:[#allocation2 + $0x38] sm:$0xff] }
  0xd1   : > { %2040 = vmatpush.msrb.mxu3 %v7246_v21  ;;  %1979 = vmatpush.msrb.mxu0 %v7247_v22  ;;  %v5934_v21 = vld [vmem:[#allocation2 + $0x88] sm:$0xff]  ;;  %v2236_v22 = vld [vmem:[#allocation2 + $0x30] sm:$0xff] }
  0xd2   : > { %1999 = vmatpush.msrb.mxu1 %v7248_v23  ;;  %2021 = vmatpush.msrb.mxu2 %v7249_v24  ;;  %v5937_v23 = vld [vmem:[#allocation2 + $0x80] sm:$0xff]  ;;  %v2235_v24 = vld [vmem:[#allocation2 + $0x28] sm:$0xff] }
  0xd3   : > { %2041 = vmatpush.msrb.mxu3 %v7250_v25  ;;  %4396 = vmatmul.msk.f32.vlgmr.msrb.gmra.mxu0 %vm400_vm2, %v7211_v51  ;;  %v577_v25 = vadd.f32 %v5743_v42, %v5731_v38  ;;  %v597_v38 = vadd.f32 %v5745_v56, %v5733_v49  ;;  %v2231_v49 = vld [vmem:[#allocation2 + $0x8] sm:$0xff] }
  0xd4   : > { %4398 = vmatmul.msk.f32.vlgmr.msrb.gmra.mxu1 %vm400_vm2, %v7211_v51  ;;  %4400 = vmatmul.msk.f32.vlgmr.msrb.gmra.mxu2 %vm400_vm2, %v7211_v51 }
  0xd5   : > { %4402 = vmatmul.msk.f32.vlgmr.msrb.gmra.mxu3 %vm400_vm2, %v7211_v51  ;;  %4403 = vmatpush.msk.msra.mxu0 %vm403_vm0, %v7251_v28  ;;  %v5853_v31 = vpop.f32.mrf.mxu3  ;;  %v718_v42 = vadd.f32 %v5779_v2, %v577_v25  ;;  %v2276_v25 = vld [vmem:[#allocation2 + $0x468] sm:$0xff] }
  0xd6   : > { %4405 = vmatpush.msk.msra.mxu1 %vm403_vm0, %v7252_v29  ;;  %v5851_v30 = vpop.f32.mrf.mxu2  ;;  %4407 = vmatpush.msk.msra.mxu2 %vm403_vm0, %v7253_v32  ;;  %v2234_v32 = vld [vmem:[#allocation2 + $0x20] sm:$0xff] }
  0xd7   : > { %4409 = vmatpush.msk.msra.mxu3 %vm403_vm0, %v7254_v33  ;;  %2061 = vmatpush.msra.mxu0 %v7255_v34  ;;  %v7265_v33 = vld [vmem:[#allocation32_spill] sm:$0xff]  ;;  %v7266_v34 = vld [vmem:[#allocation34_spill] sm:$0xff]  ;;  %v839_v2 = vadd.f32 %v5815_v8, %v718_v42 }
  0xd8   : > { %2081 = vmatpush.msra.mxu1 %v7193_v54  ;;  %2103 = vmatpush.msra.mxu2 %v7194_v53  ;;  %v5875_v51 = vpop.f32.mrf.mxu0  ;;  %v2273_v42 = vld [vmem:[#allocation2 + $0x450] sm:$0xff] }
  0xd9   : > { %2123 = vmatpush.msra.mxu3 %v7195_v52  ;;  %2062 = vmatpush.msra.mxu0 %v7256_v35  ;;  %v5877_v52 = vpop.f32.mrf.mxu1  ;;  %v476_v35 = vadd.f32 %v7266_v34, %v7265_v33  ;;  %v2294_v33 = vld [vmem:[#allocation2 + $0x130] sm:$0xff]  ;;  %v2275_v34 = vld [vmem:[#allocation2 + $0x460] sm:$0xff] }
  0xda   : > { %2082 = vmatpush.msra.mxu1 %v7257_v36  ;;  %2104 = vmatpush.msra.mxu2 %v7225_v48  ;;  %v7261_v48 = vld [vmem:[#allocation28_spill] sm:$0xff] }
  0xdb   : > { %2124 = vmatpush.msra.mxu3 %v7226_v37  ;;  %2063 = vmatpush.msra.mxu0 %v7227_v41  ;;  %v2132_v53 = vrot.slane %v7261_v48, 6  ;;  %v2233_v48 = vld [vmem:[#allocation2 + $0x18] sm:$0xff] }
  0xdc   : > { %2083 = vmatpush.msra.mxu1 %v7258_v43  ;;  %2105 = vmatpush.msra.mxu2 %v7259_v44 }
  0xdd   : > { %2125 = vmatpush.msra.mxu3 %v7260_v45  ;;  %4404 = vmatmul.msk.f32.vlgmr.msra.gmra.mxu0 %vm400_vm2, %v5721_v40 }
  0xde   : > { %4406 = vmatmul.msk.f32.vlgmr.msra.gmra.mxu1 %vm400_vm2, %v5721_v40  ;;  %4408 = vmatmul.msk.f32.vlgmr.msra.gmra.mxu2 %vm400_vm2, %v5721_v40 }
  0xdf   : > { %4410 = vmatmul.msk.f32.vlgmr.msra.gmra.mxu3 %vm400_vm2, %v5721_v40  ;;  %4411 = vmatpush.msk.msrb.mxu0 %vm403_vm0, %v7203_v16  ;;  %v5887_v37 = vpop.f32.mrf.mxu2  ;;  %v7262_v40 = vld [vmem:[#allocation51_spill] sm:$0xff] }
  0xe0   : > { %4413 = vmatpush.msk.msrb.mxu1 %vm403_vm0, %v7204_v50  ;;  %v5889_v41 = vpop.f32.mrf.mxu3  ;;  %4415 = vmatpush.msk.msrb.mxu2 %vm403_vm0, %v7205_v20  ;;  %v7263_v50 = vld [vmem:[#allocation14_spill] sm:$0xff]  ;;  %v1016_v44 = vadd.f32 %v5887_v37, %v5875_v51 }
  0xe1   : > { %4417 = vmatpush.msk.msrb.mxu3 %vm403_vm0, %v7206_v55  ;;  %2149 = vmatpush.msrb.mxu0 %v7207_v60  ;;  %v7264_v54 = vrot.slane %v7263_v50, 6  ;;  %v5919_v60 = vld [vmem:[#allocation2 + $0xb0] sm:$0xff]  ;;  %v5925_v16 = vld [vmem:[#allocation2 + $0xa0] sm:$0xff]  ;;  %v1036_v51 = vadd.f32 %v5889_v41, %v5877_v52  ;;  %v956_v52 = vadd.f32 %v5851_v30, %v839_v2  ;;  %v2582_v2 = vld [vmem:[#allocation2 + $0x5a8] sm:$0xff] }
  0xe2   : > { %2169 = vmatpush.msrb.mxu1 %v7236_v47  ;;  %2191 = vmatpush.msrb.mxu2 %v7209_v57  ;;  %v1055_v47 = vpop.f32.mrf.mxu0  ;;  %v7268_v50 = vld [vmem:[#allocation43_spill] sm:$0xff] }
  0xe3   : > { %2211 = vmatpush.msrb.mxu3 %v7210_v17  ;;  %2150 = vmatpush.msrb.mxu0 %v5381_v19  ;;  %v2133_v55 = vsel %vm609_vm3, %v7264_v54, %v2132_v53  ;;  %v2245_v17 = vld [vmem:[#allocation2 + $0x78] sm:$0xff]  ;;  %v5913_v57 = vpop.f32.mrf.mxu1  ;;  %v2240_v19 = vld [vmem:[#allocation2 + $0x50] sm:$0xff] }
  0xe4   : > { %2170 = vmatpush.msrb.mxu1 %v5386_v58  ;;  %2192 = vmatpush.msrb.mxu2 %v5393_v46  ;;  %v5915_v58 = vld [vmem:[#allocation2 + $0xb8] sm:$0xff]  ;;  %v5923_v46 = vld [vmem:[#allocation2 + $0xa8] sm:$0xff]  ;;  %v2232_v53 = vld [vmem:[#allocation2 + $0x10] sm:$0xff] }
  0xe5   : > { %2212 = vmatpush.msrb.mxu3 %v7262_v40  ;;  %2151 = vmatpush.msrb.mxu0 %v5405_v18  ;;  %v2241_v18 = vld [vmem:[#allocation2 + $0x58] sm:$0xff] }
  0xe6   : > { %2171 = vmatpush.msrb.mxu1 %v5410_v63  ;;  %2193 = vmatpush.msrb.mxu2 %v5420_v39  ;;  %v2242_v63 = vld [vmem:[#allocation2 + $0x60] sm:$0xff]  ;;  %v7267_v40 = vld [vmem:[#allocation33_spill] sm:$0xff] }
  0xe7   : > { %2213 = vmatpush.msrb.mxu3 %v5425_v62  ;;  %4412 = vmatmul.msk.f32.vlgmr.msrb.gmra.mxu0 %vm400_vm2, %v2133_v55  ;;  %v2243_v62 = vld [vmem:[#allocation2 + $0x68] sm:$0xff]  ;;  %v496_v54 = vadd.f32 %v7268_v50, %v7267_v40 }
  0xe8   : > { %4414 = vmatmul.msk.f32.vlgmr.msrb.gmra.mxu1 %vm400_vm2, %v2133_v55  ;;  %4416 = vmatmul.msk.f32.vlgmr.msrb.gmra.mxu2 %vm400_vm2, %v2133_v55  ;;  %v2293_v50 = vld [vmem:[#allocation2 + $0x128] sm:$0xff] }
  0xe9   : > { %4418 = vmatmul.msk.f32.vlgmr.msrb.gmra.mxu3 %vm400_vm2, %v2133_v55  ;;  %2351 = vmatpush.msra.mxu2 %v2245_v17  ;;  %v1095_v39 = vpop.f32.mrf.mxu2  ;;  %v661_v55 = vadd.f32 %v5767_v0, %v476_v35  ;;  %v719_v17 = vadd.f32 %v5781_v3, %v597_v38  ;;  %v662_v56 = vadd.f32 %v5769_v1, %v496_v54  ;;  %v2278_v1 = vld [vmem:[#allocation2 + $0x478] sm:$0xff] }
  0xea   : > { %v1115_v61 = vpop.f32.mrf.mxu3  ;;  %2379 = vmatpush.msra.mxu3 %v5915_v58  ;;  %v1096_v45 = vadd.f32 %v1095_v39, %v1055_v47 }
  0xeb   : > { %2352 = vmatpush.msra.mxu2 %v2244_v59  ;;  %v1116_v37 = vadd.f32 %v1115_v61, %v5913_v57  ;;  %v840_v39 = vadd.f32 %v5817_v9, %v719_v17  ;;  %v782_v3 = vadd.f32 %v5803_v4, %v661_v55  ;;  %v2277_v4 = vld [vmem:[#allocation2 + $0x470] sm:$0xff]  ;;  %v2272_v17 = vld [vmem:[#allocation2 + $0x448] sm:$0xff] }
  0xec   : > { %2380 = vmatpush.msra.mxu3 %v5919_v60  ;;  %v1135_v20 = vpop.f32.mrf.mxu0 }
  0xed   : > { %2353 = vmatpush.msra.mxu2 %v2243_v62  ;;  %v1155_v6 = vpop.f32.mrf.mxu1  ;;  %v1158_v47 = vadd.f32 %v1135_v20, %v1016_v44  ;;  %v957_v41 = vadd.f32 %v5853_v31, %v840_v39 }
  0xee   : > { %2381 = vmatpush.msra.mxu3 %v5923_v46  ;;  %v1159_v62 = vadd.f32 %v1155_v6, %v1036_v51  ;;  %v899_v6 = vadd.f32 %v5839_v26, %v782_v3  ;;  %v2295_v26 = vld [vmem:[#allocation2 + $0x138] sm:$0xff]  ;;  %v2271_v51 = vld [vmem:[#allocation2 + $0x440] sm:$0xff] }
  0xef   : > { %2354 = vmatpush.msra.mxu2 %v2242_v63  ;;  %v2230_v63 = vld [vmem:[#allocation2] sm:$0xff]  ;;  %2308 = vmatpush.msra.mxu0 %v2295_v26 }
  0xf0   : > { %2382 = vmatpush.msra.mxu3 %v5925_v16  ;;  %v6010_v26 = vld [vmem:[#allocation2 + $0x160] sm:$0xff] }
  0xf1   : > { %2355 = vmatpush.msra.mxu2 %v2241_v18  ;;  %v783_v18 = vadd.f32 %v5805_v5, %v662_v56  ;;  %v5969_v5 = vld [vmem:[%s6985_s2] sm:$0x3]  ;;  %2309 = vmatpush.msra.mxu0 %v2294_v33  ;;  %v2583_v56 = vld [vmem:[#allocation2 + $0x5b0] sm:$0xff]  ;;  %7269 = vst [vmem:[#allocation44_spill] sm:$0xff] %v6010_v26  ;;  %v6012_v33 = vld [vmem:[#allocation2 + $0x158] sm:$0xff] }
  0xf2   : > { %2383 = vmatpush.msra.mxu3 %v5928_v10  ;;  %7270 = vst [vmem:[#allocation45_spill] sm:$0xff] %v6012_v33 }
  0xf3   : > { %2356 = vmatpush.msra.mxu2 %v2240_v19  ;;  %v1177_v11 = vpop.f32.mrf.mxu2  ;;  %2310 = vmatpush.msra.mxu0 %v2293_v50 }
  0xf4   : > { %v1197_v12 = vpop.f32.mrf.mxu3  ;;  %2384 = vmatpush.msra.mxu3 %v5931_v14  ;;  %v1200_v59 = vadd.f32 %v1177_v11, %v1096_v45 }
  0xf5   : > { %2357 = vmatpush.msra.mxu2 %v2239_v7  ;;  %v1201_v0 = vadd.f32 %v1197_v12, %v1116_v37  ;;  %v900_v7 = vadd.f32 %v5841_v27, %v783_v18  ;;  %v2292_v37 = vld [vmem:[#allocation2 + $0x120] sm:$0xff]  ;;  %v2580_v18 = vld [vmem:[#allocation2 + $0x598] sm:$0xff] }
  0xf6   : > { %2385 = vmatpush.msra.mxu3 %v5934_v21  ;;  %v1219_v28 = vpop.f32.mrf.mxu0  ;;  %2311 = vmatpush.msra.mxu0 %v2292_v37  ;;  %v2281_v37 = vld [vmem:[#allocation2 + $0xc8] sm:$0xff] }
  0xf7   : > { %2358 = vmatpush.msra.mxu2 %v2238_v13  ;;  %v1239_v29 = vpop.f32.mrf.mxu1  ;;  %v1242_v19 = vadd.f32 %v1219_v28, %v1158_v47  ;;  %v7069_v28 = vperm.slane %v5969_v5, 0  ;;  %v2291_v47 = vld [vmem:[#allocation2 + $0x118] sm:$0xff] }
  0xf8   : > { %2386 = vmatpush.msra.mxu3 %v5937_v23  ;;  %v1243_v8 = vadd.f32 %v1239_v29, %v1159_v62  ;;  %2312 = vmatpush.msra.mxu0 %v2291_v47  ;;  %v6023_v47 = vld [vmem:[#allocation2 + $0x148] sm:$0xff] }
  0xf9   : > { %2359 = vmatpush.msra.mxu2 %v2237_v15  ;;  %7272 = vst [vmem:[#allocation47_spill] sm:$0xff] %v6023_v47 }
  0xfb   : > { %2360 = vmatpush.msra.mxu2 %v2236_v22  ;;  %v1372_v22 = vmax.f32 %v899_v6, %v956_v52  ;;  %v2289_v52 = vld [vmem:[#allocation2 + $0x108] sm:$0xff]  ;;  %v2286_v6 = vld [vmem:[#allocation2 + $0xf0] sm:$0xff] }
  0xfd   : > { %2361 = vmatpush.msra.mxu2 %v2235_v24  ;;  %v1261_v36 = vpop.f32.mrf.mxu2  ;;  %v1373_v24 = vmax.f32 %v900_v7, %v957_v41  ;;  %v2288_v41 = vld [vmem:[#allocation2 + $0x100] sm:$0xff] }
  0xfe   : > { %v1281_v43 = vpop.f32.mrf.mxu3  ;;  %v1284_v20 = vadd.f32 %v1261_v36, %v1200_v59  ;;  %v2584_v59 = vld [vmem:[#allocation2 + $0x5b8] sm:$0xff]  ;;  %v2577_v7 = vld [vmem:[#allocation2 + $0x580] sm:$0xff] }
  0xff   : > { %2362 = vmatpush.msra.mxu2 %v2234_v32  ;;  %v1285_v9 = vadd.f32 %v1281_v43, %v1201_v0  ;;  %v7068_v32 = vperm.slane %v5969_v5, 1  ;;  %v2274_v43 = vld [vmem:[#allocation2 + $0x458] sm:$0xff]  ;;  %v2581_v0 = vld [vmem:[#allocation2 + $0x5a0] sm:$0xff] }
 0x100   : > { %v1305_v57 = vpop.f32.mrf.mxu0 }
 0x101   : > { %2363 = vmatpush.msra.mxu2 %v2233_v48  ;;  %v1325_v61 = vpop.f32.mrf.mxu1  ;;  %v1328_v31 = vadd.f32 %v1305_v57, %v1242_v19  ;;  %v2579_v57 = vld [vmem:[#allocation2 + $0x590] sm:$0xff]  ;;  %v2287_v19 = vld [vmem:[#allocation2 + $0xf8] sm:$0xff] }
 0x102   : > { %v1329_v12 = vadd.f32 %v1325_v61, %v1243_v8  ;;  %v2303_v61 = vld [vmem:[#allocation2 + $0x178] sm:$0xff]  ;;  %v2302_v8 = vld [vmem:[#allocation2 + $0x170] sm:$0xff] }
 0x103   : > { %2364 = vmatpush.msra.mxu2 %v2232_v53  ;;  %2336 = vmatpush.msra.mxu1 %v2303_v61  ;;  %v6035_v61 = vld [vmem:[#allocation2 + $0x438] sm:$0xff] }
 0x105   : > { %2365 = vmatpush.msra.mxu2 %v2231_v49  ;;  %v2290_v49 = vld [vmem:[#allocation2 + $0x110] sm:$0xff]  ;;  %2337 = vmatpush.msra.mxu1 %v2302_v8 }
 0x106   : > { %2313 = vmatpush.msra.mxu0 %v2290_v49 }
 0x107   : > { %2366 = vmatpush.msra.mxu2 %v2230_v63  ;;  %v1347_v11 = vpop.f32.mrf.mxu2 }
 0x108   : > { %v1367_v30 = vpop.f32.mrf.mxu3  ;;  %v1370_v13 = vadd.f32 %v1347_v11, %v1284_v20  ;;  %2314 = vmatpush.msra.mxu0 %v2289_v52  ;;  %v2414_v20 = vld [vmem:[#allocation2 + $0x530] sm:$0xff]  ;;  %v2408_v52 = vld [vmem:[#allocation2 + $0x500] sm:$0xff] }
 0x109   : > { %2484 = vmatpush.msrb.mxu2 %v2278_v1  ;;  %v1371_v15 = vadd.f32 %v1367_v30, %v1285_v9  ;;  %v2415_v1 = vld [vmem:[#allocation2 + $0x538] sm:$0xff]  ;;  %v2578_v9 = vld [vmem:[#allocation2 + $0x588] sm:$0xff] }
 0x10a   : > { %v1374_v27 = vmax.f32 %v1328_v31, %v1370_v13  ;;  %v5977_v48 = vpop.f32.mrf.mxu0  ;;  %2444 = vmatpush.msrb.mxu3 %v2415_v1  ;;  %2315 = vmatpush.msra.mxu0 %v2288_v41  ;;  %v2576_v30 = vld [vmem:[#allocation2 + $0x578] sm:$0xff]  ;;  %v2285_v31 = vld [vmem:[#allocation2 + $0xe8] sm:$0xff]  ;;  %v2569_v41 = vld [vmem:[#allocation2 + $0x540] sm:$0xff] }
 0x10b   : > { %2485 = vmatpush.msrb.mxu2 %v2277_v4  ;;  %v1375_v29 = vmax.f32 %v1329_v12, %v1371_v15  ;;  %v5979_v38 = vpop.f32.mrf.mxu1  ;;  %v2301_v12 = vld [vmem:[#allocation2 + $0x168] sm:$0xff]  ;;  %v2512_v1 = vld [vmem:[#allocation2 + $0x1f8] sm:$0xff] }
 0x10c   : > { %v1376_v35 = vmax.f32 %v1372_v22, %v1374_v27  ;;  %2445 = vmatpush.msrb.mxu3 %v2414_v20  ;;  %2316 = vmatpush.msra.mxu0 %v2287_v19  ;;  %v2413_v13 = vld [vmem:[#allocation2 + $0x528] sm:$0xff]  ;;  %v2412_v27 = vld [vmem:[#allocation2 + $0x520] sm:$0xff]  ;;  %v6037_v19 = vld [vmem:[#allocation2 + $0x4f0] sm:$0xff] }
 0x10d   : > { %v1377_v36 = vmax.f32 %v1373_v24, %v1375_v29  ;;  %2486 = vmatpush.msrb.mxu2 %v2276_v25  ;;  %v2575_v24 = vld [vmem:[#allocation2 + $0x570] sm:$0xff]  ;;  %2338 = vmatpush.msra.mxu1 %v2301_v12  ;;  %v2284_v25 = vld [vmem:[#allocation2 + $0xe0] sm:$0xff]  ;;  %v2283_v29 = vld [vmem:[#allocation2 + $0xd8] sm:$0xff]  ;;  %7275 = vst [vmem:[#allocation11_spill] sm:$0xff] %v6037_v19 }
 0x10e   : > { %v1384_v44 = vadd.f32 %v7069_v28, %v1376_v35  ;;  %2317 = vmatpush.msra.mxu0 %v2286_v6  ;;  %2446 = vmatpush.msrb.mxu3 %v2413_v13  ;;  %v2411_v35 = vld [vmem:[#allocation2 + $0x518] sm:$0xff]  ;;  %v2511_v6 = vld [vmem:[#allocation2 + $0x1f0] sm:$0xff]  ;;  %v2728_v12 = vld [vmem:[#allocation2 + $0x6a8] sm:$0xff] }
 0x10f   : > { %v1385_v45 = vadd.f32 %v7068_v32, %v1377_v36  ;;  %2487 = vmatpush.msrb.mxu2 %v2275_v34  ;;  %v2574_v34 = vld [vmem:[#allocation2 + $0x568] sm:$0xff]  ;;  %2339 = vmatpush.msra.mxu1 %v6010_v26  ;;  %v2282_v36 = vld [vmem:[#allocation2 + $0xd0] sm:$0xff]  ;;  %v2730_v20 = vld [vmem:[#allocation2 + $0x6b8] sm:$0xff] }
 0x110   : > { %v5983_v40 = vmax.f32 %v1384_v44, 0.0  ;;  %2318 = vmatpush.msra.mxu0 %v2285_v31  ;;  %2447 = vmatpush.msrb.mxu3 %v2412_v27  ;;  %v2410_v44 = vld [vmem:[#allocation2 + $0x510] sm:$0xff]  ;;  %v6053_v13 = vld [vmem:[#allocation2 + $0x4e8] sm:$0xff]  ;;  %v6100_v28 = vld [vmem:[#allocation2 + $0x4b8] sm:$0xff] }
 0x111   : > { %v5981_v53 = vmax.f32 %v1385_v45, 0.0  ;;  %2488 = vmatpush.msrb.mxu2 %v2274_v43  ;;  %v5985_v54 = vpop.f32.mrf.mxu2  ;;  %v6015_v43 = vld [vmem:[#allocation2 + $0x150] sm:$0xff]  ;;  %v2573_v45 = vld [vmem:[#allocation2 + $0x560] sm:$0xff]  ;;  %2340 = vmatpush.msra.mxu1 %v6012_v33  ;;  %7276 = vst [vmem:[#allocation37_spill] sm:$0xff] %v6053_v13  ;;  %v2851_v33 = vld [vmem:[#allocation2 + $0x6f8] sm:$0xff] }
 0x112   : > { %v5987_v55 = vpop.f32.mrf.mxu3  ;;  %2367 = vmatmul.f32.vlgmr.msra.gmra.mxu2 %v5983_v40  ;;  %2319 = vmatpush.msra.mxu0 %v2284_v25  ;;  %7271 = vst [vmem:[#allocation46_spill] sm:$0xff] %v6015_v43  ;;  %v6040_v8 = vrot.slane %v5983_v40, 1  ;;  %v2510_v25 = vld [vmem:[#allocation2 + $0x1e8] sm:$0xff]  ;;  %v2858_v32 = vld [vmem:[#allocation2 + $0x730] sm:$0xff] }
 0x113   : > { %2489 = vmatpush.msrb.mxu2 %v2273_v42  ;;  %4420 = vmatmul.msk.f32.vlgmr.msra.gmra.mxu3 %vm2304_vm5, %v5981_v53  ;;  %v2572_v42 = vld [vmem:[#allocation2 + $0x558] sm:$0xff]  ;;  %7282 = vst [vmem:[#allocation15_spill] sm:$0xff] %v6100_v28 }
 0x114   : > { %v5992_v39 = vpop.f32.mrf.mxu0  ;;  %2320 = vmatpush.msra.mxu0 %v2283_v29  ;;  %2448 = vmatpush.msrb.mxu3 %v2411_v35  ;;  %v6063_v35 = vld [vmem:[#allocation2 + $0x4e0] sm:$0xff] }
 0x115   : > { %2490 = vmatpush.msrb.mxu2 %v2272_v17  ;;  %v5994_v62 = vpop.f32.mrf.mxu1  ;;  %2341 = vmatpush.msra.mxu1 %v6015_v43  ;;  %7277 = vst [vmem:[#allocation38_spill] sm:$0xff] %v6063_v35  ;;  %v2852_v43 = vld [vmem:[#allocation2 + $0x700] sm:$0xff] }
 0x116   : > { %2321 = vmatpush.msra.mxu0 %v2282_v36  ;;  %2449 = vmatpush.msrb.mxu3 %v2410_v44  ;;  %v6065_v36 = vld [vmem:[#allocation2 + $0x420] sm:$0xff] }
 0x117   : > { %2491 = vmatpush.msrb.mxu2 %v2271_v51  ;;  %v2571_v51 = vld [vmem:[#allocation2 + $0x550] sm:$0xff]  ;;  %2342 = vmatpush.msra.mxu1 %v6023_v47  ;;  %v2509_v44 = vld [vmem:[#allocation2 + $0x1e0] sm:$0xff]  ;;  %v2853_v47 = vld [vmem:[#allocation2 + $0x708] sm:$0xff] }
 0x118   : > { %2322 = vmatpush.msra.mxu0 %v2281_v37  ;;  %v2508_v37 = vld [vmem:[#allocation2 + $0x1d8] sm:$0xff] }
 0x119   : > { %2593 = vmatpush.msra.mxu2 %v2584_v59  ;;  %v2409_v59 = vld [vmem:[#allocation2 + $0x508] sm:$0xff] }
 0x11a   : > { %4422 = vmatmul.msk.f32.vlgmr.msrb.gmra.mxu2 %vm2304_vm5, %v5981_v53  ;;  %2450 = vmatpush.msrb.mxu3 %v2409_v59  ;;  %v6073_v59 = vld [vmem:[#allocation2 + $0x4d0] sm:$0xff] }
 0x11b   : > { %2594 = vmatpush.msra.mxu2 %v2583_v56  ;;  %v5996_v63 = vpop.f32.mrf.mxu2  ;;  %7279 = vst [vmem:[#allocation48_spill] sm:$0xff] %v6073_v59 }
 0x11c   : > { %v5998_v3 = vpop.f32.mrf.mxu3  ;;  %2451 = vmatpush.msrb.mxu3 %v2408_v52  ;;  %v2507_v52 = vld [vmem:[#allocation2 + $0x1d0] sm:$0xff] }
 0x11d   : > { %2595 = vmatpush.msra.mxu2 %v2582_v2  ;;  %v2570_v2 = vld [vmem:[#allocation2 + $0x548] sm:$0xff] }
 0x11e   : > { %v6002_v4 = vpop.f32.mrf.mxu0  ;;  %2527 = vmatpush.msra.mxu3 %v2512_v1 }
 0x11f   : > { %2596 = vmatpush.msra.mxu2 %v2581_v0  ;;  %v6004_v11 = vpop.f32.mrf.mxu1  ;;  %v2280_v0 = vld [vmem:[#allocation2 + $0xc0] sm:$0xff] }
 0x120   : > { %2323 = vmatpush.msra.mxu0 %v2280_v0  ;;  %2528 = vmatpush.msra.mxu3 %v2511_v6  ;;  %v6077_v0 = vld [vmem:[#allocation2 + $0x410] sm:$0xff]  ;;  %v2723_v6 = vld [vmem:[#allocation2 + $0x680] sm:$0xff] }
 0x121   : > { %2597 = vmatpush.msra.mxu2 %v2580_v18  ;;  %v6030_v18 = vld [vmem:[#allocation2 + $0x140] sm:$0xff] }
 0x122   : > { %7273 = vst [vmem:[#allocation49_spill] sm:$0xff] %v6030_v18  ;;  %2343 = vmatpush.msra.mxu1 %v6030_v18  ;;  %2456 = vmatpush.msrb.mxu0 %v6035_v61  ;;  %v2854_v18 = vld [vmem:[#allocation2 + $0x710] sm:$0xff] }
 0x123   : > { %2598 = vmatpush.msra.mxu2 %v2579_v57  ;;  %v6033_v57 = vld [vmem:[#allocation2 + $0x4f8] sm:$0xff]  ;;  %2529 = vmatpush.msra.mxu3 %v2510_v25  ;;  %v2506_v25 = vld [vmem:[#allocation2 + $0x1c8] sm:$0xff] }
 0x124   : > { %7274 = vst [vmem:[#allocation50_spill] sm:$0xff] %v6033_v57  ;;  %2416 = vmatpush.msrb.mxu1 %v6033_v57 }
 0x125   : > { %2599 = vmatpush.msra.mxu2 %v2578_v9  ;;  %v6006_v15 = vpop.f32.mrf.mxu2  ;;  %v6044_v9 = vld [vmem:[#allocation2 + $0x430] sm:$0xff]  ;;  %2530 = vmatpush.msra.mxu3 %v2509_v44 }
 0x126   : > { %v6008_v22 = vpop.f32.mrf.mxu3  ;;  %2417 = vmatpush.msrb.mxu1 %v6037_v19  ;;  %2457 = vmatpush.msrb.mxu0 %v6044_v9 }
 0x127   : > { %2600 = vmatpush.msra.mxu2 %v2577_v7  ;;  %v2729_v7 = vld [vmem:[#allocation2 + $0x6b0] sm:$0xff]  ;;  %2531 = vmatpush.msra.mxu3 %v2508_v37  ;;  %v6095_v37 = vld [vmem:[#allocation2 + $0x4c0] sm:$0xff] }
 0x128   : > { %v6019_v50 = vpop.f32.mrf.mxu0  ;;  %2418 = vmatpush.msrb.mxu1 %v6053_v13  ;;  %7281 = vst [vmem:[#allocation13_spill] sm:$0xff] %v6095_v37  ;;  %v2855_v13 = vld [vmem:[#allocation2 + $0x718] sm:$0xff] }
 0x129   : > { %2601 = vmatpush.msra.mxu2 %v2576_v30  ;;  %v6021_v17 = vpop.f32.mrf.mxu1  ;;  %2532 = vmatpush.msra.mxu3 %v2507_v52  ;;  %v2505_v52 = vld [vmem:[#allocation2 + $0x1c0] sm:$0xff] }
 0x12a   : > { %2419 = vmatpush.msrb.mxu1 %v6063_v35  ;;  %v6117_v35 = vld [vmem:[#allocation2 + $0x3e8] sm:$0xff] }
 0x12b   : > { %2602 = vmatpush.msra.mxu2 %v2575_v24  ;;  %v6055_v24 = vld [vmem:[#allocation2 + $0x428] sm:$0xff]  ;;  %2533 = vmatpush.msra.mxu3 %v2506_v25  ;;  %7287 = vst [vmem:[#allocation20_spill] sm:$0xff] %v6117_v35 }
 0x12c   : > { %2458 = vmatpush.msrb.mxu0 %v6055_v24  ;;  %v2857_v25 = vld [vmem:[#allocation2 + $0x728] sm:$0xff] }
 0x12d   : > { %2603 = vmatpush.msra.mxu2 %v2574_v34  ;;  %v2727_v34 = vld [vmem:[#allocation2 + $0x6a0] sm:$0xff]  ;;  %2534 = vmatpush.msra.mxu3 %v2505_v52  ;;  %v6119_v52 = vld [vmem:[#allocation2 + $0x1a8] sm:$0xff] }
 0x12e   : > { %2459 = vmatpush.msrb.mxu0 %v6065_v36  ;;  %7288 = vst [vmem:[#allocation21_spill] sm:$0xff] %v6119_v52 }
 0x12f   : > { %2604 = vmatpush.msra.mxu2 %v2573_v45  ;;  %v6025_v49 = vpop.f32.mrf.mxu2  ;;  %v2726_v45 = vld [vmem:[#allocation2 + $0x698] sm:$0xff] }
 0x130   : > { %v6027_v56 = vpop.f32.mrf.mxu3 }
 0x131   : > { %2605 = vmatpush.msra.mxu2 %v2572_v42  ;;  %v6069_v42 = vld [vmem:[#allocation2 + $0x4d8] sm:$0xff] }
 0x132   : > { %v6048_v30 = vpop.f32.mrf.mxu0  ;;  %7278 = vst [vmem:[#allocation39_spill] sm:$0xff] %v6069_v42  ;;  %2420 = vmatpush.msrb.mxu1 %v6069_v42  ;;  %v6108_v42 = vld [vmem:[#allocation2 + $0x3f0] sm:$0xff] }
 0x133   : > { %2606 = vmatpush.msra.mxu2 %v2571_v51  ;;  %v6050_v31 = vpop.f32.mrf.mxu1  ;;  %v6071_v51 = vld [vmem:[#allocation2 + $0x418] sm:$0xff]  ;;  %7284 = vst [vmem:[#allocation17_spill] sm:$0xff] %v6108_v42 }
 0x134   : > { %2460 = vmatpush.msrb.mxu0 %v6071_v51  ;;  %2421 = vmatpush.msrb.mxu1 %v6073_v59  ;;  %v6102_v59 = vld [vmem:[#allocation2 + $0x3f8] sm:$0xff] }
 0x135   : > { %2607 = vmatpush.msra.mxu2 %v2570_v2  ;;  %v2725_v2 = vld [vmem:[#allocation2 + $0x690] sm:$0xff] }
 0x136   : > { %2461 = vmatpush.msrb.mxu0 %v6077_v0 }
 0x137   : > { %2608 = vmatpush.msra.mxu2 %v2569_v41  ;;  %v2724_v41 = vld [vmem:[#allocation2 + $0x688] sm:$0xff] }
 0x138   : > { %2609 = vmatmul.f32.vlgmr.msra.gmra.mxu2 %v6040_v8 }
 0x139   : > { %2759 = vmatpush.msrb.mxu2 %v2730_v20  ;;  %v6057_v27 = vpop.f32.mrf.mxu2 }
 0x13a   : > { %v6059_v29 = vpop.f32.mrf.mxu3 }
 0x13b   : > { %2760 = vmatpush.msrb.mxu2 %v2729_v7  ;;  %v6085_v7 = vld [vmem:[#allocation2 + $0x4c8] sm:$0xff] }
 0x13c   : > { %v6081_v1 = vpop.f32.mrf.mxu0  ;;  %7280 = vst [vmem:[#allocation12_spill] sm:$0xff] %v6085_v7  ;;  %2422 = vmatpush.msrb.mxu1 %v6085_v7  ;;  %v6105_v7 = vld [vmem:[#allocation2 + $0x4b0] sm:$0xff] }
 0x13d   : > { %2761 = vmatpush.msrb.mxu2 %v2728_v12  ;;  %v6083_v20 = vpop.f32.mrf.mxu1  ;;  %v6087_v12 = vld [vmem:[#allocation2 + $0x408] sm:$0xff]  ;;  %7283 = vst [vmem:[#allocation16_spill] sm:$0xff] %v6105_v7 }
 0x13e   : > { %2462 = vmatpush.msrb.mxu0 %v6087_v12  ;;  %2423 = vmatpush.msrb.mxu1 %v6095_v37  ;;  %v2856_v37 = vld [vmem:[#allocation2 + $0x720] sm:$0xff] }
 0x13f   : > { %2762 = vmatpush.msrb.mxu2 %v2727_v34 }
 0x140   : > { %2424 = vmatpush.msrb.mxu1 %v6100_v28 }
 0x141   : > { %2763 = vmatpush.msrb.mxu2 %v2726_v45  ;;  %v2859_v45 = vld [vmem:[#allocation2 + $0x738] sm:$0xff] }
 0x142   : > { %2425 = vmatpush.msrb.mxu1 %v6105_v7  ;;  %v6132_v7 = vld [vmem:[#allocation2 + $0x1a0] sm:$0xff] }
 0x143   : > { %2764 = vmatpush.msrb.mxu2 %v2725_v2  ;;  %v6089_v34 = vpop.f32.mrf.mxu2  ;;  %v6097_v2 = vld [vmem:[#allocation2 + $0x400] sm:$0xff]  ;;  %7291 = vst [vmem:[#allocation24_spill] sm:$0xff] %v6132_v7 }
 0x144   : > { %v6091_v44 = vpop.f32.mrf.mxu3  ;;  %2463 = vmatpush.msrb.mxu0 %v6097_v2 }
 0x145   : > { %2765 = vmatpush.msrb.mxu2 %v2724_v41  ;;  %v2504_v41 = vld [vmem:[#allocation2 + $0x1b8] sm:$0xff] }
 0x146   : > { %2464 = vmatpush.msrb.mxu0 %v6102_v59  ;;  %2535 = vmatpush.msra.mxu3 %v2504_v41  ;;  %v6121_v28 = vpop.f32.mrf.mxu0  ;;  %v6128_v41 = vld [vmem:[#allocation2 + $0x4a0] sm:$0xff] }
 0x147   : > { %2766 = vmatpush.msrb.mxu2 %v2723_v6  ;;  %v6111_v6 = vld [vmem:[#allocation2 + $0x1b0] sm:$0xff]  ;;  %7289 = vst [vmem:[#allocation22_spill] sm:$0xff] %v6128_v41 }
 0x148   : > { %7285 = vst [vmem:[#allocation18_spill] sm:$0xff] %v6111_v6  ;;  %2465 = vmatpush.msrb.mxu0 %v6108_v42  ;;  %2536 = vmatpush.msra.mxu3 %v6111_v6  ;;  %v6141_v6 = vld [vmem:[#allocation2 + $0x3d8] sm:$0xff]  ;;  %v6197_v42 = vld [vmem:[#allocation2 + $0x6c0] sm:$0xff] }
 0x149   : > { %2868 = vmatpush.msra.mxu2 %v2859_v45  ;;  %v6115_v45 = vld [vmem:[#allocation2 + $0x4a8] sm:$0xff]  ;;  %7293 = vst [vmem:[#allocation26_spill] sm:$0xff] %v6141_v6 }
 0x14a   : > { %7286 = vst [vmem:[#allocation19_spill] sm:$0xff] %v6115_v45  ;;  %2426 = vmatpush.msrb.mxu1 %v6115_v45  ;;  %2466 = vmatpush.msrb.mxu0 %v6117_v35  ;;  %v6143_v45 = vld [vmem:[#allocation2 + $0x198] sm:$0xff] }
 0x14b   : > { %2869 = vmatpush.msra.mxu2 %v2858_v32  ;;  %v6123_v32 = vpop.f32.mrf.mxu1  ;;  %2537 = vmatpush.msra.mxu3 %v6119_v52  ;;  %7294 = vst [vmem:[#allocation27_spill] sm:$0xff] %v6143_v45  ;;  %v6148_v52 = vld [vmem:[#allocation2 + $0x490] sm:$0xff] }
 0x14c   : > { %2427 = vmatpush.msrb.mxu1 %v6128_v41  ;;  %7295 = vst [vmem:[#allocation29_spill] sm:$0xff] %v6148_v52  ;;  %v6150_v41 = vld [vmem:[#allocation2 + $0x3d0] sm:$0xff] }
 0x14d   : > { %2870 = vmatpush.msra.mxu2 %v2857_v25  ;;  %v6130_v25 = vld [vmem:[#allocation2 + $0x3e0] sm:$0xff]  ;;  %v1941_v19 = vpop.f32.mrf.mxu2  ;;  %2538 = vmatpush.msra.mxu3 %v6132_v7  ;;  %7296 = vst [vmem:[#allocation30_spill] sm:$0xff] %v6150_v41  ;;  %v6157_v7 = vld [vmem:[#allocation2 + $0x488] sm:$0xff] }
 0x14e   : > { %7290 = vst [vmem:[#allocation23_spill] sm:$0xff] %v6130_v25  ;;  %v6134_v57 = vpop.f32.mrf.mxu3  ;;  %2467 = vmatpush.msrb.mxu0 %v6130_v25  ;;  %v6184_v25 = vld [vmem:[#allocation2 + $0x6d8] sm:$0xff] }
 0x14f   : > { %2871 = vmatpush.msra.mxu2 %v2856_v37  ;;  %v6139_v37 = vld [vmem:[#allocation2 + $0x498] sm:$0xff]  ;;  %2539 = vmatpush.msra.mxu3 %v6143_v45  ;;  %7298 = vst [vmem:[#allocation35_spill] sm:$0xff] %v6157_v7  ;;  %v6166_v45 = vld [vmem:[#allocation2 + $0x480] sm:$0xff] }
 0x150   : > { %7292 = vst [vmem:[#allocation25_spill] sm:$0xff] %v6139_v37  ;;  %2428 = vmatpush.msrb.mxu1 %v6139_v37  ;;  %2468 = vmatpush.msrb.mxu0 %v6141_v6  ;;  %v6159_v37 = vld [vmem:[#allocation2 + $0x3c8] sm:$0xff]  ;;  %v1981_v26 = vpop.f32.mrf.mxu0  ;;  %v6172_v6 = vld [vmem:[#allocation2 + $0x6f0] sm:$0xff] }
 0x151   : > { %2872 = vmatpush.msra.mxu2 %v2855_v13  ;;  %v6152_v13 = vld [vmem:[#allocation2 + $0x190] sm:$0xff]  ;;  %7299 = vst [vmem:[#allocation36_spill] sm:$0xff] %v6159_v37 }
 0x152   : > { %7297 = vst [vmem:[#allocation31_spill] sm:$0xff] %v6152_v13  ;;  %2429 = vmatpush.msrb.mxu1 %v6148_v52  ;;  %2469 = vmatpush.msrb.mxu0 %v6150_v41  ;;  %v6168_v52 = vld [vmem:[#allocation2 + $0x3c0] sm:$0xff] }
 0x153   : > { %2873 = vmatpush.msra.mxu2 %v2854_v18  ;;  %v6161_v18 = vld [vmem:[#allocation2 + $0x188] sm:$0xff]  ;;  %2540 = vmatpush.msra.mxu3 %v6152_v13  ;;  %7301 = vst [vmem:[#allocation41_spill] sm:$0xff] %v6166_v45  ;;  %v2001_v41 = vpop.f32.mrf.mxu1 }
 0x154   : > { %7300 = vst [vmem:[#allocation40_spill] sm:$0xff] %v6161_v18  ;;  %2430 = vmatpush.msrb.mxu1 %v6157_v7  ;;  %2470 = vmatpush.msrb.mxu0 %v6159_v37  ;;  %v6177_v7 = vld [vmem:[#allocation2 + $0x6e8] sm:$0xff]  ;;  %v6181_v37 = vld [vmem:[#allocation2 + $0x6e0] sm:$0xff] }
 0x155   : > { %2874 = vmatpush.msra.mxu2 %v2853_v47  ;;  %7302 = vst [vmem:[#allocation42_spill] sm:$0xff] %v6168_v52  ;;  %v6170_v47 = vld [vmem:[#allocation2 + $0x180] sm:$0xff]  ;;  %2541 = vmatpush.msra.mxu3 %v6161_v18  ;;  %v6187_v18 = vld [vmem:[#allocation2 + $0x6d0] sm:$0xff] }
 0x156   : > { %7303 = vst [vmem:[#allocation28_spill] sm:$0xff] %v6170_v47  ;;  %2431 = vmatpush.msrb.mxu1 %v6166_v45  ;;  %2471 = vmatpush.msrb.mxu0 %v6168_v52 }
 0x157   : > { %2875 = vmatpush.msra.mxu2 %v2852_v43  ;;  %7304 = vst [vmem:[#allocation51_spill] sm:$0xff] %v6172_v6  ;;  %v2023_v43 = vpop.f32.mrf.mxu2  ;;  %2542 = vmatpush.msra.mxu3 %v6170_v47  ;;  %v6192_v47 = vld [vmem:[#allocation2 + $0x6c8] sm:$0xff] }
 0x158   : > { %v2043_v13 = vpop.f32.mrf.mxu3  ;;  %7305 = vst [vmem:[#allocation14_spill] sm:$0xff] %v6177_v7 }
 0x159   : > { %2876 = vmatpush.msra.mxu2 %v2851_v33  ;;  %7306 = vst [vmem:[#allocation32_spill] sm:$0xff] %v6181_v37  ;;  %v1526_v33 = vadd.f32 %v5996_v63, %v5992_v39  ;;  %v1546_v39 = vadd.f32 %v5998_v3, %v5994_v62 }
 0x15a   : > { %7307 = vst [vmem:[#allocation34_spill] sm:$0xff] %v6184_v25  ;;  %v2065_v45 = vpop.f32.mrf.mxu0 }
 0x15b   : > { %2877 = vmatpush.msra.mxu2 %v6172_v6  ;;  %7308 = vst [vmem:[#allocation33_spill] sm:$0xff] %v6187_v18  ;;  %v2085_v52 = vpop.f32.mrf.mxu1  ;;  %v1630_v63 = vadd.f32 %v6006_v15, %v1526_v33 }
 0x15c   : > { %7309 = vst [vmem:[#allocation43_spill] sm:$0xff] %v6192_v47 }
 0x15d   : > { %2878 = vmatpush.msra.mxu2 %v6177_v7  ;;  %v1446_v7 = vadd.f32 %v5985_v54, %v5977_v48  ;;  %7310 = vst [vmem:[#allocation52_spill] sm:$0xff] %v6197_v42  ;;  %v1466_v48 = vadd.f32 %v5987_v55, %v5979_v38  ;;  %v1714_v3 = vadd.f32 %v6025_v49, %v1630_v63 }
 0x15f   : > { %2879 = vmatpush.msra.mxu2 %v6181_v37  ;;  %v1862_v37 = vadd.f32 %v6089_v34, %v6081_v1  ;;  %v1588_v54 = vadd.f32 %v6002_v4, %v1446_v7  ;;  %v1882_v1 = vadd.f32 %v6091_v44, %v6083_v20  ;;  %v1589_v62 = vadd.f32 %v6004_v11, %v1466_v48  ;;  %v6232_v48 = vld [vmem:[#allocation2 + $0x238] sm:$0xff] }
 0x161   : > { %2880 = vmatpush.msra.mxu2 %v6184_v25  ;;  %v2107_v6 = vpop.f32.mrf.mxu2  ;;  %v1942_v25 = vadd.f32 %v1941_v19, %v6121_v28  ;;  %v1962_v28 = vadd.f32 %v6134_v57, %v6123_v32  ;;  %v2004_v19 = vadd.f32 %v1981_v26, %v1862_v37  ;;  %v2005_v33 = vadd.f32 %v2001_v41, %v1882_v1  ;;  %v6236_v1 = vld [vmem:[#allocation2 + $0x678] sm:$0xff] }
 0x162   : > { %v2127_v35 = vpop.f32.mrf.mxu3  ;;  %v1672_v55 = vadd.f32 %v6019_v50, %v1588_v54  ;;  %v1673_v4 = vadd.f32 %v6021_v17, %v1589_v62  ;;  %v6234_v54 = vld [vmem:[#allocation2 + $0x5f8] sm:$0xff]  ;;  %v6255_v62 = vld [vmem:[#allocation2 + $0x228] sm:$0xff] }
 0x163   : > { %2881 = vmatpush.msra.mxu2 %v6187_v18  ;;  %v1631_v18 = vadd.f32 %v6008_v22, %v1546_v39  ;;  %v2046_v34 = vadd.f32 %v2023_v43, %v1942_v25  ;;  %v2047_v38 = vadd.f32 %v2043_v13, %v1962_v28  ;;  %v1802_v22 = vadd.f32 %v6057_v27, %v1714_v3  ;;  %v6241_v28 = vld [vmem:[#allocation2 + $0x230] sm:$0xff]  ;;  %v6260_v3 = vld [vmem:[#allocation2 + $0x5e8] sm:$0xff] }
 0x164   : > { %v2153_v7 = vpop.f32.mrf.mxu0  ;;  %v2088_v26 = vadd.f32 %v2065_v45, %v2004_v19  ;;  %v2089_v44 = vadd.f32 %v2085_v52, %v2005_v33  ;;  %v1760_v49 = vadd.f32 %v6048_v30, %v1672_v55  ;;  %v7311_v45 = vperm.slane %v5969_v5, 0  ;;  %v6249_v19 = vld [vmem:[#allocation2 + $0x5f0] sm:$0xff]  ;;  %v6266_v33 = vld [vmem:[#allocation2 + $0x220] sm:$0xff] }
 0x165   : > { %2882 = vmatpush.msra.mxu2 %v6192_v47  ;;  %v1715_v15 = vadd.f32 %v6027_v56, %v1631_v18  ;;  %v2173_v57 = vpop.f32.mrf.mxu1  ;;  %v2130_v32 = vadd.f32 %v2107_v6, %v2046_v34  ;;  %v2131_v11 = vadd.f32 %v2127_v35, %v2047_v38  ;;  %v1761_v56 = vadd.f32 %v6050_v31, %v1673_v4  ;;  %v6251_v34 = vld [vmem:[#allocation2 + $0x670] sm:$0xff]  ;;  %v6270_v38 = vld [vmem:[#allocation2 + $0x5e0] sm:$0xff]  ;;  %v6280_v4 = vld [vmem:[#allocation2 + $0x218] sm:$0xff] }
 0x166   : > { %v2176_v37 = vadd.f32 %v2153_v7, %v2088_v26  ;;  %v2177_v50 = vadd.f32 %v2173_v57, %v2089_v44  ;;  %v2220_v18 = vmax.f32 %v1760_v49, %v1802_v22  ;;  %v7312_v35 = vperm.slane %v5969_v5, 1  ;;  %v6272_v55 = vld [vmem:[#allocation2 + $0x660] sm:$0xff]  ;;  %v6286_v22 = vld [vmem:[#allocation2 + $0x658] sm:$0xff]  ;;  %v6296_v7 = vld [vmem:[#allocation2 + $0x650] sm:$0xff] }
 0x167   : > { %2883 = vmatpush.msra.mxu2 %v6197_v42  ;;  %v1803_v20 = vadd.f32 %v6059_v29, %v1715_v15  ;;  %v6262_v15 = vld [vmem:[#allocation2 + $0x668] sm:$0xff]  ;;  %v6327_v49 = vld [vmem:[#allocation2 + $0x2f8] sm:$0xff]  ;;  %v6429_v42 = vld [vmem:[#allocation2 + $0x370] sm:$0xff] }
 0x168   : > { %v6303_v57 = vld [vmem:[#allocation2 + $0x208] sm:$0xff]  ;;  %7313 = vst [vmem:[#allocation53_spill] sm:$0xff] %v6327_v49  ;;  %v6431_v47 = vld [vmem:[#allocation2 + $0x270] sm:$0xff] }
 0x169   : > { %v2221_v27 = vmax.f32 %v1761_v56, %v1803_v20  ;;  %v6292_v20 = vld [vmem:[#allocation2 + $0x5d0] sm:$0xff]  ;;  %v6307_v26 = vld [vmem:[#allocation2 + $0x5c8] sm:$0xff]  ;;  %v6334_v56 = vld [vmem:[#allocation2 + $0x638] sm:$0xff]  ;;  %7323 = vst [vmem:[#allocation63_spill] sm:$0xff] %v6429_v42 }
 0x16a   : > { %v6309_v44 = vld [vmem:[#allocation2 + $0x648] sm:$0xff]  ;;  %7324 = vst [vmem:[#allocation64_spill] sm:$0xff] %v6431_v47 }
 0x16b   : > { %v2195_v41 = vpop.f32.mrf.mxu2 }
 0x16c   : > { %v2215_v25 = vpop.f32.mrf.mxu3  ;;  %v2218_v13 = vadd.f32 %v2195_v41, %v2130_v32  ;;  %v6313_v32 = vld [vmem:[#allocation2 + $0x200] sm:$0xff]  ;;  %v6338_v41 = vld [vmem:[#allocation2 + $0x2b0] sm:$0xff] }
 0x16d   : > { %v2219_v17 = vadd.f32 %v2215_v25, %v2131_v11  ;;  %v6323_v11 = vld [vmem:[#allocation2 + $0x2b8] sm:$0xff]  ;;  %v6348_v25 = vld [vmem:[#allocation2 + $0x630] sm:$0xff] }
 0x16e   : > { %v2222_v43 = vmax.f32 %v2176_v37, %v2218_v13  ;;  %v6354_v37 = vld [vmem:[#allocation2 + $0x2e8] sm:$0xff]  ;;  %v6363_v13 = vld [vmem:[#allocation2 + $0x2a0] sm:$0xff] }
 0x16f   : > { %v2223_v29 = vmax.f32 %v2177_v50, %v2219_v17  ;;  %7315 = vst [vmem:[#allocation55_spill] sm:$0xff] %v6354_v37  ;;  %v6358_v50 = vld [vmem:[#allocation2 + $0x628] sm:$0xff]  ;;  %v6369_v17 = vld [vmem:[#allocation2 + $0x620] sm:$0xff] }
 0x170   : > { %v2224_v39 = vmax.f32 %v2220_v18, %v2222_v43  ;;  %v6375_v18 = vld [vmem:[#allocation2 + $0x2d8] sm:$0xff]  ;;  %v6383_v43 = vld [vmem:[#allocation2 + $0x290] sm:$0xff] }
 0x171   : > { %v2225_v63 = vmax.f32 %v2221_v27, %v2223_v29  ;;  %7317 = vst [vmem:[#allocation57_spill] sm:$0xff] %v6375_v18  ;;  %v6379_v27 = vld [vmem:[#allocation2 + $0x618] sm:$0xff]  ;;  %v6385_v29 = vld [vmem:[#allocation2 + $0x2d0] sm:$0xff] }
 0x172   : > { %v2226_v6 = vadd.f32 %v2224_v39, %v7311_v45  ;;  %7318 = vst [vmem:[#allocation58_spill] sm:$0xff] %v6385_v29  ;;  %v6393_v39 = vld [vmem:[#allocation2 + $0x288] sm:$0xff]  ;;  %v6403_v45 = vld [vmem:[#allocation2 + $0x280] sm:$0xff] }
 0x173   : > { %v2227_v30 = vadd.f32 %v2225_v63, %v7312_v35  ;;  %v6395_v63 = vld [vmem:[#allocation2 + $0x2c8] sm:$0xff]  ;;  %v6413_v35 = vld [vmem:[#allocation2 + $0x378] sm:$0xff] }
 0x174   : > { %v6228_v52 = vmax.f32 %v2226_v6, 0.0  ;;  %7319 = vst [vmem:[#allocation59_spill] sm:$0xff] %v6395_v63  ;;  %v6405_v6 = vld [vmem:[#allocation2 + $0x2c0] sm:$0xff] }
 0x175   : > { %v6230_v31 = vmax.f32 %v2227_v30, 0.0  ;;  %7320 = vst [vmem:[#allocation60_spill] sm:$0xff] %v6405_v6 }
 0x176   : > { %2324 = vmatmul.f32.vlgmr.msra.gmra.mxu0 %v6228_v52  ;;  %7321 = vst [vmem:[#allocation61_spill] sm:$0xff] %v6413_v35  ;;  %v6423_v30 = vrot.slane %v6228_v52, 1 }
 0x177   : > { %4419 = vmatmul.msk.f32.vlgmr.msra.gmra.mxu1 %vm2304_vm5, %v6230_v31  ;;  %v6244_v5 = vrot.slane %v6230_v31, 1  ;;  %4421 = vmatmul.msk.f32.vlgmr.msrb.gmra.mxu3 %vm2304_vm5, %v6230_v31 }
 0x178   : > { %2555 = vmatpush.msra.mxu1 %v6232_v48  ;;  %2621 = vmatpush.msrb.mxu3 %v6234_v54 }
 0x179   : > { %2731 = vmatpush.msra.mxu0 %v6236_v1  ;;  %4426 = vmatmul.msk.f32.vlgmr.msrb.gmra.mxu2 %vm2304_vm5, %v6244_v5 }
 0x17a   : > { %2556 = vmatpush.msra.mxu1 %v6241_v28  ;;  %2622 = vmatpush.msrb.mxu3 %v6249_v19 }
 0x17b   : > { %2732 = vmatpush.msra.mxu0 %v6251_v34  ;;  %2977 = vmatpush.msrb.mxu2 %v5915_v58  ;;  %v6282_v58 = vld [vmem:[#allocation2 + $0x5d8] sm:$0xff] }
 0x17c   : > { %2557 = vmatpush.msra.mxu1 %v6255_v62  ;;  %2623 = vmatpush.msrb.mxu3 %v6260_v3 }
 0x17d   : > { %2733 = vmatpush.msra.mxu0 %v6262_v15  ;;  %2978 = vmatpush.msrb.mxu2 %v5919_v60  ;;  %v6290_v60 = vld [vmem:[#allocation2 + $0x210] sm:$0xff] }
 0x17e   : > { %2558 = vmatpush.msra.mxu1 %v6266_v33  ;;  %2624 = vmatpush.msrb.mxu3 %v6270_v38 }
 0x17f   : > { %2734 = vmatpush.msra.mxu0 %v6272_v55  ;;  %2979 = vmatpush.msrb.mxu2 %v5923_v46  ;;  %v6301_v46 = vrot.slane %v5983_v40, 2 }
 0x180   : > { %2432 = vmatmul.f32.vlgmr.msrb.gmra.mxu1 %v6228_v52  ;;  %2472 = vmatmul.f32.vlgmr.msrb.gmra.mxu0 %v5983_v40  ;;  %v6319_v40 = vld [vmem:[#allocation2 + $0x640] sm:$0xff] }
 0x181   : > { %2543 = vmatmul.f32.vlgmr.msra.gmra.mxu3 %v6040_v8  ;;  %2559 = vmatpush.msra.mxu1 %v6280_v4 }
 0x182   : > { %2625 = vmatpush.msrb.mxu3 %v6282_v58  ;;  %2735 = vmatpush.msra.mxu0 %v6286_v22 }
 0x183   : > { %2980 = vmatpush.msrb.mxu2 %v5925_v16  ;;  %2560 = vmatpush.msra.mxu1 %v6290_v60  ;;  %v6317_v16 = vld [vmem:[#allocation2 + $0x5c0] sm:$0xff] }
 0x184   : > { %2626 = vmatpush.msrb.mxu3 %v6292_v20  ;;  %2736 = vmatpush.msra.mxu0 %v6296_v7 }
 0x185   : > { %2884 = vmatmul.f32.vlgmr.msra.gmra.mxu2 %v6301_v46  ;;  %2561 = vmatpush.msra.mxu1 %v6303_v57 }
 0x186   : > { %2981 = vmatpush.msrb.mxu2 %v5928_v10  ;;  %2627 = vmatpush.msrb.mxu3 %v6307_v26  ;;  %v6332_v10 = vrot.slane %v5981_v53, 1 }
 0x187   : > { %2737 = vmatpush.msra.mxu0 %v6309_v44  ;;  %2562 = vmatpush.msra.mxu1 %v6313_v32 }
 0x188   : > { %2982 = vmatpush.msrb.mxu2 %v5931_v14  ;;  %2628 = vmatpush.msrb.mxu3 %v6317_v16  ;;  %v6343_v14 = vld [vmem:[#allocation2 + $0x2f0] sm:$0xff] }
 0x189   : > { %2738 = vmatpush.msra.mxu0 %v6319_v40  ;;  %2665 = vmatpush.msrb.mxu1 %v6323_v11  ;;  %7314 = vst [vmem:[#allocation54_spill] sm:$0xff] %v6343_v14 }
 0x18a   : > { %2983 = vmatpush.msrb.mxu2 %v5934_v21  ;;  %2693 = vmatpush.msra.mxu3 %v6327_v49  ;;  %v6352_v21 = vld [vmem:[#allocation2 + $0x2a8] sm:$0xff]  ;;  %v6491_v49 = vld [vmem:[#allocation2 + $0x240] sm:$0xff] }
 0x18b   : > { %4423 = vmatmul.msk.f32.vlgmr.msra.gmra.mxu1 %vm2304_vm5, %v6332_v10  ;;  %4424 = vmatmul.msk.f32.vlgmr.msrb.gmra.mxu3 %vm2304_vm5, %v6332_v10  ;;  %7340 = vst [vmem:[#allocation72_spill] sm:$0xff] %v6491_v49 }
 0x18c   : > { %2739 = vmatpush.msra.mxu0 %v6334_v56  ;;  %2984 = vmatpush.msrb.mxu2 %v5937_v23  ;;  %v6365_v23 = vld [vmem:[#allocation2 + $0x2e0] sm:$0xff] }
 0x18d   : > { %2666 = vmatpush.msrb.mxu1 %v6338_v41  ;;  %2694 = vmatpush.msra.mxu3 %v6343_v14  ;;  %7316 = vst [vmem:[#allocation56_spill] sm:$0xff] %v6365_v23  ;;  %v6471_v14 = vld [vmem:[#allocation2 + $0x250] sm:$0xff] }
 0x18e   : > { %3029 = vmatpush.msra.mxu2 %v6035_v61  ;;  %2740 = vmatpush.msra.mxu0 %v6348_v25  ;;  %v6373_v61 = vld [vmem:[#allocation2 + $0x298] sm:$0xff]  ;;  %7334 = vst [vmem:[#allocation70_spill] sm:$0xff] %v6471_v14 }
 0x18f   : > { %4430 = vmatmul.msk.f32.vlgmr.msrb.gmra.mxu2 %vm2304_vm5, %v6230_v31  ;;  %2667 = vmatpush.msrb.mxu1 %v6352_v21 }
 0x190   : > { %2695 = vmatpush.msra.mxu3 %v6354_v37  ;;  %3030 = vmatpush.msra.mxu2 %v6044_v9  ;;  %v6389_v9 = vld [vmem:[#allocation2 + $0x610] sm:$0xff]  ;;  %v6461_v37 = vld [vmem:[#allocation2 + $0x258] sm:$0xff] }
 0x191   : > { %2741 = vmatpush.msra.mxu0 %v6358_v50  ;;  %2668 = vmatpush.msrb.mxu1 %v6363_v13  ;;  %7331 = vst [vmem:[#allocation69_spill] sm:$0xff] %v6461_v37 }
 0x192   : > { %2696 = vmatpush.msra.mxu3 %v6365_v23  ;;  %3031 = vmatpush.msra.mxu2 %v6055_v24  ;;  %v6399_v24 = vld [vmem:[#allocation2 + $0x608] sm:$0xff]  ;;  %v6459_v23 = vld [vmem:[#allocation2 + $0x358] sm:$0xff] }
 0x193   : > { %2742 = vmatpush.msra.mxu0 %v6369_v17  ;;  %2669 = vmatpush.msrb.mxu1 %v6373_v61 }
 0x194   : > { %2697 = vmatpush.msra.mxu3 %v6375_v18  ;;  %3032 = vmatpush.msra.mxu2 %v6065_v36  ;;  %v6411_v36 = vld [vmem:[#allocation2 + $0x600] sm:$0xff] }
 0x195   : > { %2743 = vmatpush.msra.mxu0 %v6379_v27  ;;  %2670 = vmatpush.msrb.mxu1 %v6383_v43  ;;  %v6451_v18 = vld [vmem:[#allocation2 + $0x260] sm:$0xff] }
 0x196   : > { %2698 = vmatpush.msra.mxu3 %v6385_v29  ;;  %3033 = vmatpush.msra.mxu2 %v6071_v51  ;;  %v6417_v51 = vld [vmem:[#allocation2 + $0x278] sm:$0xff]  ;;  %v6449_v29 = vld [vmem:[#allocation2 + $0x360] sm:$0xff]  ;;  %7328 = vst [vmem:[#allocation68_spill] sm:$0xff] %v6451_v18 }
 0x197   : > { %2744 = vmatpush.msra.mxu0 %v6389_v9  ;;  %2671 = vmatpush.msrb.mxu1 %v6393_v39  ;;  %7322 = vst [vmem:[#allocation62_spill] sm:$0xff] %v6417_v51 }
 0x198   : > { %2699 = vmatpush.msra.mxu3 %v6395_v63  ;;  %3034 = vmatpush.msra.mxu2 %v6077_v0  ;;  %v6425_v0 = vld [vmem:[#allocation2 + $0x778] sm:$0xff]  ;;  %v6441_v63 = vld [vmem:[#allocation2 + $0x268] sm:$0xff]  ;;  %7327 = vst [vmem:[#allocation67_spill] sm:$0xff] %v6449_v29 }
 0x199   : > { %2745 = vmatpush.msra.mxu0 %v6399_v24  ;;  %2672 = vmatpush.msrb.mxu1 %v6403_v45  ;;  %7326 = vst [vmem:[#allocation66_spill] sm:$0xff] %v6441_v63 }
 0x19a   : > { %2700 = vmatpush.msra.mxu3 %v6405_v6  ;;  %3035 = vmatpush.msra.mxu2 %v6087_v12  ;;  %v6435_v12 = vld [vmem:[#allocation2 + $0x770] sm:$0xff]  ;;  %v6439_v6 = vld [vmem:[#allocation2 + $0x368] sm:$0xff] }
 0x19b   : > { %4425 = vmatmul.msk.f32.vlgmr.msra.gmra.mxu3 %vm2304_vm5, %v6244_v5  ;;  %2746 = vmatpush.msra.mxu0 %v6411_v36  ;;  %7325 = vst [vmem:[#allocation65_spill] sm:$0xff] %v6439_v6 }
 0x19c   : > { %2802 = vmatpush.msrb.mxu3 %v6413_v35  ;;  %2673 = vmatpush.msrb.mxu1 %v6417_v51  ;;  %v6445_v35 = vld [vmem:[#allocation2 + $0x768] sm:$0xff] }
 0x19d   : > { %2747 = vmatmul.f32.vlgmr.msra.gmra.mxu0 %v6423_v30  ;;  %3036 = vmatpush.msra.mxu2 %v6097_v2  ;;  %v6455_v2 = vld [vmem:[#allocation2 + $0x760] sm:$0xff]  ;;  %v7344_v51 = vld [vmem:[#allocation36_spill] sm:$0xff] }
 0x19e   : > { %2896 = vmatpush.msrb.mxu0 %v6425_v0  ;;  %2803 = vmatpush.msrb.mxu3 %v6429_v42  ;;  %v7329_v42 = vld [vmem:[#allocation17_spill] sm:$0xff] }
 0x19f   : > { %2674 = vmatpush.msrb.mxu1 %v6431_v47  ;;  %3037 = vmatpush.msra.mxu2 %v6102_v59  ;;  %7330 = vst [vmem:[#allocation17_spill] sm:$0xff] %v6459_v23  ;;  %v6465_v59 = vld [vmem:[#allocation2 + $0x758] sm:$0xff]  ;;  %v6481_v47 = vld [vmem:[#allocation2 + $0x248] sm:$0xff] }
 0x1a0   : > { %2897 = vmatpush.msrb.mxu0 %v6435_v12  ;;  %2804 = vmatpush.msrb.mxu3 %v6439_v6  ;;  %v7332_v6 = vld [vmem:[#allocation20_spill] sm:$0xff]  ;;  %7337 = vst [vmem:[#allocation71_spill] sm:$0xff] %v6481_v47 }
 0x1a1   : > { %2675 = vmatpush.msrb.mxu1 %v6441_v63  ;;  %3038 = vmatpush.msra.mxu2 %v7329_v42  ;;  %v6469_v63 = vld [vmem:[#allocation2 + $0x350] sm:$0xff] }
 0x1a2   : > { %2898 = vmatpush.msrb.mxu0 %v6445_v35  ;;  %2805 = vmatpush.msrb.mxu3 %v6449_v29  ;;  %7333 = vst [vmem:[#allocation20_spill] sm:$0xff] %v6469_v63  ;;  %v6475_v42 = vld [vmem:[#allocation2 + $0x750] sm:$0xff]  ;;  %v7335_v29 = vld [vmem:[#allocation23_spill] sm:$0xff] }
 0x1a3   : > { %2676 = vmatpush.msrb.mxu1 %v6451_v18  ;;  %3039 = vmatpush.msra.mxu2 %v7332_v6  ;;  %v6479_v18 = vld [vmem:[#allocation2 + $0x348] sm:$0xff] }
 0x1a4   : > { %2899 = vmatpush.msrb.mxu0 %v6455_v2  ;;  %2806 = vmatpush.msrb.mxu3 %v6459_v23  ;;  %7336 = vst [vmem:[#allocation23_spill] sm:$0xff] %v6479_v18  ;;  %v6485_v6 = vld [vmem:[#allocation2 + $0x748] sm:$0xff]  ;;  %v7338_v23 = vld [vmem:[#allocation26_spill] sm:$0xff] }
 0x1a5   : > { %2677 = vmatpush.msrb.mxu1 %v6461_v37  ;;  %3040 = vmatpush.msra.mxu2 %v7335_v29  ;;  %v6489_v37 = vld [vmem:[#allocation2 + $0x340] sm:$0xff] }
 0x1a6   : > { %2900 = vmatpush.msrb.mxu0 %v6465_v59  ;;  %2807 = vmatpush.msrb.mxu3 %v6469_v63  ;;  %7339 = vst [vmem:[#allocation26_spill] sm:$0xff] %v6489_v37  ;;  %v6495_v29 = vld [vmem:[#allocation2 + $0x740] sm:$0xff] }
 0x1a7   : > { %2678 = vmatpush.msrb.mxu1 %v6471_v14  ;;  %3041 = vmatpush.msra.mxu2 %v7338_v23  ;;  %v7341_v63 = vld [vmem:[#allocation30_spill] sm:$0xff] }
 0x1a8   : > { %2901 = vmatpush.msrb.mxu0 %v6475_v42  ;;  %2808 = vmatpush.msrb.mxu3 %v6479_v18  ;;  %v6499_v14 = vld [vmem:[#allocation2 + $0x338] sm:$0xff]  ;;  %v6508_v18 = vrot.slane %v5981_v53, 2  ;;  %v6524_v53 = vld [vmem:[#allocation2 + $0x3a8] sm:$0xff] }
 0x1a9   : > { %2679 = vmatpush.msrb.mxu1 %v6481_v47  ;;  %3042 = vmatpush.msra.mxu2 %v7341_v63  ;;  %7342 = vst [vmem:[#allocation30_spill] sm:$0xff] %v6499_v14  ;;  %v6503_v23 = vld [vmem:[#allocation2 + $0x3b8] sm:$0xff]  ;;  %v6512_v63 = vld [vmem:[#allocation2 + $0x330] sm:$0xff] }
 0x1aa   : > { %2902 = vmatpush.msrb.mxu0 %v6485_v6  ;;  %2809 = vmatpush.msrb.mxu3 %v6489_v37  ;;  %7343 = vst [vmem:[#allocation73_spill] sm:$0xff] %v6503_v23  ;;  %v6514_v47 = vld [vmem:[#allocation2 + $0x3b0] sm:$0xff]  ;;  %v4507_v37 = vld [vmem:[#allocation2 + $0x78] sm:$0xff] }
 0x1ab   : > { %2680 = vmatpush.msrb.mxu1 %v6491_v49  ;;  %3043 = vmatpush.msra.mxu2 %v7344_v51  ;;  %7345 = vst [vmem:[#allocation36_spill] sm:$0xff] %v6512_v63  ;;  %v7347_v49 = vld [vmem:[#allocation42_spill] sm:$0xff]  ;;  %v6520_v51 = vld [vmem:[#allocation2 + $0x328] sm:$0xff] }
 0x1ac   : > { %2903 = vmatpush.msrb.mxu0 %v6495_v29  ;;  %2681 = vmatmul.f32.vlgmr.msrb.gmra.mxu1 %v6423_v30  ;;  %7346 = vst [vmem:[#allocation74_spill] sm:$0xff] %v6514_v47 }
 0x1ad   : > { %2810 = vmatpush.msrb.mxu3 %v6499_v14  ;;  %2830 = vmatpush.msra.mxu1 %v6503_v23  ;;  %7348 = vst [vmem:[#allocation42_spill] sm:$0xff] %v6520_v51  ;;  %v4508_v14 = vld [vmem:[#allocation2 + $0x70] sm:$0xff]  ;;  %v6527_v23 = vld [vmem:[#allocation2 + $0x320] sm:$0xff] }
 0x1ae   : > { %4428 = vmatmul.msk.f32.vlgmr.msrb.gmra.mxu0 %vm2304_vm5, %v6508_v18  ;;  %3044 = vmatpush.msra.mxu2 %v7347_v49  ;;  %7349 = vst [vmem:[#allocation75_spill] sm:$0xff] %v6527_v23  ;;  %v4509_v49 = vld [vmem:[#allocation2 + $0x68] sm:$0xff] }
 0x1af   : > { %2949 = vmatpush.msra.mxu0 %v4507_v37  ;;  %2811 = vmatpush.msrb.mxu3 %v6512_v63  ;;  %v6531_v37 = vld [vmem:[#allocation2 + $0x3a0] sm:$0xff]  ;;  %v6534_v63 = vld [vmem:[#allocation2 + $0x318] sm:$0xff] }
 0x1b0   : > { %2831 = vmatpush.msra.mxu1 %v6514_v47  ;;  %3045 = vmatmul.f32.vlgmr.msra.gmra.mxu2 %v6228_v52  ;;  %7350 = vst [vmem:[#allocation76_spill] sm:$0xff] %v6534_v63  ;;  %v4510_v47 = vld [vmem:[#allocation2 + $0x60] sm:$0xff] }
 0x1b1   : > { %2950 = vmatpush.msra.mxu0 %v4508_v14  ;;  %3138 = vmatpush.msrb.mxu2 %v6234_v54  ;;  %v6538_v14 = vld [vmem:[#allocation2 + $0x398] sm:$0xff]  ;;  %v6541_v54 = vld [vmem:[#allocation2 + $0x310] sm:$0xff] }
 0x1b2   : > { %2812 = vmatpush.msrb.mxu3 %v6520_v51  ;;  %2832 = vmatpush.msra.mxu1 %v6524_v53  ;;  %v6545_v51 = vld [vmem:[#allocation2 + $0x390] sm:$0xff] }
 0x1b3   : > { %2951 = vmatpush.msra.mxu0 %v4509_v49  ;;  %3139 = vmatpush.msrb.mxu2 %v6249_v19  ;;  %v4511_v49 = vld [vmem:[#allocation2 + $0x58] sm:$0xff]  ;;  %v6548_v19 = vld [vmem:[#allocation2 + $0x308] sm:$0xff] }
 0x1b4   : > { %2813 = vmatpush.msrb.mxu3 %v6527_v23  ;;  %2833 = vmatpush.msra.mxu1 %v6531_v37  ;;  %v6552_v23 = vld [vmem:[#allocation2 + $0x388] sm:$0xff] }
 0x1b5   : > { %2952 = vmatpush.msra.mxu0 %v4510_v47  ;;  %3140 = vmatpush.msrb.mxu2 %v6260_v3  ;;  %v4512_v47 = vld [vmem:[#allocation2 + $0x50] sm:$0xff]  ;;  %v6555_v3 = vld [vmem:[#allocation2 + $0x300] sm:$0xff] }
 0x1b6   : > { %2814 = vmatpush.msrb.mxu3 %v6534_v63  ;;  %2834 = vmatpush.msra.mxu1 %v6538_v14  ;;  %7351 = vst [vmem:[#allocation77_spill] sm:$0xff] %v6555_v3  ;;  %v6559_v63 = vld [vmem:[#allocation2 + $0x380] sm:$0xff] }
 0x1b7   : > { %2953 = vmatpush.msra.mxu0 %v4511_v49  ;;  %3141 = vmatpush.msrb.mxu2 %v6270_v38  ;;  %v4513_v49 = vld [vmem:[#allocation2 + $0x48] sm:$0xff]  ;;  %v4514_v38 = vld [vmem:[#allocation2 + $0x40] sm:$0xff] }
 0x1b8   : > { %2815 = vmatpush.msrb.mxu3 %v6541_v54  ;;  %2835 = vmatpush.msra.mxu1 %v6545_v51 }
 0x1b9   : > { %2954 = vmatpush.msra.mxu0 %v4512_v47  ;;  %3142 = vmatpush.msrb.mxu2 %v6282_v58  ;;  %v4515_v58 = vld [vmem:[#allocation2 + $0x178] sm:$0xff] }
 0x1ba   : > { %2816 = vmatpush.msrb.mxu3 %v6548_v19  ;;  %2836 = vmatpush.msra.mxu1 %v6552_v23  ;;  %v4516_v47 = vld [vmem:[#allocation2 + $0x138] sm:$0xff] }
 0x1bb   : > { %2955 = vmatpush.msra.mxu0 %v4513_v49  ;;  %3143 = vmatpush.msrb.mxu2 %v6292_v20  ;;  %v4517_v49 = vld [vmem:[#allocation2 + $0x38] sm:$0xff]  ;;  %v4518_v20 = vld [vmem:[#allocation2 + $0x170] sm:$0xff] }
 0x1bc   : > { %2817 = vmatpush.msrb.mxu3 %v6555_v3  ;;  %2837 = vmatpush.msra.mxu1 %v6559_v63  ;;  %v4519_v3 = vld [vmem:[#allocation2 + $0x130] sm:$0xff] }
 0x1bd   : > { %2956 = vmatpush.msra.mxu0 %v4514_v38  ;;  %3144 = vmatpush.msrb.mxu2 %v6307_v26  ;;  %v4520_v26 = vld [vmem:[#allocation2 + $0x30] sm:$0xff]  ;;  %v4521_v38 = vld [vmem:[#allocation2 + $0x128] sm:$0xff] }
 0x1be   : > { %2818 = vmatmul.f32.vlgmr.msrb.gmra.mxu3 %v6301_v46  ;;  %4427 = vmatmul.msk.f32.vlgmr.msra.gmra.mxu1 %vm2304_vm5, %v6508_v18 }
 0x1bf   : > { %2937 = vmatpush.msra.mxu3 %v4515_v58  ;;  %2909 = vmatpush.msrb.mxu1 %v4516_v47  ;;  %v4522_v58 = vld [vmem:[#allocation2 + $0x168] sm:$0xff] }
 0x1c0   : > { %2957 = vmatpush.msra.mxu0 %v4517_v49  ;;  %3145 = vmatpush.msrb.mxu2 %v6317_v16  ;;  %v4523_v47 = vld [vmem:[#allocation2 + $0x28] sm:$0xff]  ;;  %v4524_v16 = vld [vmem:[#allocation2 + $0x120] sm:$0xff] }
 0x1c1   : > { %2938 = vmatpush.msra.mxu3 %v4518_v20  ;;  %2910 = vmatpush.msrb.mxu1 %v4519_v3  ;;  %v7352_v49 = vld [vmem:[#allocation44_spill] sm:$0xff]  ;;  %v4525_v3 = vld [vmem:[#allocation2 + $0x20] sm:$0xff]  ;;  %v4526_v20 = vld [vmem:[#allocation2 + $0x118] sm:$0xff] }
 0x1c2   : > { %4434 = vmatmul.msk.f32.vlgmr.msrb.gmra.mxu2 %vm2304_vm5, %v6244_v5  ;;  %2958 = vmatpush.msra.mxu0 %v4520_v26  ;;  %v4527_v26 = vld [vmem:[#allocation2 + $0x18] sm:$0xff] }
 0x1c3   : > { %3192 = vmatpush.msra.mxu2 %v6236_v1  ;;  %2911 = vmatpush.msrb.mxu1 %v4521_v38  ;;  %v7353_v1 = vld [vmem:[#allocation45_spill] sm:$0xff] }
 0x1c4   : > { %2939 = vmatpush.msra.mxu3 %v4522_v58  ;;  %2959 = vmatpush.msra.mxu0 %v4523_v47  ;;  %v4528_v38 = vld [vmem:[#allocation2 + $0x110] sm:$0xff]  ;;  %v4530_v47 = vld [vmem:[#allocation2 + $0x108] sm:$0xff] }
 0x1c5   : > { %3193 = vmatpush.msra.mxu2 %v6251_v34  ;;  %2912 = vmatpush.msrb.mxu1 %v4524_v16  ;;  %v7354_v34 = vld [vmem:[#allocation46_spill] sm:$0xff]  ;;  %v4529_v58 = vld [vmem:[#allocation2 + $0x10] sm:$0xff]  ;;  %v4531_v16 = vld [vmem:[#allocation2 + $0x8] sm:$0xff] }
 0x1c6   : > { %2940 = vmatpush.msra.mxu3 %v7352_v49  ;;  %2960 = vmatpush.msra.mxu0 %v4525_v3  ;;  %v4532_v49 = vld [vmem:[#allocation2 + $0x100] sm:$0xff] }
 0x1c7   : > { %3194 = vmatpush.msra.mxu2 %v6262_v15  ;;  %2913 = vmatpush.msrb.mxu1 %v4526_v20  ;;  %v7355_v15 = vld [vmem:[#allocation47_spill] sm:$0xff]  ;;  %v7357_v3 = vld [vmem:[#allocation50_spill] sm:$0xff] }
 0x1c8   : > { %2941 = vmatpush.msra.mxu3 %v7353_v1  ;;  %2961 = vmatpush.msra.mxu0 %v4527_v26  ;;  %v4534_v20 = vld [vmem:[#allocation2 + $0xf8] sm:$0xff]  ;;  %v7358_v1 = vld [vmem:[#allocation11_spill] sm:$0xff]  ;;  %v4536_v26 = vld [vmem:[#allocation2 + $0xf0] sm:$0xff] }
 0x1c9   : > { %3195 = vmatpush.msra.mxu2 %v6272_v55  ;;  %2914 = vmatpush.msrb.mxu1 %v4528_v38  ;;  %v7356_v55 = vld [vmem:[#allocation49_spill] sm:$0xff] }
 0x1ca   : > { %2942 = vmatpush.msra.mxu3 %v7354_v34  ;;  %2962 = vmatpush.msra.mxu0 %v4529_v58  ;;  %v7359_v38 = vld [vmem:[#allocation37_spill] sm:$0xff]  ;;  %v4538_v34 = vld [vmem:[#allocation2 + $0xe8] sm:$0xff] }
 0x1cb   : > { %3196 = vmatpush.msra.mxu2 %v6286_v22  ;;  %2915 = vmatpush.msrb.mxu1 %v4530_v47  ;;  %v4533_v22 = vld [vmem:[#allocation2] sm:$0xff]  ;;  %v4539_v58 = vld [vmem:[#allocation2 + $0x468] sm:$0xff] }
 0x1cc   : > { %2943 = vmatpush.msra.mxu3 %v7355_v15  ;;  %2963 = vmatpush.msra.mxu0 %v4531_v16  ;;  %v7360_v47 = vld [vmem:[#allocation38_spill] sm:$0xff]  ;;  %v7361_v16 = vld [vmem:[#allocation39_spill] sm:$0xff] }
 0x1cd   : > { %3197 = vmatpush.msra.mxu2 %v6296_v7  ;;  %2916 = vmatpush.msrb.mxu1 %v4532_v49  ;;  %v4535_v7 = vld [vmem:[#allocation2 + $0x478] sm:$0xff]  ;;  %v4540_v15 = vld [vmem:[#allocation2 + $0xe0] sm:$0xff] }
 0x1ce   : > { %2944 = vmatpush.msra.mxu3 %v7356_v55  ;;  %2964 = vmatpush.msra.mxu0 %v4533_v22  ;;  %v4542_v49 = vld [vmem:[#allocation2 + $0xd8] sm:$0xff]  ;;  %v7362_v55 = vld [vmem:[#allocation48_spill] sm:$0xff] }
 0x1cf   : > { %3198 = vmatpush.msra.mxu2 %v6309_v44  ;;  %4429 = vmatmul.msk.f32.vlgmr.msra.gmra.mxu3 %vm2304_vm5, %v6332_v10  ;;  %v4537_v44 = vld [vmem:[#allocation2 + $0x470] sm:$0xff] }
 0x1d0   : > { %2989 = vmatpush.msrb.mxu3 %v7357_v3  ;;  %2917 = vmatpush.msrb.mxu1 %v4534_v20  ;;  %v4544_v22 = vld [vmem:[#allocation2 + $0xd0] sm:$0xff]  ;;  %v4546_v20 = vld [vmem:[#allocation2 + $0xc8] sm:$0xff] }
 0x1d1   : > { %2965 = vmatmul.f32.vlgmr.msra.gmra.mxu0 %v6228_v52  ;;  %3199 = vmatpush.msra.mxu2 %v6319_v40  ;;  %v4541_v40 = vld [vmem:[#allocation2 + $0x460] sm:$0xff]  ;;  %v7363_v3 = vld [vmem:[#allocation12_spill] sm:$0xff] }
 0x1d2   : > { %3057 = vmatpush.msrb.mxu0 %v4535_v7  ;;  %2990 = vmatpush.msrb.mxu3 %v7358_v1  ;;  %v7364_v7 = vld [vmem:[#allocation13_spill] sm:$0xff]  ;;  %v4548_v1 = vld [vmem:[#allocation2 + $0xc0] sm:$0xff] }
 0x1d3   : > { %2918 = vmatpush.msrb.mxu1 %v4536_v26  ;;  %3200 = vmatpush.msra.mxu2 %v6334_v56  ;;  %v4543_v56 = vld [vmem:[#allocation2 + $0x458] sm:$0xff]  ;;  %v7365_v26 = vld [vmem:[#allocation15_spill] sm:$0xff] }
 0x1d4   : > { %3058 = vmatpush.msrb.mxu0 %v4537_v44  ;;  %2991 = vmatpush.msrb.mxu3 %v7359_v38  ;;  %v4551_v44 = vld [vmem:[#allocation2 + $0x5b8] sm:$0xff]  ;;  %v4552_v38 = vld [vmem:[#allocation2 + $0x530] sm:$0xff] }
 0x1d5   : > { %2919 = vmatpush.msrb.mxu1 %v4538_v34  ;;  %3201 = vmatpush.msra.mxu2 %v6348_v25  ;;  %v4545_v25 = vld [vmem:[#allocation2 + $0x450] sm:$0xff] }
 0x1d6   : > { %3059 = vmatpush.msrb.mxu0 %v4539_v58  ;;  %2992 = vmatpush.msrb.mxu3 %v7360_v47  ;;  %v4553_v34 = vld [vmem:[#allocation2 + $0x5b0] sm:$0xff]  ;;  %v4554_v58 = vld [vmem:[#allocation2 + $0x528] sm:$0xff] }
 0x1d7   : > { %2920 = vmatpush.msrb.mxu1 %v4540_v15  ;;  %3202 = vmatpush.msra.mxu2 %v6358_v50  ;;  %v4547_v50 = vld [vmem:[#allocation2 + $0x448] sm:$0xff]  ;;  %v7368_v15 = vld [vmem:[#allocation22_spill] sm:$0xff] }
 0x1d8   : > { %3060 = vmatpush.msrb.mxu0 %v4541_v40  ;;  %2993 = vmatpush.msrb.mxu3 %v7361_v16  ;;  %v4555_v47 = vld [vmem:[#allocation2 + $0x5a8] sm:$0xff]  ;;  %v4557_v40 = vld [vmem:[#allocation2 + $0x5a0] sm:$0xff]  ;;  %v7369_v16 = vld [vmem:[#allocation25_spill] sm:$0xff] }
 0x1d9   : > { %2921 = vmatpush.msrb.mxu1 %v4542_v49  ;;  %3203 = vmatpush.msra.mxu2 %v6369_v17  ;;  %v4549_v17 = vld [vmem:[#allocation2 + $0x440] sm:$0xff]  ;;  %v4558_v49 = vld [vmem:[#allocation2 + $0x518] sm:$0xff] }
 0x1da   : > { %3061 = vmatpush.msrb.mxu0 %v4543_v56  ;;  %2994 = vmatpush.msrb.mxu3 %v7362_v55  ;;  %v7370_v56 = vld [vmem:[#allocation29_spill] sm:$0xff] }
 0x1db   : > { %2922 = vmatpush.msrb.mxu1 %v4544_v22  ;;  %3204 = vmatpush.msra.mxu2 %v6379_v27  ;;  %v4550_v27 = vld [vmem:[#allocation2 + $0x538] sm:$0xff]  ;;  %v4560_v55 = vld [vmem:[#allocation2 + $0x510] sm:$0xff]  ;;  %v7371_v22 = vld [vmem:[#allocation35_spill] sm:$0xff] }
 0x1dc   : > { %3062 = vmatpush.msrb.mxu0 %v4545_v25  ;;  %2995 = vmatpush.msrb.mxu3 %v7363_v3  ;;  %v4562_v25 = vld [vmem:[#allocation2 + $0x508] sm:$0xff]  ;;  %v7372_v3 = vld [vmem:[#allocation41_spill] sm:$0xff] }
 0x1dd   : > { %2923 = vmatpush.msrb.mxu1 %v4546_v20  ;;  %3205 = vmatpush.msra.mxu2 %v6389_v9  ;;  %v7366_v9 = vld [vmem:[#allocation16_spill] sm:$0xff]  ;;  %v4564_v20 = vld [vmem:[#allocation2 + $0x500] sm:$0xff] }
 0x1de   : > { %3063 = vmatpush.msrb.mxu0 %v4547_v50  ;;  %2996 = vmatpush.msrb.mxu3 %v7364_v7  ;;  %v4567_v50 = vld [vmem:[#allocation2 + $0x578] sm:$0xff] }
 0x1df   : > { %2924 = vmatpush.msrb.mxu1 %v4548_v1  ;;  %3206 = vmatpush.msra.mxu2 %v6399_v24  ;;  %v7367_v24 = vld [vmem:[#allocation19_spill] sm:$0xff] }
 0x1e0   : > { %3064 = vmatpush.msrb.mxu0 %v4549_v17  ;;  %2925 = vmatmul.f32.vlgmr.msrb.gmra.mxu1 %v6040_v8  ;;  %v2368_v17 = vpop.f32.mrf.mxu2 }
 0x1e1   : > { %2997 = vmatpush.msrb.mxu3 %v7365_v26  ;;  %3017 = vmatpush.msra.mxu1 %v4550_v27  ;;  %v2388_v26 = vpop.f32.mrf.mxu3  ;;  %v4570_v27 = vld [vmem:[#allocation2 + $0x1e8] sm:$0xff] }
 0x1e2   : > { %4432 = vmatmul.msk.f32.vlgmr.msrb.gmra.mxu0 %vm2304_vm5, %v6230_v31  ;;  %3207 = vmatpush.msra.mxu2 %v6411_v36  ;;  %v4556_v36 = vld [vmem:[#allocation2 + $0x520] sm:$0xff] }
 0x1e3   : > { %3110 = vmatpush.msra.mxu0 %v4551_v44  ;;  %2998 = vmatpush.msrb.mxu3 %v7366_v9  ;;  %v4571_v44 = vld [vmem:[#allocation2 + $0x568] sm:$0xff]  ;;  %v4573_v9 = vld [vmem:[#allocation2 + $0x560] sm:$0xff] }
 0x1e4   : > { %3018 = vmatpush.msra.mxu1 %v4552_v38  ;;  %3208 = vmatmul.f32.vlgmr.msra.gmra.mxu2 %v6301_v46  ;;  %v4574_v38 = vld [vmem:[#allocation2 + $0x1d8] sm:$0xff] }
 0x1e5   : > { %3111 = vmatpush.msra.mxu0 %v4553_v34  ;;  %3307 = vmatpush.msrb.mxu2 %v6425_v0  ;;  %v4559_v0 = vld [vmem:[#allocation2 + $0x598] sm:$0xff] }
 0x1e6   : > { %2999 = vmatpush.msrb.mxu3 %v7367_v24  ;;  %3019 = vmatpush.msra.mxu1 %v4554_v58  ;;  %v4575_v34 = vld [vmem:[#allocation2 + $0x558] sm:$0xff]  ;;  %v4577_v24 = vld [vmem:[#allocation2 + $0x550] sm:$0xff]  ;;  %v4579_v58 = vld [vmem:[#allocation2 + $0x548] sm:$0xff] }
 0x1e7   : > { %3112 = vmatpush.msra.mxu0 %v4555_v47  ;;  %3308 = vmatpush.msrb.mxu2 %v6435_v12  ;;  %v4561_v12 = vld [vmem:[#allocation2 + $0x590] sm:$0xff]  ;;  %v4580_v47 = vld [vmem:[#allocation2 + $0x1c0] sm:$0xff] }
 0x1e8   : > { %3000 = vmatpush.msrb.mxu3 %v7368_v15  ;;  %3020 = vmatpush.msra.mxu1 %v4556_v36  ;;  %v7373_v15 = vld [vmem:[#allocation18_spill] sm:$0xff]  ;;  %v7374_v36 = vld [vmem:[#allocation21_spill] sm:$0xff] }
 0x1e9   : > { %3113 = vmatpush.msra.mxu0 %v4557_v40  ;;  %3309 = vmatpush.msrb.mxu2 %v6445_v35  ;;  %v4563_v35 = vld [vmem:[#allocation2 + $0x588] sm:$0xff]  ;;  %v4586_v40 = vld [vmem:[#allocation2 + $0x6a0] sm:$0xff] }
 0x1ea   : > { %3001 = vmatpush.msrb.mxu3 %v7369_v16  ;;  %3021 = vmatpush.msra.mxu1 %v4558_v49  ;;  %v7376_v16 = vld [vmem:[#allocation27_spill] sm:$0xff] }
 0x1eb   : > { %3114 = vmatpush.msra.mxu0 %v4559_v0  ;;  %3310 = vmatpush.msrb.mxu2 %v6455_v2  ;;  %v4565_v2 = vld [vmem:[#allocation2 + $0x580] sm:$0xff]  ;;  %v7378_v0 = vld [vmem:[#allocation40_spill] sm:$0xff] }
 0x1ec   : > { %3002 = vmatpush.msrb.mxu3 %v7370_v56  ;;  %3022 = vmatpush.msra.mxu1 %v4560_v55  ;;  %v7377_v49 = vld [vmem:[#allocation31_spill] sm:$0xff]  ;;  %v7379_v56 = vld [vmem:[#allocation28_spill] sm:$0xff]  ;;  %v7380_v55 = vld [vmem:[#allocation62_spill] sm:$0xff] }
 0x1ed   : > { %3115 = vmatpush.msra.mxu0 %v4561_v12  ;;  %3311 = vmatpush.msrb.mxu2 %v6465_v59  ;;  %v4566_v59 = vld [vmem:[#allocation2 + $0x1f8] sm:$0xff]  ;;  %v7382_v12 = vld [vmem:[#allocation64_spill] sm:$0xff] }
 0x1ee   : > { %3003 = vmatpush.msrb.mxu3 %v7371_v22  ;;  %3023 = vmatpush.msra.mxu1 %v4562_v25  ;;  %v7383_v22 = vld [vmem:[#allocation54_spill] sm:$0xff] }
 0x1ef   : > { %3116 = vmatpush.msra.mxu0 %v4563_v35  ;;  %3312 = vmatpush.msrb.mxu2 %v6475_v42  ;;  %v3234_v42 = vrot.slane %v6230_v31, 2  ;;  %v7384_v25 = vld [vmem:[#allocation66_spill] sm:$0xff]  ;;  %v7385_v35 = vld [vmem:[#allocation55_spill] sm:$0xff] }
 0x1f0   : > { %3004 = vmatpush.msrb.mxu3 %v7372_v3  ;;  %3024 = vmatpush.msra.mxu1 %v4564_v20  ;;  %v7386_v3 = vld [vmem:[#allocation68_spill] sm:$0xff] }
 0x1f1   : > { %3117 = vmatpush.msra.mxu0 %v4565_v2  ;;  %3313 = vmatpush.msrb.mxu2 %v6485_v6  ;;  %v7387_v20 = vld [vmem:[#allocation56_spill] sm:$0xff]  ;;  %v4594_v2 = vld [vmem:[#allocation2 + $0x720] sm:$0xff] }
 0x1f2   : > { %3005 = vmatmul.f32.vlgmr.msrb.gmra.mxu3 %v6040_v8  ;;  %4431 = vmatmul.msk.f32.vlgmr.msra.gmra.mxu1 %vm2304_vm5, %v6332_v10  ;;  %v4568_v8 = vld [vmem:[#allocation2 + $0x1f0] sm:$0xff] }
 0x1f3   : > { %3097 = vmatpush.msra.mxu3 %v6232_v48  ;;  %3069 = vmatpush.msrb.mxu1 %v4566_v59  ;;  %v2325_v7 = vpop.f32.mrf.mxu0  ;;  %v4569_v48 = vld [vmem:[#allocation2 + $0x570] sm:$0xff] }
 0x1f4   : > { %3118 = vmatpush.msra.mxu0 %v4567_v50  ;;  %v2345_v1 = vpop.f32.mrf.mxu1  ;;  %3314 = vmatpush.msrb.mxu2 %v6495_v29  ;;  %v4572_v29 = vld [vmem:[#allocation2 + $0x1e0] sm:$0xff]  ;;  %v7388_v59 = vld [vmem:[#allocation69_spill] sm:$0xff] }
 0x1f5   : > { %3098 = vmatpush.msra.mxu3 %v6241_v28  ;;  %v2346_v6 = vadd.f32 %v2345_v1, %v2325_v7  ;;  %3070 = vmatpush.msrb.mxu1 %v4568_v8  ;;  %v7389_v7 = vld [vmem:[#allocation57_spill] sm:$0xff] }
 0x1f6   : > { %4438 = vmatmul.msk.f32.vlgmr.msrb.gmra.mxu2 %vm2304_vm5, %v3234_v42  ;;  %3119 = vmatpush.msra.mxu0 %v4569_v48  ;;  %v4595_v1 = vld [vmem:[#allocation2 + $0x718] sm:$0xff]  ;;  %v4596_v8 = vld [vmem:[#allocation2 + $0x710] sm:$0xff]  ;;  %v7392_v48 = vld [vmem:[#allocation71_spill] sm:$0xff] }
 0x1f7   : > { %3099 = vmatpush.msra.mxu3 %v6255_v62  ;;  %v2369_v10 = vadd.f32 %v2368_v17, %v2346_v6  ;;  %3071 = vmatpush.msrb.mxu1 %v4570_v27  ;;  %v4576_v62 = vld [vmem:[#allocation2 + $0x1d0] sm:$0xff]  ;;  %v7390_v6 = vld [vmem:[#allocation70_spill] sm:$0xff] }
 0x1f8   : > { %3120 = vmatpush.msra.mxu0 %v4571_v44  ;;  %v7391_v17 = vld [vmem:[#allocation58_spill] sm:$0xff]  ;;  %v7394_v27 = vld [vmem:[#allocation72_spill] sm:$0xff] }
 0x1f9   : > { %3100 = vmatpush.msra.mxu3 %v6266_v33  ;;  %v6635_v28 = vadd.f32 %v2388_v26, %v2369_v10  ;;  %3072 = vmatpush.msrb.mxu1 %v4572_v29  ;;  %v4578_v33 = vld [vmem:[#allocation2 + $0x1c8] sm:$0xff]  ;;  %v4598_v29 = vld [vmem:[#allocation2 + $0x700] sm:$0xff] }
 0x1fa   : > { %3121 = vmatpush.msra.mxu0 %v4573_v9  ;;  %v2453_v50 = vpop.f32.mrf.mxu3  ;;  %v7393_v10 = vld [vmem:[#allocation59_spill] sm:$0xff]  ;;  %v7395_v44 = vld [vmem:[#allocation60_spill] sm:$0xff]  ;;  %v2493_v9 = vpop.f32.mrf.mxu2 }
 0x1fb   : > { %3101 = vmatpush.msra.mxu3 %v6280_v4  ;;  %3073 = vmatpush.msrb.mxu1 %v4574_v38  ;;  %v4581_v4 = vld [vmem:[#allocation2 + $0x540] sm:$0xff]  ;;  %v4597_v26 = vld [vmem:[#allocation2 + $0x708] sm:$0xff]  ;;  %v7396_v38 = vld [vmem:[#allocation61_spill] sm:$0xff] }
 0x1fc   : > { %3122 = vmatpush.msra.mxu0 %v4575_v34  ;;  %v7397_v34 = vld [vmem:[#allocation73_spill] sm:$0xff] }
 0x1fd   : > { %3102 = vmatpush.msra.mxu3 %v6290_v60  ;;  %3074 = vmatpush.msrb.mxu1 %v4576_v62  ;;  %v4582_v60 = vld [vmem:[#allocation2 + $0x1b8] sm:$0xff] }
 0x1fe   : > { %3123 = vmatpush.msra.mxu0 %v4577_v24  ;;  %v4599_v62 = vld [vmem:[#allocation2 + $0x6f8] sm:$0xff]  ;;  %v2433_v24 = vpop.f32.mrf.mxu1 }
 0x1ff   : > { %3103 = vmatpush.msra.mxu3 %v6303_v57  ;;  %3075 = vmatpush.msrb.mxu1 %v4578_v33  ;;  %v4583_v57 = vld [vmem:[#allocation2 + $0x6b8] sm:$0xff] }
 0x200   : > { %3124 = vmatpush.msra.mxu0 %v4579_v58  ;;  %v7398_v58 = vld [vmem:[#allocation63_spill] sm:$0xff] }
 0x201   : > { %3104 = vmatpush.msra.mxu3 %v6313_v32  ;;  %3076 = vmatpush.msrb.mxu1 %v4580_v47  ;;  %v4584_v32 = vld [vmem:[#allocation2 + $0x6b0] sm:$0xff]  ;;  %v7399_v47 = vld [vmem:[#allocation74_spill] sm:$0xff] }
 0x202   : > { %4433 = vmatmul.msk.f32.vlgmr.msra.gmra.mxu3 %vm2304_vm5, %v6244_v5  ;;  %3125 = vmatpush.msra.mxu0 %v4581_v4  ;;  %v4585_v5 = vld [vmem:[#allocation2 + $0x6a8] sm:$0xff] }
 0x203   : > { %3151 = vmatpush.msrb.mxu3 %v6323_v11  ;;  %3077 = vmatpush.msrb.mxu1 %v4582_v60  ;;  %v7375_v11 = vld [vmem:[#allocation24_spill] sm:$0xff]  ;;  %v7400_v4 = vld [vmem:[#allocation51_spill] sm:$0xff] }
 0x204   : > { %3126 = vmatmul.f32.vlgmr.msra.gmra.mxu0 %v6423_v30  ;;  %v2544_v33 = vpop.f32.mrf.mxu3  ;;  %v7403_v60 = vld [vmem:[#allocation67_spill] sm:$0xff] }
 0x205   : > { %3220 = vmatpush.msrb.mxu0 %v4583_v57  ;;  %3152 = vmatpush.msrb.mxu3 %v6338_v41  ;;  %v4587_v41 = vld [vmem:[#allocation2 + $0x698] sm:$0xff]  ;;  %v7404_v57 = vld [vmem:[#allocation32_spill] sm:$0xff] }
 0x206   : > { %3078 = vmatpush.msrb.mxu1 %v7373_v15  ;;  %v2610_v15 = vpop.f32.mrf.mxu2 }
 0x207   : > { %3221 = vmatpush.msrb.mxu0 %v4584_v32  ;;  %3153 = vmatpush.msrb.mxu3 %v6352_v21  ;;  %v4588_v21 = vld [vmem:[#allocation2 + $0x690] sm:$0xff]  ;;  %v2473_v32 = vpop.f32.mrf.mxu0 }
 0x208   : > { %3079 = vmatpush.msrb.mxu1 %v7374_v36  ;;  %v7405_v36 = vld [vmem:[#allocation17_spill] sm:$0xff] }
 0x209   : > { %3222 = vmatpush.msrb.mxu0 %v4585_v5  ;;  %3154 = vmatpush.msrb.mxu3 %v6363_v13  ;;  %v4589_v13 = vld [vmem:[#allocation2 + $0x688] sm:$0xff]  ;;  %v7406_v5 = vld [vmem:[#allocation34_spill] sm:$0xff] }
 0x20a   : > { %3080 = vmatpush.msrb.mxu1 %v7375_v11  ;;  %v7407_v11 = vld [vmem:[#allocation20_spill] sm:$0xff] }
 0x20b   : > { %3223 = vmatpush.msrb.mxu0 %v4586_v40  ;;  %3155 = vmatpush.msrb.mxu3 %v6373_v61  ;;  %v4590_v61 = vld [vmem:[#allocation2 + $0x680] sm:$0xff]  ;;  %v2564_v40 = vpop.f32.mrf.mxu1 }
 0x20c   : > { %3081 = vmatpush.msrb.mxu1 %v7376_v16  ;;  %v2565_v31 = vadd.f32 %v2564_v40, %v2544_v33  ;;  %v3443_v33 = vld [vmem:[#allocation5 + $0x388] sm:$0xff]  ;;  %v3433_v40 = vld [vmem:[#allocation5 + $0x338] sm:$0xff] }
 0x20d   : > { %3224 = vmatpush.msrb.mxu0 %v4587_v41  ;;  %3156 = vmatpush.msrb.mxu3 %v6383_v43  ;;  %v7381_v43 = vld [vmem:[#allocation53_spill] sm:$0xff]  ;;  %v7409_v41 = vld [vmem:[#allocation23_spill] sm:$0xff] }
 0x20e   : > { %3082 = vmatpush.msrb.mxu1 %v7377_v49  ;;  %v2630_v16 = vpop.f32.mrf.mxu3  ;;  %v7411_v49 = vld [vmem:[#allocation26_spill] sm:$0xff] }
 0x20f   : > { %3225 = vmatpush.msrb.mxu0 %v4588_v21  ;;  %3157 = vmatpush.msrb.mxu3 %v6393_v39  ;;  %v4591_v39 = vld [vmem:[#allocation2 + $0x738] sm:$0xff]  ;;  %v2768_v21 = vpop.f32.mrf.mxu2 }
 0x210   : > { %3083 = vmatpush.msrb.mxu1 %v7378_v0 }
 0x211   : > { %3226 = vmatpush.msrb.mxu0 %v4589_v13  ;;  %3158 = vmatpush.msrb.mxu3 %v6403_v45  ;;  %v4592_v45 = vld [vmem:[#allocation2 + $0x730] sm:$0xff]  ;;  %v7413_v13 = vld [vmem:[#allocation30_spill] sm:$0xff] }
 0x212   : > { %3084 = vmatpush.msrb.mxu1 %v7379_v56  ;;  %v7414_v56 = vld [vmem:[#allocation36_spill] sm:$0xff] }
 0x213   : > { %3227 = vmatpush.msrb.mxu0 %v4590_v61  ;;  %3085 = vmatmul.f32.vlgmr.msrb.gmra.mxu1 %v6423_v30  ;;  %v4593_v30 = vld [vmem:[#allocation2 + $0x728] sm:$0xff] }
 0x214   : > { %3159 = vmatpush.msrb.mxu3 %v7380_v55  ;;  %3179 = vmatpush.msra.mxu1 %v7381_v43  ;;  %v7415_v43 = vld [vmem:[#allocation42_spill] sm:$0xff] }
 0x215   : > { %4436 = vmatmul.msk.f32.vlgmr.msrb.gmra.mxu0 %vm2304_vm5, %v6508_v18 }
 0x216   : > { %3279 = vmatpush.msra.mxu0 %v4591_v39  ;;  %3160 = vmatpush.msrb.mxu3 %v7382_v12  ;;  %v2631_v39 = vadd.f32 %v2630_v16, %v2610_v15  ;;  %v7417_v12 = vld [vmem:[#allocation76_spill] sm:$0xff]  ;;  %v3426_v16 = vld [vmem:[#allocation5 + $0x300] sm:$0xff] }
 0x217   : > { %3180 = vmatpush.msra.mxu1 %v7383_v22  ;;  %v3435_v15 = vld [vmem:[#allocation5 + $0x348] sm:$0xff] }
 0x218   : > { %3280 = vmatpush.msra.mxu0 %v4592_v45  ;;  %3161 = vmatpush.msrb.mxu3 %v7384_v25 }
 0x219   : > { %3181 = vmatpush.msra.mxu1 %v7385_v35  ;;  %v2885_v35 = vpop.f32.mrf.mxu2 }
 0x21a   : > { %3281 = vmatpush.msra.mxu0 %v4593_v30  ;;  %3162 = vmatpush.msrb.mxu3 %v7386_v3  ;;  %v2748_v0 = vpop.f32.mrf.mxu0  ;;  %v2567_v30 = vadd.f32 %v2565_v31, %v6635_v28  ;;  %v3454_v28 = vld [vmem:[#allocation5 + $0x3e0] sm:$0xff] }
 0x21b   : > { %3182 = vmatpush.msra.mxu1 %v7387_v20  ;;  %v2769_v45 = vadd.f32 %v2768_v21, %v2748_v0  ;;  %v3424_v21 = vld [vmem:[#allocation5 + $0x2f0] sm:$0xff]  ;;  %v3425_v0 = vld [vmem:[#allocation5 + $0x2f8] sm:$0xff]  ;;  %v3410_v31 = vld [vmem:[#allocation5 + $0x280] sm:$0xff] }
 0x21c   : > { %3282 = vmatpush.msra.mxu0 %v4594_v2  ;;  %3163 = vmatpush.msrb.mxu3 %v7388_v59 }
 0x21d   : > { %3183 = vmatpush.msra.mxu1 %v7389_v7 }
 0x21e   : > { %3283 = vmatpush.msra.mxu0 %v4595_v1  ;;  %3164 = vmatpush.msrb.mxu3 %v7390_v6  ;;  %v2702_v61 = vpop.f32.mrf.mxu3  ;;  %v7418_v6 = vld [vmem:[#allocation77_spill] sm:$0xff] }
 0x21f   : > { %3184 = vmatpush.msra.mxu1 %v7391_v17 }
 0x220   : > { %3284 = vmatpush.msra.mxu0 %v4596_v8  ;;  %3165 = vmatpush.msrb.mxu3 %v7392_v48  ;;  %v3455_v48 = vld [vmem:[#allocation5 + $0x3e8] sm:$0xff] }
 0x221   : > { %3185 = vmatpush.msra.mxu1 %v7393_v10  ;;  %v3456_v10 = vld [vmem:[#allocation5 + $0x3f0] sm:$0xff] }
 0x222   : > { %3285 = vmatpush.msra.mxu0 %v4597_v26  ;;  %3166 = vmatpush.msrb.mxu3 %v7394_v27  ;;  %v3450_v26 = vld [vmem:[#allocation5 + $0x3c0] sm:$0xff]  ;;  %v3451_v27 = vld [vmem:[#allocation5 + $0x3c8] sm:$0xff] }
 0x223   : > { %3186 = vmatpush.msra.mxu1 %v7395_v44  ;;  %3167 = vmatmul.f32.vlgmr.msrb.gmra.mxu3 %v6301_v46  ;;  %v7401_v46 = vld [vmem:[#allocation65_spill] sm:$0xff] }
 0x224   : > { %3286 = vmatpush.msra.mxu0 %v4598_v29  ;;  %4435 = vmatmul.msk.f32.vlgmr.msra.gmra.mxu1 %vm2304_vm5, %v6508_v18  ;;  %v7402_v18 = vld [vmem:[#allocation14_spill] sm:$0xff]  ;;  %v3452_v44 = vld [vmem:[#allocation5 + $0x3d0] sm:$0xff] }
 0x225   : > { %3238 = vmatpush.msrb.mxu1 %v7396_v38  ;;  %3266 = vmatpush.msra.mxu3 %v7397_v34  ;;  %v3453_v29 = vld [vmem:[#allocation5 + $0x3d8] sm:$0xff]  ;;  %v3447_v38 = vld [vmem:[#allocation5 + $0x3a8] sm:$0xff]  ;;  %v3448_v34 = vld [vmem:[#allocation5 + $0x3b0] sm:$0xff] }
 0x226   : > { %3287 = vmatpush.msra.mxu0 %v4599_v62  ;;  %3501 = vmatpush.msra.mxu2 %v3456_v10  ;;  %v3449_v62 = vld [vmem:[#allocation5 + $0x3b8] sm:$0xff] }
 0x227   : > { %3239 = vmatpush.msrb.mxu1 %v7398_v58  ;;  %3267 = vmatpush.msra.mxu3 %v7399_v47  ;;  %v3444_v58 = vld [vmem:[#allocation5 + $0x390] sm:$0xff]  ;;  %v3445_v47 = vld [vmem:[#allocation5 + $0x398] sm:$0xff] }
 0x228   : > { %3288 = vmatpush.msra.mxu0 %v7400_v4  ;;  %3502 = vmatpush.msra.mxu2 %v3452_v44  ;;  %v3438_v4 = vld [vmem:[#allocation5 + $0x360] sm:$0xff]  ;;  %v3397_v10 = vld [vmem:[#allocation5 + $0x218] sm:$0xff] }
 0x229   : > { %3240 = vmatpush.msrb.mxu1 %v7401_v46  ;;  %3268 = vmatpush.msra.mxu3 %v6524_v53  ;;  %v7408_v53 = vld [vmem:[#allocation33_spill] sm:$0xff]  ;;  %v2682_v55 = vpop.f32.mrf.mxu1  ;;  %v3439_v46 = vld [vmem:[#allocation5 + $0x368] sm:$0xff] }
 0x22a   : > { %3289 = vmatpush.msra.mxu0 %v7402_v18  ;;  %v2703_v25 = vadd.f32 %v2702_v61, %v2682_v55  ;;  %3503 = vmatpush.msra.mxu2 %v3448_v34  ;;  %v3440_v18 = vld [vmem:[#allocation5 + $0x370] sm:$0xff]  ;;  %v3421_v61 = vld [vmem:[#allocation5 + $0x2d8] sm:$0xff]  ;;  %v3414_v55 = vld [vmem:[#allocation5 + $0x2a0] sm:$0xff] }
 0x22b   : > { %3241 = vmatpush.msrb.mxu1 %v7403_v60  ;;  %3269 = vmatpush.msra.mxu3 %v6531_v37  ;;  %v7410_v37 = vld [vmem:[#allocation43_spill] sm:$0xff]  ;;  %v3441_v60 = vld [vmem:[#allocation5 + $0x378] sm:$0xff] }
 0x22c   : > { %3290 = vmatpush.msra.mxu0 %v7404_v57  ;;  %v2705_v7 = vadd.f32 %v2703_v25, %v2567_v30  ;;  %3504 = vmatpush.msra.mxu2 %v3444_v58  ;;  %v3434_v57 = vld [vmem:[#allocation5 + $0x340] sm:$0xff]  ;;  %v3408_v25 = vld [vmem:[#allocation5 + $0x270] sm:$0xff]  ;;  %v3392_v44 = vld [vmem:[#allocation5 + $0x1f8] sm:$0xff] }
 0x22d   : > { %3242 = vmatpush.msrb.mxu1 %v7405_v36  ;;  %3270 = vmatpush.msra.mxu3 %v6538_v14  ;;  %v3233_v14 = vrot.slane %v6228_v52, 2  ;;  %v7416_v52 = vld [vmem:[#allocation75_spill] sm:$0xff]  ;;  %v3437_v36 = vld [vmem:[#allocation5 + $0x358] sm:$0xff] }
 0x22e   : > { %3291 = vmatpush.msra.mxu0 %v7406_v5  ;;  %3505 = vmatpush.msra.mxu2 %v3440_v18  ;;  %v3430_v5 = vld [vmem:[#allocation5 + $0x320] sm:$0xff]  ;;  %v3388_v34 = vld [vmem:[#allocation5 + $0x1d8] sm:$0xff] }
 0x22f   : > { %3243 = vmatpush.msrb.mxu1 %v7407_v11  ;;  %3271 = vmatpush.msra.mxu3 %v6545_v51  ;;  %v7412_v51 = vld [vmem:[#allocation52_spill] sm:$0xff]  ;;  %v3402_v30 = vld [vmem:[#allocation5 + $0x240] sm:$0xff]  ;;  %v3384_v58 = vld [vmem:[#allocation5 + $0x1b8] sm:$0xff] }
 0x230   : > { %3292 = vmatpush.msra.mxu0 %v7408_v53  ;;  %v3431_v11 = vld [vmem:[#allocation5 + $0x328] sm:$0xff]  ;;  %v3432_v53 = vld [vmem:[#allocation5 + $0x330] sm:$0xff]  ;;  %v3380_v18 = vld [vmem:[#allocation5 + $0x198] sm:$0xff] }
 0x231   : > { %3244 = vmatpush.msrb.mxu1 %v7409_v41  ;;  %3272 = vmatpush.msra.mxu3 %v6552_v23  ;;  %v2454_v23 = vadd.f32 %v2453_v50, %v2433_v24  ;;  %v3442_v24 = vld [vmem:[#allocation5 + $0x380] sm:$0xff]  ;;  %v3427_v41 = vld [vmem:[#allocation5 + $0x308] sm:$0xff] }
 0x232   : > { %3293 = vmatpush.msra.mxu0 %v7410_v37  ;;  %v3428_v37 = vld [vmem:[#allocation5 + $0x310] sm:$0xff] }
 0x233   : > { %3245 = vmatpush.msrb.mxu1 %v7411_v49  ;;  %3273 = vmatpush.msra.mxu3 %v6559_v63  ;;  %v2474_v63 = vadd.f32 %v2473_v32, %v2454_v23  ;;  %v3436_v32 = vld [vmem:[#allocation5 + $0x350] sm:$0xff]  ;;  %v3429_v49 = vld [vmem:[#allocation5 + $0x318] sm:$0xff]  ;;  %v3419_v23 = vld [vmem:[#allocation5 + $0x2c8] sm:$0xff] }
 0x234   : > { %4437 = vmatmul.msk.f32.vlgmr.msra.gmra.mxu3 %vm2304_vm5, %v3234_v42  ;;  %3294 = vmatpush.msra.mxu0 %v7412_v51  ;;  %v2905_v42 = vpop.f32.mrf.mxu0  ;;  %v3423_v51 = vld [vmem:[#allocation5 + $0x2e8] sm:$0xff] }
 0x235   : > { %3246 = vmatpush.msrb.mxu1 %v7413_v13  ;;  %3295 = vmatmul.f32.vlgmr.msra.gmra.mxu0 %v3233_v14  ;;  %v2494_v22 = vadd.f32 %v2493_v9, %v2474_v63  ;;  %v2906_v20 = vadd.f32 %v2905_v42, %v2885_v35  ;;  %v3446_v9 = vld [vmem:[#allocation5 + $0x3a0] sm:$0xff]  ;;  %v3416_v63 = vld [vmem:[#allocation5 + $0x2b0] sm:$0xff]  ;;  %v3409_v35 = vld [vmem:[#allocation5 + $0x278] sm:$0xff] }
 0x236   : > { %3461 = vmatpush.msrb.mxu3 %v3454_v28  ;;  %3506 = vmatpush.msra.mxu2 %v3436_v32  ;;  %v3418_v13 = vld [vmem:[#allocation5 + $0x2c0] sm:$0xff]  ;;  %v3412_v42 = vld [vmem:[#allocation5 + $0x290] sm:$0xff]  ;;  %v3395_v28 = vld [vmem:[#allocation5 + $0x208] sm:$0xff] }
 0x237   : > { %3247 = vmatpush.msrb.mxu1 %v7414_v56  ;;  %v2633_v3 = vadd.f32 %v2631_v39, %v2494_v22  ;;  %v3420_v56 = vld [vmem:[#allocation5 + $0x2d0] sm:$0xff]  ;;  %v3411_v39 = vld [vmem:[#allocation5 + $0x288] sm:$0xff]  ;;  %v3406_v22 = vld [vmem:[#allocation5 + $0x260] sm:$0xff] }
 0x238   : > { %3462 = vmatpush.msrb.mxu3 %v3450_v26  ;;  %3507 = vmatpush.msra.mxu2 %v3432_v53  ;;  %v3390_v26 = vld [vmem:[#allocation5 + $0x1e8] sm:$0xff]  ;;  %v3376_v32 = vld [vmem:[#allocation5 + $0x178] sm:$0xff] }
 0x239   : > { %3248 = vmatpush.msrb.mxu1 %v7415_v43  ;;  %v2771_v50 = vadd.f32 %v2769_v45, %v2633_v3  ;;  %v3415_v43 = vld [vmem:[#allocation5 + $0x2a8] sm:$0xff]  ;;  %v3372_v53 = vld [vmem:[#allocation5 + $0x158] sm:$0xff] }
 0x23a   : > { %3463 = vmatpush.msrb.mxu3 %v3446_v9  ;;  %3508 = vmatpush.msra.mxu2 %v3428_v37  ;;  %v3407_v45 = vld [vmem:[#allocation5 + $0x268] sm:$0xff]  ;;  %v3368_v37 = vld [vmem:[#allocation5 + $0x138] sm:$0xff] }
 0x23b   : > { %3249 = vmatpush.msrb.mxu1 %v7416_v52  ;;  %v2839_v2 = vpop.f32.mrf.mxu1  ;;  %v6717_v17 = vadd.f32 %v2906_v20, %v2771_v50  ;;  %v3417_v52 = vld [vmem:[#allocation5 + $0x2b8] sm:$0xff]  ;;  %v3403_v3 = vld [vmem:[#allocation5 + $0x248] sm:$0xff]  ;;  %v3404_v20 = vld [vmem:[#allocation5 + $0x250] sm:$0xff] }
 0x23c   : > { %3464 = vmatpush.msrb.mxu3 %v3442_v24  ;;  %3509 = vmatpush.msra.mxu2 %v3424_v21  ;;  %v3399_v50 = vld [vmem:[#allocation5 + $0x228] sm:$0xff]  ;;  %v3363_v21 = vld [vmem:[#allocation5 + $0x110] sm:$0xff] }
 0x23d   : > { %3250 = vmatpush.msrb.mxu1 %v7417_v12  ;;  %v3413_v12 = vld [vmem:[#allocation5 + $0x298] sm:$0xff]  ;;  %v3386_v9 = vld [vmem:[#allocation5 + $0x1c8] sm:$0xff] }
 0x23e   : > { %3465 = vmatpush.msrb.mxu3 %v3438_v4  ;;  %3510 = vmatpush.msra.mxu2 %v3420_v56  ;;  %v3382_v24 = vld [vmem:[#allocation5 + $0x1a8] sm:$0xff] }
 0x23f   : > { %3251 = vmatpush.msrb.mxu1 %v6541_v54  ;;  %v3378_v4 = vld [vmem:[#allocation5 + $0x188] sm:$0xff] }
 0x240   : > { %3466 = vmatpush.msrb.mxu3 %v3434_v57  ;;  %3511 = vmatpush.msra.mxu2 %v3416_v63  ;;  %v3374_v57 = vld [vmem:[#allocation5 + $0x168] sm:$0xff]  ;;  %v3360_v63 = vld [vmem:[#allocation5 + $0xf8] sm:$0xff] }
 0x241   : > { %3252 = vmatpush.msrb.mxu1 %v6548_v19  ;;  %v2819_v59 = vpop.f32.mrf.mxu3  ;;  %v3457_v19 = vld [vmem:[#allocation5 + $0x3f8] sm:$0xff]  ;;  %v3358_v56 = vld [vmem:[#allocation5 + $0xe8] sm:$0xff] }
 0x242   : > { %v2840_v1 = vadd.f32 %v2839_v2, %v2819_v59  ;;  %3521 = vmatpush.msrb.mxu0 %v3457_v19  ;;  %3467 = vmatpush.msrb.mxu3 %v3430_v5  ;;  %v3405_v2 = vld [vmem:[#allocation5 + $0x258] sm:$0xff]  ;;  %v3398_v59 = vld [vmem:[#allocation5 + $0x220] sm:$0xff]  ;;  %v3370_v5 = vld [vmem:[#allocation5 + $0x148] sm:$0xff] }
 0x243   : > { %3253 = vmatpush.msrb.mxu1 %v7418_v6  ;;  %3512 = vmatpush.msra.mxu2 %v3412_v42  ;;  %v3394_v6 = vld [vmem:[#allocation5 + $0x200] sm:$0xff]  ;;  %v3356_v42 = vld [vmem:[#allocation5 + $0xd8] sm:$0xff] }
 0x244   : > { %3254 = vmatmul.f32.vlgmr.msrb.gmra.mxu1 %v3233_v14  ;;  %v6719_v8 = vadd.f32 %v2840_v1, %v2705_v7  ;;  %3522 = vmatpush.msrb.mxu0 %v3453_v29  ;;  %v3422_v14 = vld [vmem:[#allocation5 + $0x2e0] sm:$0xff]  ;;  %v3400_v7 = vld [vmem:[#allocation5 + $0x230] sm:$0xff]  ;;  %v3401_v1 = vld [vmem:[#allocation5 + $0x238] sm:$0xff] }
 0x245   : > { %3481 = vmatpush.msra.mxu1 %v3455_v48  ;;  %3468 = vmatpush.msrb.mxu3 %v3426_v16  ;;  %v3396_v48 = vld [vmem:[#allocation5 + $0x210] sm:$0xff]  ;;  %v3389_v19 = vld [vmem:[#allocation5 + $0x1e0] sm:$0xff]  ;;  %v3366_v16 = vld [vmem:[#allocation5 + $0x128] sm:$0xff] }
 0x246   : > { %v3320_v54 = vmax.f32 %v6719_v8, %v6717_v17  ;;  %3523 = vmatpush.msrb.mxu0 %v3449_v62  ;;  %3513 = vmatpush.msra.mxu2 %v3408_v25  ;;  %v3385_v29 = vld [vmem:[#allocation5 + $0x1c0] sm:$0xff]  ;;  %v3681_v17 = vld [vmem:[#allocation5 + $0x5d8] sm:$0xff] }
 0x247   : > { %3482 = vmatpush.msra.mxu1 %v3451_v27  ;;  %3469 = vmatpush.msrb.mxu3 %v3422_v14  ;;  %v3391_v27 = vld [vmem:[#allocation5 + $0x1f0] sm:$0xff]  ;;  %v3381_v62 = vld [vmem:[#allocation5 + $0x1a0] sm:$0xff] }
 0x248   : > { %3524 = vmatpush.msrb.mxu0 %v3445_v47  ;;  %3514 = vmatpush.msra.mxu2 %v3404_v20  ;;  %v3377_v47 = vld [vmem:[#allocation5 + $0x180] sm:$0xff]  ;;  %v3347_v20 = vld [vmem:[#allocation5 + $0x90] sm:$0xff] }
 0x249   : > { %3483 = vmatpush.msra.mxu1 %v3447_v38  ;;  %3470 = vmatpush.msrb.mxu3 %v3418_v13  ;;  %v3387_v38 = vld [vmem:[#allocation5 + $0x1d0] sm:$0xff]  ;;  %v3361_v14 = vld [vmem:[#allocation5 + $0x100] sm:$0xff]  ;;  %v6725_v13 = vpop.f32.mrf.mxu2 }
 0x24a   : > { %3525 = vmatpush.msrb.mxu0 %v3441_v60  ;;  %3515 = vmatpush.msra.mxu2 %v3400_v7  ;;  %v3373_v60 = vld [vmem:[#allocation5 + $0x160] sm:$0xff]  ;;  %v3342_v7 = vld [vmem:[#allocation5 + $0x68] sm:$0xff] }
 0x24b   : > { %3484 = vmatpush.msra.mxu1 %v3443_v33  ;;  %3471 = vmatpush.msrb.mxu3 %v3414_v55  ;;  %v3383_v33 = vld [vmem:[#allocation5 + $0x1b0] sm:$0xff]  ;;  %v3674_v8 = vld [vmem:[#allocation5 + $0x5a0] sm:$0xff] }
 0x24c   : > { %3526 = vmatpush.msrb.mxu0 %v3437_v36  ;;  %3516 = vmatpush.msra.mxu2 %v3396_v48  ;;  %v3369_v36 = vld [vmem:[#allocation5 + $0x140] sm:$0xff]  ;;  %v3344_v48 = vld [vmem:[#allocation5 + $0x78] sm:$0xff] }
 0x24d   : > { %3485 = vmatpush.msra.mxu1 %v3439_v46  ;;  %3472 = vmatpush.msrb.mxu3 %v3410_v31  ;;  %v3379_v46 = vld [vmem:[#allocation5 + $0x190] sm:$0xff]  ;;  %v3354_v31 = vld [vmem:[#allocation5 + $0xc8] sm:$0xff] }
 0x24e   : > { %3527 = vmatpush.msrb.mxu0 %v3433_v40  ;;  %3581 = vmatpush.msrb.mxu2 %v3391_v27  ;;  %v3365_v40 = vld [vmem:[#allocation5 + $0x120] sm:$0xff]  ;;  %v3340_v27 = vld [vmem:[#allocation5 + $0x58] sm:$0xff] }
 0x24f   : > { %3486 = vmatpush.msra.mxu1 %v3435_v15  ;;  %3473 = vmatpush.msrb.mxu3 %v3406_v22  ;;  %v3375_v15 = vld [vmem:[#allocation5 + $0x170] sm:$0xff]  ;;  %v3350_v22 = vld [vmem:[#allocation5 + $0xa8] sm:$0xff] }
 0x250   : > { %3528 = vmatpush.msrb.mxu0 %v3429_v49  ;;  %3582 = vmatpush.msrb.mxu2 %v3387_v38  ;;  %v6723_v49 = vpop.f32.mrf.mxu0 }
 0x251   : > { %3487 = vmatpush.msra.mxu1 %v3431_v11  ;;  %3474 = vmatpush.msrb.mxu3 %v3402_v30  ;;  %v3371_v11 = vld [vmem:[#allocation5 + $0x150] sm:$0xff]  ;;  %v3345_v30 = vld [vmem:[#allocation5 + $0x80] sm:$0xff] }
 0x252   : > { %3529 = vmatpush.msrb.mxu0 %v3425_v0  ;;  %3583 = vmatpush.msrb.mxu2 %v3383_v33  ;;  %v3364_v0 = vld [vmem:[#allocation5 + $0x118] sm:$0xff]  ;;  %v6727_v55 = vpop.f32.mrf.mxu3  ;;  %v3331_v33 = vld [vmem:[#allocation5 + $0x10] sm:$0xff] }
 0x253   : > { %3488 = vmatpush.msra.mxu1 %v3427_v41  ;;  %3475 = vmatpush.msrb.mxu3 %v3398_v59  ;;  %v3367_v41 = vld [vmem:[#allocation5 + $0x130] sm:$0xff]  ;;  %v3348_v59 = vld [vmem:[#allocation5 + $0x98] sm:$0xff] }
 0x254   : > { %3530 = vmatpush.msrb.mxu0 %v3421_v61  ;;  %3584 = vmatpush.msrb.mxu2 %v3379_v46  ;;  %v3359_v61 = vld [vmem:[#allocation5 + $0xf0] sm:$0xff] }
 0x255   : > { %3489 = vmatpush.msra.mxu1 %v3423_v51  ;;  %3476 = vmatpush.msrb.mxu3 %v3394_v6  ;;  %v3362_v51 = vld [vmem:[#allocation5 + $0x108] sm:$0xff] }
 0x256   : > { %3531 = vmatpush.msrb.mxu0 %v3417_v52  ;;  %3585 = vmatpush.msrb.mxu2 %v3375_v15  ;;  %v3353_v52 = vld [vmem:[#allocation5 + $0xc0] sm:$0xff] }
 0x257   : > { %3490 = vmatpush.msra.mxu1 %v3419_v23  ;;  %3541 = vmatpush.msra.mxu3 %v3389_v19  ;;  %v3357_v23 = vld [vmem:[#allocation5 + $0xe0] sm:$0xff]  ;;  %v3338_v19 = vld [vmem:[#allocation5 + $0x48] sm:$0xff] }
 0x258   : > { %3532 = vmatpush.msrb.mxu0 %v3413_v12  ;;  %3586 = vmatpush.msrb.mxu2 %v3371_v11  ;;  %v3349_v12 = vld [vmem:[#allocation5 + $0xa0] sm:$0xff] }
 0x259   : > { %3491 = vmatpush.msra.mxu1 %v3415_v43  ;;  %3542 = vmatpush.msra.mxu3 %v3385_v29  ;;  %v3334_v29 = vld [vmem:[#allocation5 + $0x28] sm:$0xff] }
 0x25a   : > { %3533 = vmatpush.msrb.mxu0 %v3409_v35  ;;  %3587 = vmatpush.msrb.mxu2 %v3367_v41  ;;  %v3352_v35 = vld [vmem:[#allocation5 + $0xb8] sm:$0xff] }
 0x25b   : > { %3492 = vmatpush.msra.mxu1 %v3411_v39  ;;  %3543 = vmatpush.msra.mxu3 %v3381_v62  ;;  %v3355_v39 = vld [vmem:[#allocation5 + $0xd0] sm:$0xff]  ;;  %v3329_v62 = vld [vmem:[#allocation5] sm:$0xff] }
 0x25c   : > { %3534 = vmatpush.msrb.mxu0 %v3405_v2  ;;  %3588 = vmatpush.msrb.mxu2 %v3363_v21  ;;  %v3046_v2 = vpop.f32.mrf.mxu2 }
 0x25d   : > { %3493 = vmatpush.msra.mxu1 %v3407_v45  ;;  %3544 = vmatpush.msra.mxu3 %v3377_v47  ;;  %v6729_v43 = vpop.f32.mrf.mxu1  ;;  %v3351_v45 = vld [vmem:[#allocation5 + $0xb0] sm:$0xff] }
 0x25e   : > { %3535 = vmatpush.msrb.mxu0 %v3401_v1  ;;  %3589 = vmatpush.msrb.mxu2 %v3359_v61 }
 0x25f   : > { %3494 = vmatpush.msra.mxu1 %v3403_v3  ;;  %3545 = vmatpush.msra.mxu3 %v3373_v60  ;;  %v6731_v25 = vpop.f32.mrf.mxu0  ;;  %v3346_v3 = vld [vmem:[#allocation5 + $0x88] sm:$0xff]  ;;  %v2947_v60 = vadd.f32 %v6727_v55, %v6729_v43 }
 0x260   : > { %3536 = vmatpush.msrb.mxu0 %v3397_v10  ;;  %3590 = vmatpush.msrb.mxu2 %v3355_v39  ;;  %v3337_v10 = vld [vmem:[#allocation5 + $0x40] sm:$0xff] }
 0x261   : > { %3495 = vmatpush.msra.mxu1 %v3399_v50  ;;  %3546 = vmatpush.msra.mxu3 %v3369_v36  ;;  %v3341_v50 = vld [vmem:[#allocation5 + $0x60] sm:$0xff] }
 0x262   : > { %3601 = vmatpush.msra.mxu0 %v3392_v44  ;;  %3591 = vmatpush.msrb.mxu2 %v3351_v45  ;;  %v3333_v44 = vld [vmem:[#allocation5 + $0x20] sm:$0xff] }
 0x263   : > { %3496 = vmatpush.msra.mxu1 %v3395_v28  ;;  %3547 = vmatpush.msra.mxu3 %v3365_v40  ;;  %v3343_v28 = vld [vmem:[#allocation5 + $0x70] sm:$0xff] }
 0x264   : > { %3602 = vmatpush.msra.mxu0 %v3388_v34  ;;  %3592 = vmatpush.msrb.mxu2 %v3347_v20  ;;  %v3336_v34 = vld [vmem:[#allocation5 + $0x38] sm:$0xff]  ;;  %v3147_v47 = vpop.f32.mrf.mxu2  ;;  %v3678_v20 = vld [vmem:[#allocation5 + $0x5c0] sm:$0xff] }
 0x265   : > { %3561 = vmatpush.msrb.mxu1 %v3390_v26  ;;  %3548 = vmatpush.msra.mxu3 %v3361_v14  ;;  %v3339_v26 = vld [vmem:[#allocation5 + $0x50] sm:$0xff] }
 0x266   : > { %3603 = vmatpush.msra.mxu0 %v3384_v58  ;;  %3593 = vmatpush.msrb.mxu2 %v3343_v28  ;;  %v3332_v58 = vld [vmem:[#allocation5 + $0x18] sm:$0xff]  ;;  %v3672_v28 = vld [vmem:[#allocation5 + $0x590] sm:$0xff] }
 0x267   : > { %3562 = vmatpush.msrb.mxu1 %v3386_v9  ;;  %3549 = vmatpush.msra.mxu3 %v3357_v23  ;;  %v3335_v9 = vld [vmem:[#allocation5 + $0x30] sm:$0xff] }
 0x268   : > { %3604 = vmatpush.msra.mxu0 %v3380_v18  ;;  %3594 = vmatpush.msrb.mxu2 %v3339_v26  ;;  %v3668_v26 = vld [vmem:[#allocation5 + $0x570] sm:$0xff] }
 0x269   : > { %3563 = vmatpush.msrb.mxu1 %v3382_v24  ;;  %3550 = vmatpush.msra.mxu3 %v3353_v52  ;;  %v3330_v24 = vld [vmem:[#allocation5 + $0x8] sm:$0xff] }
 0x26a   : > { %3605 = vmatpush.msra.mxu0 %v3376_v32  ;;  %3595 = vmatpush.msrb.mxu2 %v3335_v9  ;;  %v3664_v9 = vld [vmem:[#allocation5 + $0x550] sm:$0xff] }
 0x26b   : > { %3564 = vmatpush.msrb.mxu1 %v3378_v4  ;;  %3551 = vmatpush.msra.mxu3 %v3349_v12 }
 0x26c   : > { %3606 = vmatpush.msra.mxu0 %v3372_v53  ;;  %3596 = vmatpush.msrb.mxu2 %v3331_v33  ;;  %v3209_v15 = vpop.f32.mrf.mxu2  ;;  %v3661_v33 = vld [vmem:[#allocation5 + $0x538] sm:$0xff] }
 0x26d   : > { %3565 = vmatpush.msrb.mxu1 %v3374_v57  ;;  %3552 = vmatpush.msra.mxu3 %v3345_v30  ;;  %v3684_v30 = vld [vmem:[#allocation5 + $0x5f0] sm:$0xff] }
 0x26e   : > { %3607 = vmatpush.msra.mxu0 %v3368_v37 }
 0x26f   : > { %3566 = vmatpush.msrb.mxu1 %v3370_v5  ;;  %v3026_v1 = vpop.f32.mrf.mxu1  ;;  %3553 = vmatpush.msra.mxu3 %v3341_v50  ;;  %v2967_v5 = vadd.f32 %v6723_v49, %v2947_v60  ;;  %v3676_v50 = vld [vmem:[#allocation5 + $0x5b0] sm:$0xff]  ;;  %v3651_v60 = vld [vmem:[#allocation5 + $0x4e8] sm:$0xff] }
 0x270   : > { %3608 = vmatpush.msra.mxu0 %v3364_v0 }
 0x271   : > { %3567 = vmatpush.msrb.mxu1 %v3366_v16  ;;  %3554 = vmatpush.msra.mxu3 %v3337_v10  ;;  %v2987_v37 = vadd.f32 %v6725_v13, %v2967_v5  ;;  %v3666_v10 = vld [vmem:[#allocation5 + $0x560] sm:$0xff]  ;;  %v3648_v5 = vld [vmem:[#allocation5 + $0x4d0] sm:$0xff] }
 0x272   : > { %3609 = vmatpush.msra.mxu0 %v3360_v63 }
 0x273   : > { %3568 = vmatpush.msrb.mxu1 %v3362_v51  ;;  %3555 = vmatpush.msra.mxu3 %v3333_v44  ;;  %v3662_v44 = vld [vmem:[#allocation5 + $0x540] sm:$0xff] }
 0x274   : > { %3610 = vmatpush.msra.mxu0 %v3356_v42  ;;  %v4506_v42 = vld [vmem:[%s6987_s4] ss:$0 sm:$0xff] }
 0x275   : > { %3569 = vmatpush.msrb.mxu1 %v3358_v56  ;;  %v3006_v6 = vpop.f32.mrf.mxu3  ;;  %3556 = vmatpush.msra.mxu3 %v3329_v62  ;;  %v3659_v62 = vld [vmem:[#allocation5 + $0x528] sm:$0xff] }
 0x276   : > { %3611 = vmatpush.msra.mxu0 %v3352_v35  ;;  %v3027_v57 = vadd.f32 %v3026_v1, %v3006_v6  ;;  %v3683_v35 = vld [vmem:[#allocation5 + $0x5e8] sm:$0xff]  ;;  %v3670_v1 = vld [vmem:[#allocation5 + $0x580] sm:$0xff] }
 0x277   : > { %3570 = vmatpush.msrb.mxu1 %v3354_v31  ;;  %v3671_v6 = vld [vmem:[#allocation5 + $0x588] sm:$0xff] }
 0x278   : > { %3612 = vmatpush.msra.mxu0 %v3348_v59  ;;  %v3047_v11 = vadd.f32 %v3046_v2, %v3027_v57  ;;  %v3679_v2 = vld [vmem:[#allocation5 + $0x5c8] sm:$0xff]  ;;  %v3680_v59 = vld [vmem:[#allocation5 + $0x5d0] sm:$0xff] }
 0x279   : > { %3571 = vmatpush.msrb.mxu1 %v3350_v22  ;;  %v3316_v21 = vpop.f32.mrf.mxu2  ;;  %v3652_v57 = vld [vmem:[#allocation5 + $0x4f0] sm:$0xff] }
 0x27a   : > { %3613 = vmatpush.msra.mxu0 %v3344_v48  ;;  %v3067_v41 = vadd.f32 %v6731_v25, %v3047_v11  ;;  %v3682_v25 = vld [vmem:[#allocation5 + $0x5e0] sm:$0xff]  ;;  %v3673_v48 = vld [vmem:[#allocation5 + $0x598] sm:$0xff] }
 0x27b   : > { %3572 = vmatpush.msrb.mxu1 %v3346_v3  ;;  %v3685_v3 = vld [vmem:[#allocation5 + $0x5f8] sm:$0xff] }
 0x27c   : > { %3614 = vmatpush.msra.mxu0 %v3340_v27  ;;  %v3669_v27 = vld [vmem:[#allocation5 + $0x578] sm:$0xff] }
 0x27d   : > { %3573 = vmatpush.msrb.mxu1 %v3342_v7  ;;  %v3677_v7 = vld [vmem:[#allocation5 + $0x5b8] sm:$0xff] }
 0x27e   : > { %3615 = vmatpush.msra.mxu0 %v3336_v34  ;;  %v3658_v34 = vld [vmem:[#allocation5 + $0x520] sm:$0xff]  ;;  %v3649_v11 = vld [vmem:[#allocation5 + $0x4d8] sm:$0xff] }
 0x27f   : > { %3574 = vmatpush.msrb.mxu1 %v3338_v19  ;;  %v3667_v19 = vld [vmem:[#allocation5 + $0x568] sm:$0xff] }
 0x280   : > { %3616 = vmatpush.msra.mxu0 %v3332_v58  ;;  %v3654_v58 = vld [vmem:[#allocation5 + $0x500] sm:$0xff] }
 0x281   : > { %v3127_v38 = vpop.f32.mrf.mxu0  ;;  %3575 = vmatpush.msrb.mxu1 %v3334_v29  ;;  %v3663_v29 = vld [vmem:[#allocation5 + $0x548] sm:$0xff] }
 0x282   : > { %v3148_v53 = vadd.f32 %v3147_v47, %v3127_v38  ;;  %v3665_v38 = vld [vmem:[#allocation5 + $0x558] sm:$0xff]  ;;  %v3655_v47 = vld [vmem:[#allocation5 + $0x508] sm:$0xff] }
 0x283   : > { %3576 = vmatpush.msrb.mxu1 %v3330_v24  ;;  %v3660_v24 = vld [vmem:[#allocation5 + $0x530] sm:$0xff] }
 0x284   : > { %v3150_v0 = vadd.f32 %v3148_v53, %v3067_v41  ;;  %v3642_v53 = vld [vmem:[#allocation5 + $0x4a0] sm:$0xff]  ;;  %v3645_v41 = vld [vmem:[#allocation5 + $0x4b8] sm:$0xff] }
 0x285   : > { %v3106_v4 = vpop.f32.mrf.mxu3 }
 0x290   : > { %v3086_v46 = vpop.f32.mrf.mxu1 }
 0x291   : > { %v3107_v40 = vadd.f32 %v3106_v4, %v3086_v46  ;;  %v3656_v4 = vld [vmem:[#allocation5 + $0x510] sm:$0xff]  ;;  %v3657_v46 = vld [vmem:[#allocation5 + $0x518] sm:$0xff] }
 0x292   : > { %v3229_v18 = vpop.f32.mrf.mxu0 }
 0x293   : > { %v3230_v14 = vadd.f32 %v3229_v18, %v3209_v15  ;;  %v3109_v23 = vadd.f32 %v3107_v40, %v2987_v37  ;;  %v3650_v18 = vld [vmem:[#allocation5 + $0x4e0] sm:$0xff]  ;;  %v3653_v15 = vld [vmem:[#allocation5 + $0x4f8] sm:$0xff]  ;;  %v3643_v40 = vld [vmem:[#allocation5 + $0x4a8] sm:$0xff] }
 0x294   : > { %v3638_v37 = vld [vmem:[#allocation5 + $0x480] sm:$0xff] }
 0x295   : > { %v3232_v43 = vadd.f32 %v3230_v14, %v3150_v0  ;;  %v3639_v14 = vld [vmem:[#allocation5 + $0x488] sm:$0xff]  ;;  %v3634_v0 = vld [vmem:[#allocation5 + $0x460] sm:$0xff] }
 0x2a1   : > { %v3188_v32 = vpop.f32.mrf.mxu1 }
 0x2a6   : > { %v3168_v36 = vpop.f32.mrf.mxu3 }
 0x2a7   : > { %v3189_v51 = vadd.f32 %v3188_v32, %v3168_v36  ;;  %v3646_v32 = vld [vmem:[#allocation5 + $0x4c0] sm:$0xff]  ;;  %v3647_v36 = vld [vmem:[#allocation5 + $0x4c8] sm:$0xff] }
 0x2a9   : > { %v3191_v63 = vadd.f32 %v3189_v51, %v3109_v23  ;;  %v3640_v51 = vld [vmem:[#allocation5 + $0x490] sm:$0xff]  ;;  %v3635_v23 = vld [vmem:[#allocation5 + $0x468] sm:$0xff] }
 0x2b2   : > { %v3296_v16 = vpop.f32.mrf.mxu0 }
 0x2b3   : > { %v3317_v56 = vadd.f32 %v3316_v21, %v3296_v16  ;;  %v3644_v16 = vld [vmem:[#allocation5 + $0x4b0] sm:$0xff]  ;;  %v3641_v21 = vld [vmem:[#allocation5 + $0x498] sm:$0xff] }
 0x2b5   : > { %v3319_v49 = vadd.f32 %v3317_v56, %v3232_v43  ;;  %v3636_v56 = vld [vmem:[#allocation5 + $0x470] sm:$0xff]  ;;  %v3631_v43 = vld [vmem:[#allocation5 + $0x448] sm:$0xff] }
 0x2b7   : > { %v3275_v61 = vpop.f32.mrf.mxu3 }
 0x2c1   : > { %v3255_v55 = vpop.f32.mrf.mxu1 }
 0x2c2   : > { %v3276_v52 = vadd.f32 %v3275_v61, %v3255_v55  ;;  %v3637_v61 = vld [vmem:[#allocation5 + $0x478] sm:$0xff]  ;;  %v3630_v55 = vld [vmem:[#allocation5 + $0x440] sm:$0xff] }
 0x2c4   : > { %v3278_v31 = vadd.f32 %v3276_v52, %v3191_v63  ;;  %v3632_v63 = vld [vmem:[#allocation5 + $0x450] sm:$0xff]  ;;  %v3633_v52 = vld [vmem:[#allocation5 + $0x458] sm:$0xff] }
 0x2c6   : > { %v3321_v39 = vmax.f32 %v3278_v31, %v3319_v49  ;;  %v3626_v49 = vld [vmem:[#allocation5 + $0x420] sm:$0xff]  ;;  %v3627_v31 = vld [vmem:[#allocation5 + $0x428] sm:$0xff] }
 0x2c8   : > { %v3322_v13 = vmax.f32 %v3320_v54, %v3321_v39  ;;  %v3675_v54 = vld [vmem:[#allocation5 + $0x5a8] sm:$0xff]  ;;  %v3628_v39 = vld [vmem:[#allocation5 + $0x430] sm:$0xff] }
 0x2ca   : > { %v3327_v12 = vadd.f32 %v4506_v42, %v3322_v13  ;;  %v3629_v42 = vld [vmem:[#allocation5 + $0x438] sm:$0xff]  ;;  %v3622_v13 = vld [vmem:[#allocation5 + $0x400] sm:$0xff] }
 0x2cc   : > { %v6744_v22 = vmax.f32 %v3327_v12, 0.0  ;;  %v3623_v12 = vld [vmem:[#allocation5 + $0x408] sm:$0xff] }
 0x2ce   : > { %v3459_v45 = vrot.slane %v6744_v22, 1 }
 0x2d0   : > { %3477 = vmatmul.f32.vlgmr.msrb.gmra.mxu3 %v3459_v45  ;;  %3497 = vmatmul.f32.vlgmr.msra.gmra.mxu1 %v3459_v45 }
 0x2d1   : > { %3517 = vmatmul.f32.vlgmr.msra.gmra.mxu2 %v3459_v45  ;;  %3537 = vmatmul.f32.vlgmr.msrb.gmra.mxu0 %v3459_v45  ;;  %v3624_v45 = vld [vmem:[#allocation5 + $0x410] sm:$0xff] }
 0x2d2   : > { %3688 = vmatpush.msrb.mxu3 %v3682_v25  ;;  %3708 = vmatpush.msra.mxu1 %v3683_v35  ;;  %v3625_v25 = vld [vmem:[#allocation5 + $0x418] sm:$0xff]  ;;  %v3686_v35 = vrot.slane %v6744_v22, 2 }
 0x2d3   : > { %3728 = vmatpush.msra.mxu2 %v3684_v30  ;;  %3748 = vmatpush.msrb.mxu0 %v3685_v3  ;;  %v3833_v30 = vld [vmem:[#allocation5 + $0x7e0] sm:$0xff]  ;;  %v3834_v3 = vld [vmem:[#allocation5 + $0x7e8] sm:$0xff] }
 0x2d4   : > { %3689 = vmatpush.msrb.mxu3 %v3678_v20  ;;  %3709 = vmatpush.msra.mxu1 %v3679_v2  ;;  %v3835_v20 = vld [vmem:[#allocation5 + $0x7f0] sm:$0xff]  ;;  %v3836_v2 = vld [vmem:[#allocation5 + $0x7f8] sm:$0xff] }
 0x2d5   : > { %3729 = vmatpush.msra.mxu2 %v3680_v59  ;;  %3749 = vmatpush.msrb.mxu0 %v3681_v17  ;;  %v3829_v59 = vld [vmem:[#allocation5 + $0x7c0] sm:$0xff]  ;;  %v3830_v17 = vld [vmem:[#allocation5 + $0x7c8] sm:$0xff] }
 0x2d6   : > { %3690 = vmatpush.msrb.mxu3 %v3674_v8  ;;  %3710 = vmatpush.msra.mxu1 %v3675_v54  ;;  %v3831_v8 = vld [vmem:[#allocation5 + $0x7d0] sm:$0xff]  ;;  %v3832_v54 = vld [vmem:[#allocation5 + $0x7d8] sm:$0xff] }
 0x2d7   : > { %3730 = vmatpush.msra.mxu2 %v3676_v50  ;;  %3750 = vmatpush.msrb.mxu0 %v3677_v7  ;;  %v3825_v50 = vld [vmem:[#allocation5 + $0x7a0] sm:$0xff]  ;;  %v3826_v7 = vld [vmem:[#allocation5 + $0x7a8] sm:$0xff] }
 0x2d8   : > { %3691 = vmatpush.msrb.mxu3 %v3670_v1  ;;  %3711 = vmatpush.msra.mxu1 %v3671_v6  ;;  %v3827_v1 = vld [vmem:[#allocation5 + $0x7b0] sm:$0xff]  ;;  %v3828_v6 = vld [vmem:[#allocation5 + $0x7b8] sm:$0xff] }
 0x2d9   : > { %3731 = vmatpush.msra.mxu2 %v3672_v28  ;;  %3751 = vmatpush.msrb.mxu0 %v3673_v48  ;;  %v3821_v28 = vld [vmem:[#allocation5 + $0x780] sm:$0xff]  ;;  %v3822_v48 = vld [vmem:[#allocation5 + $0x788] sm:$0xff] }
 0x2da   : > { %3557 = vmatmul.f32.vlgmr.msra.gmra.mxu3 %v6744_v22  ;;  %3577 = vmatmul.f32.vlgmr.msrb.gmra.mxu1 %v6744_v22 }
 0x2db   : > { %3597 = vmatmul.f32.vlgmr.msrb.gmra.mxu2 %v6744_v22  ;;  %3617 = vmatmul.f32.vlgmr.msra.gmra.mxu0 %v6744_v22 }
 0x2dc   : > { %3692 = vmatpush.msrb.mxu3 %v3666_v10  ;;  %3712 = vmatpush.msra.mxu1 %v3667_v19  ;;  %v3823_v10 = vld [vmem:[#allocation5 + $0x790] sm:$0xff]  ;;  %v3824_v19 = vld [vmem:[#allocation5 + $0x798] sm:$0xff] }
 0x2dd   : > { %3732 = vmatpush.msra.mxu2 %v3668_v26  ;;  %3752 = vmatpush.msrb.mxu0 %v3669_v27  ;;  %v3817_v26 = vld [vmem:[#allocation5 + $0x760] sm:$0xff]  ;;  %v3818_v27 = vld [vmem:[#allocation5 + $0x768] sm:$0xff] }
 0x2de   : > { %3693 = vmatpush.msrb.mxu3 %v3662_v44  ;;  %3713 = vmatpush.msra.mxu1 %v3663_v29  ;;  %v3819_v44 = vld [vmem:[#allocation5 + $0x770] sm:$0xff]  ;;  %v3820_v29 = vld [vmem:[#allocation5 + $0x778] sm:$0xff] }
 0x2df   : > { %3733 = vmatpush.msra.mxu2 %v3664_v9  ;;  %3753 = vmatpush.msrb.mxu0 %v3665_v38  ;;  %v3813_v9 = vld [vmem:[#allocation5 + $0x740] sm:$0xff]  ;;  %v3814_v38 = vld [vmem:[#allocation5 + $0x748] sm:$0xff] }
 0x2e0   : > { %3694 = vmatpush.msrb.mxu3 %v3658_v34  ;;  %3714 = vmatpush.msra.mxu1 %v3659_v62  ;;  %v3815_v34 = vld [vmem:[#allocation5 + $0x750] sm:$0xff]  ;;  %v3816_v62 = vld [vmem:[#allocation5 + $0x758] sm:$0xff] }
 0x2e1   : > { %3734 = vmatpush.msra.mxu2 %v3660_v24  ;;  %3754 = vmatpush.msrb.mxu0 %v3661_v33  ;;  %v3809_v24 = vld [vmem:[#allocation5 + $0x720] sm:$0xff]  ;;  %v3810_v33 = vld [vmem:[#allocation5 + $0x728] sm:$0xff] }
 0x2e2   : > { %3695 = vmatpush.msrb.mxu3 %v3654_v58  ;;  %3715 = vmatpush.msra.mxu1 %v3655_v47  ;;  %v3811_v58 = vld [vmem:[#allocation5 + $0x730] sm:$0xff]  ;;  %v3812_v47 = vld [vmem:[#allocation5 + $0x738] sm:$0xff] }
 0x2e3   : > { %3735 = vmatpush.msra.mxu2 %v3656_v4  ;;  %3755 = vmatpush.msrb.mxu0 %v3657_v46  ;;  %v3805_v4 = vld [vmem:[#allocation5 + $0x700] sm:$0xff]  ;;  %v3806_v46 = vld [vmem:[#allocation5 + $0x708] sm:$0xff] }
 0x2e4   : > { %3696 = vmatpush.msrb.mxu3 %v3650_v18  ;;  %3716 = vmatpush.msra.mxu1 %v3651_v60  ;;  %v3807_v18 = vld [vmem:[#allocation5 + $0x710] sm:$0xff]  ;;  %v3808_v60 = vld [vmem:[#allocation5 + $0x718] sm:$0xff] }
 0x2e5   : > { %3736 = vmatpush.msra.mxu2 %v3652_v57  ;;  %3756 = vmatpush.msrb.mxu0 %v3653_v15  ;;  %v3801_v57 = vld [vmem:[#allocation5 + $0x6e0] sm:$0xff]  ;;  %v3802_v15 = vld [vmem:[#allocation5 + $0x6e8] sm:$0xff] }
 0x2e6   : > { %3697 = vmatpush.msrb.mxu3 %v3646_v32  ;;  %3717 = vmatpush.msra.mxu1 %v3647_v36  ;;  %v3803_v32 = vld [vmem:[#allocation5 + $0x6f0] sm:$0xff]  ;;  %v3804_v36 = vld [vmem:[#allocation5 + $0x6f8] sm:$0xff] }
 0x2e7   : > { %3737 = vmatpush.msra.mxu2 %v3648_v5  ;;  %3757 = vmatpush.msrb.mxu0 %v3649_v11  ;;  %v3797_v5 = vld [vmem:[#allocation5 + $0x6c0] sm:$0xff]  ;;  %v3798_v11 = vld [vmem:[#allocation5 + $0x6c8] sm:$0xff] }
 0x2e8   : > { %3698 = vmatpush.msrb.mxu3 %v3642_v53  ;;  %3718 = vmatpush.msra.mxu1 %v3643_v40  ;;  %v3799_v53 = vld [vmem:[#allocation5 + $0x6d0] sm:$0xff]  ;;  %v3800_v40 = vld [vmem:[#allocation5 + $0x6d8] sm:$0xff] }
 0x2e9   : > { %3738 = vmatpush.msra.mxu2 %v3644_v16  ;;  %3758 = vmatpush.msrb.mxu0 %v3645_v41  ;;  %v3793_v16 = vld [vmem:[#allocation5 + $0x6a0] sm:$0xff]  ;;  %v3794_v41 = vld [vmem:[#allocation5 + $0x6a8] sm:$0xff] }
 0x2ea   : > { %3699 = vmatpush.msrb.mxu3 %v3638_v37  ;;  %3719 = vmatpush.msra.mxu1 %v3639_v14  ;;  %v3795_v37 = vld [vmem:[#allocation5 + $0x6b0] sm:$0xff]  ;;  %v3796_v14 = vld [vmem:[#allocation5 + $0x6b8] sm:$0xff] }
 0x2eb   : > { %3739 = vmatpush.msra.mxu2 %v3640_v51  ;;  %3759 = vmatpush.msrb.mxu0 %v3641_v21  ;;  %v3789_v51 = vld [vmem:[#allocation5 + $0x680] sm:$0xff]  ;;  %v3790_v21 = vld [vmem:[#allocation5 + $0x688] sm:$0xff] }
 0x2ec   : > { %3700 = vmatpush.msrb.mxu3 %v3634_v0  ;;  %3720 = vmatpush.msra.mxu1 %v3635_v23  ;;  %v3791_v0 = vld [vmem:[#allocation5 + $0x690] sm:$0xff]  ;;  %v3792_v23 = vld [vmem:[#allocation5 + $0x698] sm:$0xff] }
 0x2ed   : > { %3740 = vmatpush.msra.mxu2 %v3636_v56  ;;  %3760 = vmatpush.msrb.mxu0 %v3637_v61  ;;  %v3785_v56 = vld [vmem:[#allocation5 + $0x660] sm:$0xff]  ;;  %v3786_v61 = vld [vmem:[#allocation5 + $0x668] sm:$0xff] }
 0x2ee   : > { %3701 = vmatpush.msrb.mxu3 %v3630_v55  ;;  %3721 = vmatpush.msra.mxu1 %v3631_v43  ;;  %v3787_v55 = vld [vmem:[#allocation5 + $0x670] sm:$0xff]  ;;  %v3788_v43 = vld [vmem:[#allocation5 + $0x678] sm:$0xff] }
 0x2ef   : > { %3741 = vmatpush.msra.mxu2 %v3632_v63  ;;  %3761 = vmatpush.msrb.mxu0 %v3633_v52  ;;  %v3781_v63 = vld [vmem:[#allocation5 + $0x640] sm:$0xff]  ;;  %v3782_v52 = vld [vmem:[#allocation5 + $0x648] sm:$0xff] }
 0x2f0   : > { %3702 = vmatpush.msrb.mxu3 %v3626_v49  ;;  %3722 = vmatpush.msra.mxu1 %v3627_v31  ;;  %v3783_v49 = vld [vmem:[#allocation5 + $0x650] sm:$0xff]  ;;  %v3784_v31 = vld [vmem:[#allocation5 + $0x658] sm:$0xff] }
 0x2f1   : > { %3742 = vmatpush.msra.mxu2 %v3628_v39  ;;  %3762 = vmatpush.msrb.mxu0 %v3629_v42  ;;  %v3777_v39 = vld [vmem:[#allocation5 + $0x620] sm:$0xff]  ;;  %v3778_v42 = vld [vmem:[#allocation5 + $0x628] sm:$0xff] }
 0x2f2   : > { %3703 = vmatpush.msrb.mxu3 %v3622_v13  ;;  %3723 = vmatpush.msra.mxu1 %v3623_v12  ;;  %v3779_v13 = vld [vmem:[#allocation5 + $0x630] sm:$0xff]  ;;  %v3780_v12 = vld [vmem:[#allocation5 + $0x638] sm:$0xff] }
 0x2f3   : > { %3743 = vmatpush.msra.mxu2 %v3624_v45  ;;  %3763 = vmatpush.msrb.mxu0 %v3625_v25  ;;  %v3773_v45 = vld [vmem:[#allocation5 + $0x600] sm:$0xff]  ;;  %v3774_v25 = vld [vmem:[#allocation5 + $0x608] sm:$0xff] }
 0x2f4   : > { %3704 = vmatmul.f32.vlgmr.msrb.gmra.mxu3 %v3686_v35  ;;  %3724 = vmatmul.f32.vlgmr.msra.gmra.mxu1 %v3686_v35 }
 0x2f5   : > { %3744 = vmatmul.f32.vlgmr.msra.gmra.mxu2 %v3686_v35  ;;  %3764 = vmatmul.f32.vlgmr.msrb.gmra.mxu0 %v3686_v35  ;;  %v3775_v35 = vld [vmem:[#allocation5 + $0x610] sm:$0xff] }
 0x2f6   : > { %3839 = vmatpush.msra.mxu3 %v3833_v30  ;;  %3859 = vmatpush.msrb.mxu1 %v3834_v3  ;;  %v3776_v30 = vld [vmem:[#allocation5 + $0x618] sm:$0xff]  ;;  %v3837_v3 = vrot.slane %v6744_v22, 3  ;;  %v4003_v22 = vld [vmem:[%s6990_s7 + $0x1f0] sm:$0xff] }
 0x2f7   : > { %3879 = vmatpush.msrb.mxu2 %v3835_v20  ;;  %3899 = vmatpush.msra.mxu0 %v3836_v2  ;;  %v3972_v20 = vld [vmem:[%s6990_s7 + $0xf8] sm:$0xff] }
 0x2f8   : > { %3840 = vmatpush.msra.mxu3 %v3829_v59  ;;  %3860 = vmatpush.msrb.mxu1 %v3830_v17  ;;  %v4004_v2 = vld [vmem:[%s6990_s7 + $0x1f8] sm:$0xff]  ;;  %v3971_v59 = vld [vmem:[%s6990_s7 + $0xf0] sm:$0xff]  ;;  %v3970_v17 = vld [vmem:[%s6990_s7 + $0xe8] sm:$0xff] }
 0x2f9   : > { %3880 = vmatpush.msrb.mxu2 %v3831_v8  ;;  %3900 = vmatpush.msra.mxu0 %v3832_v54  ;;  %v4002_v8 = vld [vmem:[%s6990_s7 + $0x1e8] sm:$0xff]  ;;  %v3956_v54 = vld [vmem:[%s6990_s7 + $0x78] sm:$0xff] }
 0x2fa   : > { %3841 = vmatpush.msra.mxu3 %v3825_v50  ;;  %3861 = vmatpush.msrb.mxu1 %v3826_v7  ;;  %v3988_v50 = vld [vmem:[%s6990_s7 + $0x178] sm:$0xff]  ;;  %v3955_v7 = vld [vmem:[%s6990_s7 + $0x70] sm:$0xff] }
 0x2fb   : > { %3881 = vmatpush.msrb.mxu2 %v3827_v1  ;;  %3901 = vmatpush.msra.mxu0 %v3828_v6  ;;  %v3969_v1 = vld [vmem:[%s6990_s7 + $0xe0] sm:$0xff] }
 0x2fc   : > { %3842 = vmatpush.msra.mxu3 %v3821_v28  ;;  %3862 = vmatpush.msrb.mxu1 %v3822_v48  ;;  %v4001_v6 = vld [vmem:[%s6990_s7 + $0x1e0] sm:$0xff]  ;;  %v3987_v28 = vld [vmem:[%s6990_s7 + $0x170] sm:$0xff]  ;;  %v3954_v48 = vld [vmem:[%s6990_s7 + $0x68] sm:$0xff] }
 0x2fd   : > { %3882 = vmatpush.msrb.mxu2 %v3823_v10  ;;  %3902 = vmatpush.msra.mxu0 %v3824_v19  ;;  %v3986_v10 = vld [vmem:[%s6990_s7 + $0x168] sm:$0xff]  ;;  %v3968_v19 = vld [vmem:[%s6990_s7 + $0xd8] sm:$0xff] }
 0x2fe   : > { %3843 = vmatpush.msra.mxu3 %v3817_v26  ;;  %3863 = vmatpush.msrb.mxu1 %v3818_v27  ;;  %v4000_v26 = vld [vmem:[%s6990_s7 + $0x1d8] sm:$0xff]  ;;  %v3953_v27 = vld [vmem:[%s6990_s7 + $0x60] sm:$0xff] }
 0x2ff   : > { %3883 = vmatpush.msrb.mxu2 %v3819_v44  ;;  %3903 = vmatpush.msra.mxu0 %v3820_v29  ;;  %v3985_v44 = vld [vmem:[%s6990_s7 + $0x160] sm:$0xff]  ;;  %v3967_v29 = vld [vmem:[%s6990_s7 + $0xd0] sm:$0xff] }
 0x300   : > { %3844 = vmatpush.msra.mxu3 %v3813_v9  ;;  %3864 = vmatpush.msrb.mxu1 %v3814_v38  ;;  %v3999_v9 = vld [vmem:[%s6990_s7 + $0x1d0] sm:$0xff]  ;;  %v3952_v38 = vld [vmem:[%s6990_s7 + $0x58] sm:$0xff] }
 0x301   : > { %3884 = vmatpush.msrb.mxu2 %v3815_v34  ;;  %3904 = vmatpush.msra.mxu0 %v3816_v62  ;;  %v3984_v34 = vld [vmem:[%s6990_s7 + $0x158] sm:$0xff]  ;;  %v3966_v62 = vld [vmem:[%s6990_s7 + $0xc8] sm:$0xff] }
 0x302   : > { %3845 = vmatpush.msra.mxu3 %v3809_v24  ;;  %3865 = vmatpush.msrb.mxu1 %v3810_v33  ;;  %v3998_v24 = vld [vmem:[%s6990_s7 + $0x1c8] sm:$0xff]  ;;  %v3951_v33 = vld [vmem:[%s6990_s7 + $0x50] sm:$0xff] }
 0x303   : > { %3885 = vmatpush.msrb.mxu2 %v3811_v58  ;;  %3905 = vmatpush.msra.mxu0 %v3812_v47  ;;  %v3983_v58 = vld [vmem:[%s6990_s7 + $0x150] sm:$0xff]  ;;  %v3965_v47 = vld [vmem:[%s6990_s7 + $0xc0] sm:$0xff] }
 0x304   : > { %3846 = vmatpush.msra.mxu3 %v3805_v4  ;;  %3866 = vmatpush.msrb.mxu1 %v3806_v46  ;;  %v3997_v4 = vld [vmem:[%s6990_s7 + $0x1c0] sm:$0xff]  ;;  %v3950_v46 = vld [vmem:[%s6990_s7 + $0x48] sm:$0xff] }
 0x305   : > { %3886 = vmatpush.msrb.mxu2 %v3807_v18  ;;  %3906 = vmatpush.msra.mxu0 %v3808_v60  ;;  %v3982_v18 = vld [vmem:[%s6990_s7 + $0x148] sm:$0xff]  ;;  %v3964_v60 = vld [vmem:[%s6990_s7 + $0xb8] sm:$0xff] }
 0x306   : > { %3847 = vmatpush.msra.mxu3 %v3801_v57  ;;  %3867 = vmatpush.msrb.mxu1 %v3802_v15  ;;  %v3996_v57 = vld [vmem:[%s6990_s7 + $0x1b8] sm:$0xff]  ;;  %v3949_v15 = vld [vmem:[%s6990_s7 + $0x40] sm:$0xff] }
 0x307   : > { %3887 = vmatpush.msrb.mxu2 %v3803_v32  ;;  %3907 = vmatpush.msra.mxu0 %v3804_v36  ;;  %v3981_v32 = vld [vmem:[%s6990_s7 + $0x140] sm:$0xff]  ;;  %v3963_v36 = vld [vmem:[%s6990_s7 + $0xb0] sm:$0xff] }
 0x308   : > { %3848 = vmatpush.msra.mxu3 %v3797_v5  ;;  %3868 = vmatpush.msrb.mxu1 %v3798_v11  ;;  %v3995_v5 = vld [vmem:[%s6990_s7 + $0x1b0] sm:$0xff]  ;;  %v3948_v11 = vld [vmem:[%s6990_s7 + $0x38] sm:$0xff] }
 0x309   : > { %3888 = vmatpush.msrb.mxu2 %v3799_v53  ;;  %3908 = vmatpush.msra.mxu0 %v3800_v40  ;;  %v3980_v53 = vld [vmem:[%s6990_s7 + $0x138] sm:$0xff]  ;;  %v3962_v40 = vld [vmem:[%s6990_s7 + $0xa8] sm:$0xff] }
 0x30a   : > { %3849 = vmatpush.msra.mxu3 %v3793_v16  ;;  %3869 = vmatpush.msrb.mxu1 %v3794_v41  ;;  %v3994_v16 = vld [vmem:[%s6990_s7 + $0x1a8] sm:$0xff]  ;;  %v3961_v41 = vld [vmem:[%s6990_s7 + $0xa0] sm:$0xff] }
 0x30b   : > { %3889 = vmatpush.msrb.mxu2 %v3795_v37  ;;  %3909 = vmatpush.msra.mxu0 %v3796_v14  ;;  %v3993_v37 = vld [vmem:[%s6990_s7 + $0x1a0] sm:$0xff]  ;;  %v3947_v14 = vld [vmem:[%s6990_s7 + $0x30] sm:$0xff] }
 0x30c   : > { %3850 = vmatpush.msra.mxu3 %v3789_v51  ;;  %3870 = vmatpush.msrb.mxu1 %v3790_v21  ;;  %v3960_v51 = vld [vmem:[%s6990_s7 + $0x98] sm:$0xff]  ;;  %v3979_v21 = vld [vmem:[%s6990_s7 + $0x130] sm:$0xff] }
 0x30d   : > { %3890 = vmatpush.msrb.mxu2 %v3791_v0  ;;  %3910 = vmatpush.msra.mxu0 %v3792_v23  ;;  %v3992_v0 = vld [vmem:[%s6990_s7 + $0x198] sm:$0xff]  ;;  %v3946_v23 = vld [vmem:[%s6990_s7 + $0x28] sm:$0xff] }
 0x30e   : > { %3851 = vmatpush.msra.mxu3 %v3785_v56  ;;  %3871 = vmatpush.msrb.mxu1 %v3786_v61  ;;  %v3959_v56 = vld [vmem:[%s6990_s7 + $0x90] sm:$0xff]  ;;  %v3978_v61 = vld [vmem:[%s6990_s7 + $0x128] sm:$0xff] }
 0x30f   : > { %3891 = vmatpush.msrb.mxu2 %v3787_v55  ;;  %3911 = vmatpush.msra.mxu0 %v3788_v43  ;;  %v3991_v55 = vld [vmem:[%s6990_s7 + $0x190] sm:$0xff]  ;;  %v3945_v43 = vld [vmem:[%s6990_s7 + $0x20] sm:$0xff] }
 0x310   : > { %3852 = vmatpush.msra.mxu3 %v3781_v63  ;;  %3872 = vmatpush.msrb.mxu1 %v3782_v52  ;;  %v3958_v63 = vld [vmem:[%s6990_s7 + $0x88] sm:$0xff]  ;;  %v3977_v52 = vld [vmem:[%s6990_s7 + $0x120] sm:$0xff] }
 0x311   : > { %3892 = vmatpush.msrb.mxu2 %v3783_v49  ;;  %3912 = vmatpush.msra.mxu0 %v3784_v31  ;;  %v3990_v49 = vld [vmem:[%s6990_s7 + $0x188] sm:$0xff] }
 0x312   : > { %3853 = vmatpush.msra.mxu3 %v3777_v39  ;;  %3873 = vmatpush.msrb.mxu1 %v3778_v42  ;;  %v3944_v39 = vld [vmem:[%s6990_s7 + $0x18] sm:$0xff]  ;;  %v3957_v42 = vld [vmem:[%s6990_s7 + $0x80] sm:$0xff] }
 0x313   : > { %3893 = vmatpush.msrb.mxu2 %v3779_v13  ;;  %3913 = vmatpush.msra.mxu0 %v3780_v12  ;;  %v3976_v13 = vld [vmem:[%s6990_s7 + $0x118] sm:$0xff] }
 0x314   : > { %3854 = vmatpush.msra.mxu3 %v3773_v45  ;;  %3874 = vmatpush.msrb.mxu1 %v3774_v25  ;;  %v3989_v45 = vld [vmem:[%s6990_s7 + $0x180] sm:$0xff]  ;;  %v3943_v25 = vld [vmem:[%s6990_s7 + $0x10] sm:$0xff] }
 0x315   : > { %3894 = vmatpush.msrb.mxu2 %v3775_v35  ;;  %3914 = vmatpush.msra.mxu0 %v3776_v30  ;;  %v3975_v35 = vld [vmem:[%s6990_s7 + $0x110] sm:$0xff]  ;;  %v3942_v30 = vld [vmem:[%s6990_s7 + $0x8] sm:$0xff] }
 0x316   : > { %3855 = vmatmul.f32.vlgmr.msra.gmra.mxu3 %v3837_v3  ;;  %3875 = vmatmul.f32.vlgmr.msrb.gmra.mxu1 %v3837_v3 }
 0x317   : > { %3895 = vmatmul.f32.vlgmr.msrb.gmra.mxu2 %v3837_v3  ;;  %3915 = vmatmul.f32.vlgmr.msra.gmra.mxu0 %v3837_v3  ;;  %v3974_v3 = vld [vmem:[%s6990_s7 + $0x108] sm:$0xff] }
 0x318   : > { %4026 = vmatpush.msra.mxu1 %v3972_v20  ;;  %4066 = vmatpush.msrb.mxu0 %v4004_v2  ;;  %v3941_v2 = vld [vmem:[%s6990_s7] sm:$0xff] }
 0x319   : > { %4006 = vmatpush.msrb.mxu3 %v3956_v54  ;;  %4046 = vmatpush.msra.mxu2 %v3988_v50 }
 0x31a   : > { %4027 = vmatpush.msra.mxu1 %v3971_v59  ;;  %4067 = vmatpush.msrb.mxu0 %v4003_v22  ;;  %v3973_v59 = vld [vmem:[%s6990_s7 + $0x100] sm:$0xff] }
 0x31b   : > { %4007 = vmatpush.msrb.mxu3 %v3955_v7  ;;  %4047 = vmatpush.msra.mxu2 %v3987_v28 }
 0x31c   : > { %4028 = vmatpush.msra.mxu1 %v3970_v17  ;;  %4068 = vmatpush.msrb.mxu0 %v4002_v8 }
 0x31d   : > { %4008 = vmatpush.msrb.mxu3 %v3954_v48  ;;  %4048 = vmatpush.msra.mxu2 %v3986_v10 }
 0x31e   : > { %4029 = vmatpush.msra.mxu1 %v3969_v1  ;;  %4069 = vmatpush.msrb.mxu0 %v4001_v6  ;;  %v3923_v6 = vld [vmem:[%s6989_s6] sm:$0xf] }
 0x31f   : > { %4009 = vmatpush.msrb.mxu3 %v3953_v27  ;;  %4049 = vmatpush.msra.mxu2 %v3985_v44  ;;  %v3926_v27 = vperm.slane %v3923_v6, 1 }
 0x320   : > { %4030 = vmatpush.msra.mxu1 %v3968_v19  ;;  %4070 = vmatpush.msrb.mxu0 %v4000_v26 }
 0x321   : > { %4010 = vmatpush.msrb.mxu3 %v3952_v38  ;;  %4050 = vmatpush.msra.mxu2 %v3984_v34 }
 0x322   : > { %4031 = vmatpush.msra.mxu1 %v3967_v29  ;;  %4071 = vmatpush.msrb.mxu0 %v3999_v9  ;;  %v3928_v9 = vperm.slane %v3923_v6, 3 }
 0x323   : > { %4011 = vmatpush.msrb.mxu3 %v3951_v33  ;;  %4051 = vmatpush.msra.mxu2 %v3983_v58 }
 0x324   : > { %4032 = vmatpush.msra.mxu1 %v3966_v62  ;;  %4072 = vmatpush.msrb.mxu0 %v3998_v24 }
 0x325   : > { %4012 = vmatpush.msrb.mxu3 %v3950_v46  ;;  %4052 = vmatpush.msra.mxu2 %v3982_v18  ;;  %v3925_v18 = vperm.slane %v3923_v6, 0 }
 0x326   : > { %4033 = vmatpush.msra.mxu1 %v3965_v47  ;;  %4073 = vmatpush.msrb.mxu0 %v3997_v4 }
 0x327   : > { %4013 = vmatpush.msrb.mxu3 %v3949_v15  ;;  %4053 = vmatpush.msra.mxu2 %v3981_v32  ;;  %v3927_v32 = vperm.slane %v3923_v6, 2 }
 0x328   : > { %4034 = vmatpush.msra.mxu1 %v3964_v60  ;;  %4074 = vmatpush.msrb.mxu0 %v3996_v57 }
 0x329   : > { %4014 = vmatpush.msrb.mxu3 %v3948_v11  ;;  %4054 = vmatpush.msra.mxu2 %v3980_v53 }
 0x32a   : > { %4035 = vmatpush.msra.mxu1 %v3963_v36  ;;  %4075 = vmatpush.msrb.mxu0 %v3995_v5 }
 0x32b   : > { %4015 = vmatpush.msrb.mxu3 %v3947_v14  ;;  %4055 = vmatpush.msra.mxu2 %v3979_v21 }
 0x32c   : > { %4036 = vmatpush.msra.mxu1 %v3962_v40  ;;  %4076 = vmatpush.msrb.mxu0 %v3994_v16 }
 0x32d   : > { %4016 = vmatpush.msrb.mxu3 %v3946_v23  ;;  %4056 = vmatpush.msra.mxu2 %v3978_v61 }
 0x32e   : > { %4037 = vmatpush.msra.mxu1 %v3961_v41  ;;  %4077 = vmatpush.msrb.mxu0 %v3993_v37  ;;  %v4005_v37 = vld [vmem:[%s6991_s8] sm:$0x1] }
 0x32f   : > { %4017 = vmatpush.msrb.mxu3 %v3945_v43  ;;  %4057 = vmatpush.msra.mxu2 %v3977_v52 }
 0x330   : > { %4038 = vmatpush.msra.mxu1 %v3960_v51  ;;  %4078 = vmatpush.msrb.mxu0 %v3992_v0 }
 0x331   : > { %4018 = vmatpush.msrb.mxu3 %v3944_v39  ;;  %4058 = vmatpush.msra.mxu2 %v3976_v13 }
 0x332   : > { %4039 = vmatpush.msra.mxu1 %v3959_v56  ;;  %4079 = vmatpush.msrb.mxu0 %v3991_v55 }
 0x333   : > { %4019 = vmatpush.msrb.mxu3 %v3943_v25  ;;  %4059 = vmatpush.msra.mxu2 %v3975_v35 }
 0x334   : > { %4040 = vmatpush.msra.mxu1 %v3958_v63  ;;  %4080 = vmatpush.msrb.mxu0 %v3990_v49 }
 0x335   : > { %4020 = vmatpush.msrb.mxu3 %v3942_v30  ;;  %4060 = vmatpush.msra.mxu2 %v3974_v3 }
 0x336   : > { %4041 = vmatpush.msra.mxu1 %v3957_v42  ;;  %4081 = vmatpush.msrb.mxu0 %v3989_v45 }
 0x337   : > { %4021 = vmatpush.msrb.mxu3 %v3941_v2  ;;  %4061 = vmatpush.msra.mxu2 %v3973_v59 }
 0x34d   : > { %v3498_v31 = vpop.f32.mrf.mxu1 }
 0x34e   : > { %v3538_v12 = vpop.f32.mrf.mxu0 }
 0x353   : > { %v3478_v20 = vpop.f32.mrf.mxu3 }
 0x354   : > { %v3518_v22 = vpop.f32.mrf.mxu2 }
 0x357   : > { %v3578_v17 = vpop.f32.mrf.mxu1 }
 0x358   : > { %v3618_v8 = vpop.f32.mrf.mxu0  ;;  %v3579_v28 = vadd.f32 %v3578_v17, %v3498_v31 }
 0x359   : > { %v3619_v48 = vadd.f32 %v3618_v8, %v3538_v12 }
 0x35d   : > { %v3558_v54 = vpop.f32.mrf.mxu3 }
 0x35e   : > { %v3598_v50 = vpop.f32.mrf.mxu2  ;;  %v3559_v24 = vadd.f32 %v3558_v54, %v3478_v20 }
 0x35f   : > { %v3599_v58 = vadd.f32 %v3598_v50, %v3518_v22 }
 0x371   : > { %v3725_v7 = vpop.f32.mrf.mxu1 }
 0x372   : > { %v3765_v1 = vpop.f32.mrf.mxu0  ;;  %v3769_v19 = vadd.f32 %v3725_v7, %v3579_v28 }
 0x373   : > { %v3771_v44 = vadd.f32 %v3765_v1, %v3619_v48 }
 0x377   : > { %v3705_v10 = vpop.f32.mrf.mxu3 }
 0x378   : > { %v3745_v26 = vpop.f32.mrf.mxu2  ;;  %v3768_v4 = vadd.f32 %v3705_v10, %v3559_v24 }
 0x379   : > { %v3770_v60 = vadd.f32 %v3745_v26, %v3599_v58 }
 0x393   : > { %v3876_v29 = vpop.f32.mrf.mxu1 }
 0x394   : > { %v3920_v38 = vadd.f32 %v3876_v29, %v3769_v19  ;;  %v3916_v34 = vpop.f32.mrf.mxu0 }
 0x395   : > { %v3922_v62 = vadd.f32 %v3916_v34, %v3771_v44 }
 0x396   : > { %v3934_v33 = vadd.f32 %v3926_v27, %v3920_v38 }
 0x397   : > { %v3936_v47 = vadd.f32 %v3928_v9, %v3922_v62 }
 0x398   : > { %v3938_v46 = vmax.f32 %v3934_v33, 0.0 }
 0x399   : > { %v3940_v57 = vmax.f32 %v3936_v47, 0.0  ;;  %v3856_v15 = vpop.f32.mrf.mxu3 }
 0x39a   : > { %v3919_v36 = vadd.f32 %v3856_v15, %v3768_v4  ;;  %v3896_v5 = vpop.f32.mrf.mxu2  ;;  %4042 = vmatmul.f32.vlgmr.msra.gmra.mxu1 %v3938_v46 }
 0x39b   : > { %v3921_v11 = vadd.f32 %v3896_v5, %v3770_v60  ;;  %4082 = vmatmul.f32.vlgmr.msrb.gmra.mxu0 %v3940_v57 }
 0x39c   : > { %v3933_v53 = vadd.f32 %v3925_v18, %v3919_v36 }
 0x39d   : > { %v3935_v40 = vadd.f32 %v3927_v32, %v3921_v11 }
 0x39e   : > { %v3937_v16 = vmax.f32 %v3933_v53, 0.0 }
 0x39f   : > { %v3939_v41 = vmax.f32 %v3935_v40, 0.0 }
 0x3a0   : > { %4022 = vmatmul.f32.vlgmr.msrb.gmra.mxu3 %v3937_v16 }
 0x3a1   : > { %4062 = vmatmul.f32.vlgmr.msra.gmra.mxu2 %v3939_v41 }
 0x417   : > { %v4043_v21 = vpop.f32.mrf.mxu1 }
 0x418   : > { %v4083_v61 = vpop.f32.mrf.mxu0 }
 0x423   : > { %v4023_v14 = vpop.f32.mrf.mxu3 }
 0x424   : > { %v4024_v51 = vadd.f32 %v4023_v14, %v4005_v37  ;;  %v4063_v23 = vpop.f32.mrf.mxu2 }
 0x426   : > { %v4044_v0 = vadd.f32 %v4043_v21, %v4024_v51 }
 0x428   : > { %v4064_v56 = vadd.f32 %v4063_v23, %v4044_v0 }
 0x42a   : > { %v4084_v55 = vadd.f32 %v4083_v61, %v4064_v56 }
 0x42c   : > { %4086 = vst [vmem:[%s358_s24] sm:$0x1] %v4084_v55 }
 0x42d   : > { %4687 = shalt.err (!%p4684_p8)
}
 0x42e   : > { %4450 = dma.vmem_to_hbm [thread:$0]  (%p4826_p5), %s4099_s21, 16, %s4101_s25, %s4088_s26  }
 0x42f PF: > { %p4467_p9 = scmp.ge.s32.totalorder %s4730_s12, 2  ;;  %s4112_s16 = sand.u32 1, %s4718_s30  }
 0x430   : > { %s4113_s23 = scalar_lea.sflag [#allocation4], %s4112_s16 }
 0x431   : > { %p4460_p10 = pnand %p4467_p9, %p4830_p6 }
 0x433   : > { %p4461_p11 = pneg %p4460_p10 }
 0x435   : > { %4713 = dma.done.wait (%p4461_p11), %s4113_s23, 16  }
 0x436   : > { %4715 = vsyncadd (%p4461_p11), %s4113_s23, 4294967280  ;;  %p21_p12 = scmp.ge.s32.totalorder %s4813_s15, 4   ;;  %s7419_s30 = smov %s4722_s10 }
 0x437   : > { %s7420_s10 = smov %s4726_s11  ;;  %s7421_s11 = smov %s4824_s18 }
 0x438   : > { %s7422_s12 = smov %s4813_s15  ;;  %23 = sbr.rel (!%p21_p12) target bundleno = 7 (0x7), region = 121 }
 0x43d   :  { %4118 = vsyncpa [#allocation3], 1 }
 0x43e   :  { %4120 = vsyncpa [#allocation3 + $0x1], 1 }
 0x43f   :  { %4121 = vsyncpa [#allocation6], 1 }
 0x440   :  { %4122 = vsyncpa [#allocation4], 1 }
 0x441   :  { %4124 = vsyncpa [#allocation4 + $0x1], 1 }

</bundles_post_ra>
